<compile_context>
chip_gen: v7x
topology: tpu7x:2x2x1
jax: 0.10.0
libtpu: 0.0.40
codegen_flags: <defaults>
</compile_context>

<pallas_src>
import functools

import jax
import jax.numpy as jnp
import numpy as np
from jax import lax
from jax.experimental import pallas as pl
from jax.experimental.pallas import tpu as pltpu


def _round_up(x, m):
    return ((x + m - 1) // m) * m


# Packed gate order inside the kernel: [i, f, o, g]  (PyTorch stores [i, f, g, o]).
# Grouping the three sigmoid gates into the leading 3*Hp lanes lets the kernel issue
# a single sigmoid call over a contiguous, lane-aligned window per timestep.
_GATE_PERM = (0, 1, 3, 2)


def _pack_gates(w, h_dim, hp):
    """(R, 4*H) PyTorch [i,f,g,o] -> (R, 4*Hp) kernel order [i,f,o,g], each gate
    zero-padded from H to Hp columns (Hp a multiple of 128)."""
    r = w.shape[0]
    w4 = w.reshape(r, 4, h_dim)[:, list(_GATE_PERM), :]
    w4 = jnp.pad(w4, ((0, 0), (0, 0), (0, hp - h_dim)))
    return w4.reshape(r, 4 * hp)


def _lstm_chunk_kernel(x_ref, wih_ref, whh_ref, b_ref,
                       out_ref, hN_ref, cN_ref,
                       xg_sc, h_sc, c_sc,
                       *, seq_len, needs_mask):
    """One (batch-tile, time-chunk) block of the LSTM recurrence.

    grid = (n_batch_tiles [parallel], n_time_chunks [arbitrary/sequential]).
    h/c persist across chunks in VMEM scratch; within a chunk they are fori_loop
    carry values.
    """
    chunk = pl.program_id(1)
    n_chunks = pl.num_programs(1)

    T, Bt, Ep = x_ref.shape
    Hp = whh_ref.shape[0]

    # ---- Bulk input projection for the whole chunk: one big bf16 MXU matmul with
    #      f32 accumulation, plus the f32 bias, into VMEM scratch.
    x2 = x_ref[...].reshape(T * Bt, Ep)
    xg_sc[...] = (jnp.dot(x2, wih_ref[...], preferred_element_type=jnp.float32)
                  + b_ref[...])

    # ---- Zero-init the h/c carry at the first chunk of each batch tile.
    @pl.when(chunk == 0)
    def _():
        h_sc[...] = jnp.zeros_like(h_sc)
        c_sc[...] = jnp.zeros_like(c_sc)

    chunk_base = chunk * T

    def run_steps(masked):
        def step(t, carry):
            h, c = carry
            row = pl.multiple_of(t * Bt, Bt)
            # Only the small recurrent matmul is sequential (bf16 operands, f32 acc).
            gates = (xg_sc[pl.ds(row, Bt), :]
                     + jnp.dot(h.astype(jnp.bfloat16), whh_ref[...],
                               preferred_element_type=jnp.float32))
            # Gate layout [i, f, o, g]; all slices are 128-lane aligned.
            sig = jax.nn.sigmoid(gates[:, :3 * Hp])
            i_g = sig[:, 0 * Hp:1 * Hp]
            f_g = sig[:, 1 * Hp:2 * Hp]
            o_g = sig[:, 2 * Hp:3 * Hp]
            g_g = jnp.tanh(gates[:, 3 * Hp:])
            c_new = f_g * c + i_g * g_g
            h_new = o_g * jnp.tanh(c_new)
            if masked:
                # Padded timesteps at the end of the sequence must not advance h/c.
                valid = (chunk_base + t) < seq_len
                h_new = jnp.where(valid, h_new, h)
                c_new = jnp.where(valid, c_new, c)
            out_ref[t] = h_new
            return h_new, c_new

        h_fin, c_fin = lax.fori_loop(0, T, step, (h_sc[...], c_sc[...]),
                                     unroll=(True if T <= 16 else 4))
        h_sc[...] = h_fin
        c_sc[...] = c_fin

    if needs_mask:
        # The tail mask is only needed in the very last chunk; keep the two selects
        # out of the serial dependency chain everywhere else.
        @pl.when(chunk < n_chunks - 1)
        def _():
            run_steps(False)

        @pl.when(chunk == n_chunks - 1)
        def _():
            run_steps(True)
    else:
        run_steps(False)

    # ---- Final states written once per batch tile (last chunk only).
    @pl.when(chunk == n_chunks - 1)
    def _():
        hN_ref[...] = h_sc[...]
        cN_ref[...] = c_sc[...]


def _vmem_usage_bytes(t_chunk, b_tile, Ep, Hp):
    """Conservative per-core VMEM estimate (double-buffered I/O blocks, weights
    counted double-buffered in case single-buffering is unavailable, f32 scratch)."""
    x_blk = 2 * t_chunk * b_tile * Ep * 2            # bf16 input chunk, 2 buffers
    out_blk = 2 * t_chunk * b_tile * Hp * 4          # f32 output chunk, 2 buffers
    state_blk = 2 * 2 * b_tile * Hp * 4              # h_n / c_n blocks, 2 buffers each
    w = 2 * (Ep + Hp) * 4 * Hp * 2                   # bf16 W_ih / W_hh, 2 buffers
    bias = 2 * 4 * Hp * 4                            # f32 bias
    xg = t_chunk * b_tile * 4 * Hp * 4               # f32 chunk projection scratch
    hc = 2 * b_tile * Hp * 4                         # h/c carry scratch
    return x_blk + out_blk + state_blk + w + bias + xg + hc


def lstm_forward_pallas(x_emb, w_ih, w_hh, bias, *, t_chunk=None, b_tile=None,
                        vmem_budget_bytes=40 << 20):
    """x_emb: (S, B, E) f32. Returns out (S, B, H), h_n (B, H), c_n (B, H) in f32."""
    S, B, E = x_emb.shape
    H = w_hh.shape[0]

    Ep = _round_up(E, 128)          # lane-aligned embedding width
    Hp = _round_up(H, 128)          # lane-aligned hidden width (per gate)

    # --- Tile selection: big batch tiles fill MXU rows on the serial recurrent
    # matmul; t_chunk is shrunk first so the kernel also fits v7x's 64 MiB VMEM.
    if b_tile is None:
        b_tile = min(128, _round_up(B, 16))          # multiple of 16 (bf16 sublanes)
    if t_chunk is None:
        t_chunk = min(S, 128)
    while _vmem_usage_bytes(t_chunk, b_tile, Ep, Hp) > vmem_budget_bytes and t_chunk > 8:
        t_chunk = max(8, t_chunk // 2)
    while _vmem_usage_bytes(t_chunk, b_tile, Ep, Hp) > vmem_budget_bytes and b_tile > 16:
        b_tile = max(16, (b_tile // 2) // 16 * 16)

    Bp = _round_up(B, b_tile)
    S_pad = _round_up(S, t_chunk)
    n_chunks = S_pad // t_chunk
    n_btiles = Bp // b_tile

    # --- Zero-pad activations / parameters. Zero padding is exact: padded weight
    # rows/cols contribute 0 and padded h/c lanes stay 0. bf16 only on the MXU
    # operands (f32 accumulation + f32 gate math keeps accuracy).
    x_p = jnp.pad(x_emb, ((0, S_pad - S), (0, Bp - B), (0, Ep - E))).astype(jnp.bfloat16)
    w_ih_p = jnp.pad(_pack_gates(w_ih, H, Hp), ((0, Ep - E), (0, 0))).astype(jnp.bfloat16)
    w_hh_p = jnp.pad(_pack_gates(w_hh, H, Hp), ((0, Hp - H), (0, 0))).astype(jnp.bfloat16)
    b_p = _pack_gates(bias, H, Hp)                   # (1, 4*Hp) f32

    kernel = functools.partial(_lstm_chunk_kernel,
                               seq_len=S, needs_mask=(S_pad != S))

    needed = _vmem_usage_bytes(t_chunk, b_tile, Ep, Hp)
    vmem_limit = int(min(64 << 20, max(32 << 20, needed + (4 << 20))))
    compiler_params = pltpu.CompilerParams(
        # batch tiles are independent (megacore-shardable); time is sequential
        dimension_semantics=("parallel", "arbitrary"),
        vmem_limit_bytes=vmem_limit)

    out_shapes = (
        jax.ShapeDtypeStruct((S_pad, Bp, Hp), jnp.float32),
        jax.ShapeDtypeStruct((Bp, Hp), jnp.float32),
        jax.ShapeDtypeStruct((Bp, Hp), jnp.float32),
    )

    def _run(single_buffer_weights):
        w_kwargs = ({"pipeline_mode": pl.Buffered(1)}
                    if single_buffer_weights else {})
        grid_spec = pltpu.PrefetchScalarGridSpec(
            num_scalar_prefetch=0,
            grid=(n_btiles, n_chunks),
            in_specs=[
                pl.BlockSpec((t_chunk, b_tile, Ep), lambda b, c: (c, b, 0)),   # x chunk
                pl.BlockSpec((Ep, 4 * Hp), lambda b, c: (0, 0), **w_kwargs),   # W_ih
                pl.BlockSpec((Hp, 4 * Hp), lambda b, c: (0, 0), **w_kwargs),   # W_hh
                pl.BlockSpec((1, 4 * Hp), lambda b, c: (0, 0), **w_kwargs),    # bias
            ],
            out_specs=[
                pl.BlockSpec((t_chunk, b_tile, Hp), lambda b, c: (c, b, 0)),   # out chunk
                pl.BlockSpec((b_tile, Hp), lambda b, c: (b, 0)),               # h_n
                pl.BlockSpec((b_tile, Hp), lambda b, c: (b, 0)),               # c_n
            ],
            scratch_shapes=[
                pltpu.VMEM((t_chunk * b_tile, 4 * Hp), jnp.float32),  # chunk input proj
                pltpu.VMEM((b_tile, Hp), jnp.float32),                # h carry
                pltpu.VMEM((b_tile, Hp), jnp.float32),                # c carry
            ],
        )
        return pl.pallas_call(
            kernel, out_shape=out_shapes, grid_spec=grid_spec,
            compiler_params=compiler_params,
        )(x_p, w_ih_p, w_hh_p, b_p)

    try:
        out_p, h_p, c_p = jax.block_until_ready(_run(True))
    except Exception:
        # pl.Buffered(1) on the resident weights is purely a VMEM optimization;
        # fall back to default double-buffered specs if this build rejects it.
        out_p, h_p, c_p = jax.block_until_ready(_run(False))

    return out_p[:S, :B, :H], h_p[:B, :H], c_p[:B, :H]


class EncoderPallas:
    """JAX/Pallas port of the PyTorch Encoder (num_layers=1, unidirectional LSTM)."""

    def __init__(self, src_vocab_size, embedding, h_dim, key):
        self.vocab_size = src_vocab_size
        self.embedding_size = embedding
        self.h_dim = h_dim
        k0, k1, k2, k3, k4 = jax.random.split(key, 5)
        scale = 1.0 / np.sqrt(h_dim)
        # Deterministic synthetic parameters (same shapes as nn.Embedding / nn.LSTM).
        self.emb_table = jax.random.normal(
            k0, (src_vocab_size, embedding), jnp.float32)
        # Stored transposed relative to PyTorch (E,4H)/(H,4H), gate order [i,f,g,o].
        self.w_ih = jax.random.uniform(
            k1, (embedding, 4 * h_dim), jnp.float32, -scale, scale)
        self.w_hh = jax.random.uniform(
            k2, (h_dim, 4 * h_dim), jnp.float32, -scale, scale)
        b_ih = jax.random.uniform(k3, (4 * h_dim,), jnp.float32, -scale, scale)
        b_hh = jax.random.uniform(k4, (4 * h_dim,), jnp.float32, -scale, scale)
        self.bias = (b_ih + b_hh).reshape(1, 4 * h_dim)

    def __call__(self, tokens):
        # tokens: (S, B) int32
        # TODO(synk): fuse this gather into the kernel (scalar-prefetch token ids,
        #             HBM-resident table + DMA row gather) to avoid the (S,B,E) round trip.
        x = jnp.take(self.emb_table, tokens, axis=0)   # embedding lookup (glue)
        # dropout_p = 0.0 -> identity (matches nn.Dropout(0.0))
        out, h_n, c_n = lstm_forward_pallas(x, self.w_ih, self.w_hh, self.bias)
        states = (h_n[None, :, :], c_n[None, :, :])    # (num_layers=1, B, H)
        return out, states


def _lstm_reference_f32(x_emb, w_ih, w_hh, bias):
    """Pure-JAX f32 reference (lax.scan) — matches the PyTorch module semantics."""
    H = w_hh.shape[0]

    def step(carry, x_t):
        h, c = carry
        gates = x_t @ w_ih + h @ w_hh + bias
        i = jax.nn.sigmoid(gates[:, 0 * H:1 * H])
        f = jax.nn.sigmoid(gates[:, 1 * H:2 * H])
        g = jnp.tanh(gates[:, 2 * H:3 * H])
        o = jax.nn.sigmoid(gates[:, 3 * H:4 * H])
        c = f * c + i * g
        h = o * jnp.tanh(c)
        return (h, c), h

    B = x_emb.shape[1]
    init = (jnp.zeros((B, H), jnp.float32), jnp.zeros((B, H), jnp.float32))
    (h_n, c_n), outs = lax.scan(step, init, x_emb)
    return outs, h_n, c_n


def _lstm_reference_mixed(x_emb, w_ih, w_hh, bias):
    """Mixed-precision reference matching the kernel's numerics: bf16 MXU operands,
    f32 accumulation, f32 gate math."""
    H = w_hh.shape[0]
    x_bf = x_emb.astype(jnp.bfloat16)
    wih_bf = w_ih.astype(jnp.bfloat16)
    whh_bf = w_hh.astype(jnp.bfloat16)

    def step(carry, x_t):
        h, c = carry
        gates = (jnp.dot(x_t, wih_bf, preferred_element_type=jnp.float32) + bias
                 + jnp.dot(h.astype(jnp.bfloat16), whh_bf,
                           preferred_element_type=jnp.float32))
        i = jax.nn.sigmoid(gates[:, 0 * H:1 * H])
        f = jax.nn.sigmoid(gates[:, 1 * H:2 * H])
        g = jnp.tanh(gates[:, 2 * H:3 * H])
        o = jax.nn.sigmoid(gates[:, 3 * H:4 * H])
        c = f * c + i * g
        h = o * jnp.tanh(c)
        return (h, c), h

    B = x_emb.shape[1]
    init = (jnp.zeros((B, H), jnp.float32), jnp.zeros((B, H), jnp.float32))
    (h_n, c_n), outs = lax.scan(step, init, x_bf)
    return outs, h_n, c_n


if __name__ == "__main__":
    key = jax.random.PRNGKey(0)
    k_param, k_tok = jax.random.split(key)

    SRC_VOCAB = 50
    EMB = 32
    H_DIM = 32
    SEQ = 8
    BATCH = 2

    enc = EncoderPallas(SRC_VOCAB, EMB, H_DIM, k_param)
    tokens = jax.random.randint(k_tok, (SEQ, BATCH), 0, SRC_VOCAB, jnp.int32)

    out, (h_n, c_n) = enc(tokens)
    out = jax.block_until_ready(out)
    h_n = jax.block_until_ready(h_n)
    c_n = jax.block_until_ready(c_n)

    x_emb = jnp.take(enc.emb_table, tokens, axis=0)

    # Primary check: kernel vs a reference with the same bf16-matmul / f32-gate numerics.
    m_out, m_h, m_c = _lstm_reference_mixed(x_emb, enc.w_ih, enc.w_hh, enc.bias)
    np.testing.assert_allclose(np.asarray(out), np.asarray(m_out), rtol=1e-3, atol=1e-3)
    np.testing.assert_allclose(np.asarray(h_n[0]), np.asarray(m_h), rtol=1e-3, atol=1e-3)
    np.testing.assert_allclose(np.asarray(c_n[0]), np.asarray(m_c), rtol=1e-3, atol=1e-3)

    # Secondary check: within bf16 tolerance of the full-f32 (PyTorch-equivalent) math.
    r_out, r_h, r_c = _lstm_reference_f32(x_emb, enc.w_ih, enc.w_hh, enc.bias)
    np.testing.assert_allclose(np.asarray(out), np.asarray(r_out), rtol=5e-2, atol=5e-2)
    np.testing.assert_allclose(np.asarray(h_n[0]), np.asarray(r_h), rtol=5e-2, atol=5e-2)
    np.testing.assert_allclose(np.asarray(c_n[0]), np.asarray(r_c), rtol=5e-2, atol=5e-2)

    assert out.shape == (SEQ, BATCH, H_DIM)
    assert h_n.shape == (1, BATCH, H_DIM) and c_n.shape == (1, BATCH, H_DIM)
    print("KERNEL_OK")
</pallas_src>

<mosaic_0001>
module attributes {stable_mosaic.version = 11 : i64} {
  func.func @_lstm_chunk_kernel(%arg0: i32, %arg1: i32, %arg2: memref<8x16x128xbf16, #tpu.memory_space<vmem>>, %arg3: memref<128x512xbf16, #tpu.memory_space<vmem>>, %arg4: memref<128x512xbf16, #tpu.memory_space<vmem>>, %arg5: memref<1x512xf32, #tpu.memory_space<vmem>>, %arg6: memref<8x16x128xf32, #tpu.memory_space<vmem>>, %arg7: memref<16x128xf32, #tpu.memory_space<vmem>>, %arg8: memref<16x128xf32, #tpu.memory_space<vmem>>, %arg9: memref<128x512xf32, #tpu.memory_space<vmem>>, %arg10: memref<16x128xf32, #tpu.memory_space<vmem>>, %arg11: memref<16x128xf32, #tpu.memory_space<vmem>>) attributes {dimension_semantics = [#tpu.dimension_semantics<parallel>, #tpu.dimension_semantics<arbitrary>], iteration_bounds = array<i64: 1, 1>, scalar_prefetch = 0 : i64, scratch_operands = 3 : i64, tpu.core_type = #tpu.core_type<tc>, window_params = [{transform_indices = @transform_0, window_bounds = array<i64: 8, 16, 128>}, {pipeline_mode = #tpu.pipeline_mode<synchronous>, transform_indices = @transform_1, window_bounds = array<i64: 128, 512>}, {pipeline_mode = #tpu.pipeline_mode<synchronous>, transform_indices = @transform_2, window_bounds = array<i64: 128, 512>}, {pipeline_mode = #tpu.pipeline_mode<synchronous>, transform_indices = @transform_3, window_bounds = array<i64: 1, 512>}, {transform_indices = @transform_4, window_bounds = array<i64: 8, 16, 128>}, {transform_indices = @transform_5, window_bounds = array<i64: 16, 128>}, {transform_indices = @transform_6, window_bounds = array<i64: 16, 128>}]} {
    %c0 = arith.constant 0 : index
    %c0_0 = arith.constant 0 : index
    %c0_1 = arith.constant 0 : index
    %0 = vector.load %arg2[%c0, %c0_0, %c0_1] : memref<8x16x128xbf16, #tpu.memory_space<vmem>>, vector<8x16x128xbf16>
    %1 = vector.shape_cast %0 : vector<8x16x128xbf16> to vector<128x128xbf16>
    %c0_2 = arith.constant 0 : index
    %c0_3 = arith.constant 0 : index
    %2 = vector.load %arg3[%c0_2, %c0_3] : memref<128x512xbf16, #tpu.memory_space<vmem>>, vector<128x512xbf16>
    %cst = arith.constant dense<0.000000e+00> : vector<128x512xf32>
    %3 = tpu.matmul %1, %2, %cst {dimension_numbers = #tpu.dot_dimension_numbers<[1], [0], [0], [1], [0, 0, 1, 1], [], []>} : vector<128x128xbf16>, vector<128x512xbf16>, vector<128x512xf32> -> vector<128x512xf32>
    %c0_4 = arith.constant 0 : index
    %c0_5 = arith.constant 0 : index
    %4 = vector.load %arg5[%c0_4, %c0_5] : memref<1x512xf32, #tpu.memory_space<vmem>>, vector<1x512xf32>
    %5 = vector.broadcast %4 : vector<1x512xf32> to vector<128x512xf32>
    %6 = arith.addf %3, %5 : vector<128x512xf32>
    %c0_6 = arith.constant 0 : index
    %c0_7 = arith.constant 0 : index
    %7 = vector.load %arg9[%c0_6, %c0_7] : memref<128x512xf32, #tpu.memory_space<vmem>>, vector<128x512xf32>
    tpu.vector_store %arg9[%c0_6, %c0_7], %6 {strides = array<i32>} : memref<128x512xf32, #tpu.memory_space<vmem>>, vector<128x512xf32>,
    %c0_i32 = arith.constant 0 : i32
    %8 = arith.cmpi eq, %arg1, %c0_i32 : i32
    %9 = arith.extui %8 : i1 to i32
    %c0_i32_8 = arith.constant 0 : i32
    %10 = arith.cmpi ne, %9, %c0_i32_8 : i32
    scf.if %10 {
      %cst_83 = arith.constant 0.000000e+00 : f32
      %242 = vector.broadcast %cst_83 : f32 to vector<16x128xf32>
      %c0_84 = arith.constant 0 : index
      %c0_85 = arith.constant 0 : index
      %243 = vector.load %arg10[%c0_84, %c0_85] : memref<16x128xf32, #tpu.memory_space<vmem>>, vector<16x128xf32>
      tpu.vector_store %arg10[%c0_84, %c0_85], %242 {strides = array<i32>} : memref<16x128xf32, #tpu.memory_space<vmem>>, vector<16x128xf32>,
      %cst_86 = arith.constant 0.000000e+00 : f32
      %244 = vector.broadcast %cst_86 : f32 to vector<16x128xf32>
      %c0_87 = arith.constant 0 : index
      %c0_88 = arith.constant 0 : index
      %245 = vector.load %arg11[%c0_87, %c0_88] : memref<16x128xf32, #tpu.memory_space<vmem>>, vector<16x128xf32>
      tpu.vector_store %arg11[%c0_87, %c0_88], %244 {strides = array<i32>} : memref<16x128xf32, #tpu.memory_space<vmem>>, vector<16x128xf32>,
    } else {
    }
    %c0_9 = arith.constant 0 : index
    %c0_10 = arith.constant 0 : index
    %11 = vector.load %arg10[%c0_9, %c0_10] : memref<16x128xf32, #tpu.memory_space<vmem>>, vector<16x128xf32>
    %c0_11 = arith.constant 0 : index
    %c0_12 = arith.constant 0 : index
    %12 = vector.load %arg11[%c0_11, %c0_12] : memref<16x128xf32, #tpu.memory_space<vmem>>, vector<16x128xf32>
    %c0_i32_13 = arith.constant 0 : i32
    %c16_i32 = arith.constant 16 : i32
    %13 = arith.muli %c0_i32_13, %c16_i32 : i32
    %14 = tpu.assume_multiple %13, 16 : i32
    %15 = arith.index_cast %14 : i32 to index
    %c0_14 = arith.constant 0 : index
    %16 = vector.load %arg9[%15, %c0_14] : memref<128x512xf32, #tpu.memory_space<vmem>>, vector<16x512xf32>
    %17 = arith.truncf %11 : vector<16x128xf32> to vector<16x128xbf16>
    %c0_15 = arith.constant 0 : index
    %c0_16 = arith.constant 0 : index
    %18 = vector.load %arg4[%c0_15, %c0_16] : memref<128x512xbf16, #tpu.memory_space<vmem>>, vector<128x512xbf16>
    %cst_17 = arith.constant dense<0.000000e+00> : vector<16x512xf32>
    %19 = tpu.matmul %17, %18, %cst_17 {dimension_numbers = #tpu.dot_dimension_numbers<[1], [0], [0], [1], [0, 0, 1, 1], [], []>} : vector<16x128xbf16>, vector<128x512xbf16>, vector<16x512xf32> -> vector<16x512xf32>
    %20 = arith.addf %16, %19 : vector<16x512xf32>
    %21 = vector.extract_strided_slice %20 {offsets = [0, 0], sizes = [16, 384], strides = [1, 1]} : vector<16x512xf32> to vector<16x384xf32>
    %22 = arith.negf %21 : vector<16x384xf32>
    %23 = math.exp %22 : vector<16x384xf32>
    %cst_18 = arith.constant 1.000000e+00 : f32
    %24 = vector.broadcast %cst_18 : f32 to vector<16x384xf32>
    %25 = arith.addf %24, %23 : vector<16x384xf32>
    %26 = arith.divf %24, %25 : vector<16x384xf32>
    %27 = vector.extract_strided_slice %26 {offsets = [0, 0], sizes = [16, 128], strides = [1, 1]} : vector<16x384xf32> to vector<16x128xf32>
    %28 = vector.extract_strided_slice %26 {offsets = [0, 128], sizes = [16, 128], strides = [1, 1]} : vector<16x384xf32> to vector<16x128xf32>
    %29 = vector.extract_strided_slice %26 {offsets = [0, 256], sizes = [16, 128], strides = [1, 1]} : vector<16x384xf32> to vector<16x128xf32>
    %30 = vector.extract_strided_slice %20 {offsets = [0, 384], sizes = [16, 128], strides = [1, 1]} : vector<16x512xf32> to vector<16x128xf32>
    %31 = math.tanh %30 : vector<16x128xf32>
    %32 = arith.mulf %28, %12 : vector<16x128xf32>
    %33 = arith.mulf %27, %31 : vector<16x128xf32>
    %34 = arith.addf %32, %33 : vector<16x128xf32>
    %35 = math.tanh %34 : vector<16x128xf32>
    %36 = arith.mulf %29, %35 : vector<16x128xf32>
    %37 = arith.index_cast %c0_i32_13 : i32 to index
    %c0_19 = arith.constant 0 : index
    %c0_20 = arith.constant 0 : index
    %38 = vector.load %arg6[%37, %c0_19, %c0_20] : memref<8x16x128xf32, #tpu.memory_space<vmem>>, vector<1x16x128xf32>
    %39 = vector.shape_cast %38 : vector<1x16x128xf32> to vector<16x128xf32>
    %40 = vector.shape_cast %36 : vector<16x128xf32> to vector<1x16x128xf32>
    tpu.vector_store %arg6[%37, %c0_19, %c0_20], %40 {strides = array<i32>} : memref<8x16x128xf32, #tpu.memory_space<vmem>>, vector<1x16x128xf32>,
    %c1_i32 = arith.constant 1 : i32
    %c16_i32_21 = arith.constant 16 : i32
    %41 = arith.muli %c1_i32, %c16_i32_21 : i32
    %42 = tpu.assume_multiple %41, 16 : i32
    %43 = arith.index_cast %42 : i32 to index
    %c0_22 = arith.constant 0 : index
    %44 = vector.load %arg9[%43, %c0_22] : memref<128x512xf32, #tpu.memory_space<vmem>>, vector<16x512xf32>
    %45 = arith.truncf %36 : vector<16x128xf32> to vector<16x128xbf16>
    %c0_23 = arith.constant 0 : index
    %c0_24 = arith.constant 0 : index
    %46 = vector.load %arg4[%c0_23, %c0_24] : memref<128x512xbf16, #tpu.memory_space<vmem>>, vector<128x512xbf16>
    %cst_25 = arith.constant dense<0.000000e+00> : vector<16x512xf32>
    %47 = tpu.matmul %45, %46, %cst_25 {dimension_numbers = #tpu.dot_dimension_numbers<[1], [0], [0], [1], [0, 0, 1, 1], [], []>} : vector<16x128xbf16>, vector<128x512xbf16>, vector<16x512xf32> -> vector<16x512xf32>
    %48 = arith.addf %44, %47 : vector<16x512xf32>
    %49 = vector.extract_strided_slice %48 {offsets = [0, 0], sizes = [16, 384], strides = [1, 1]} : vector<16x512xf32> to vector<16x384xf32>
    %50 = arith.negf %49 : vector<16x384xf32>
    %51 = math.exp %50 : vector<16x384xf32>
    %cst_26 = arith.constant 1.000000e+00 : f32
    %52 = vector.broadcast %cst_26 : f32 to vector<16x384xf32>
    %53 = arith.addf %52, %51 : vector<16x384xf32>
    %54 = arith.divf %52, %53 : vector<16x384xf32>
    %55 = vector.extract_strided_slice %54 {offsets = [0, 0], sizes = [16, 128], strides = [1, 1]} : vector<16x384xf32> to vector<16x128xf32>
    %56 = vector.extract_strided_slice %54 {offsets = [0, 128], sizes = [16, 128], strides = [1, 1]} : vector<16x384xf32> to vector<16x128xf32>
    %57 = vector.extract_strided_slice %54 {offsets = [0, 256], sizes = [16, 128], strides = [1, 1]} : vector<16x384xf32> to vector<16x128xf32>
    %58 = vector.extract_strided_slice %48 {offsets = [0, 384], sizes = [16, 128], strides = [1, 1]} : vector<16x512xf32> to vector<16x128xf32>
    %59 = math.tanh %58 : vector<16x128xf32>
    %60 = arith.mulf %56, %34 : vector<16x128xf32>
    %61 = arith.mulf %55, %59 : vector<16x128xf32>
    %62 = arith.addf %60, %61 : vector<16x128xf32>
    %63 = math.tanh %62 : vector<16x128xf32>
    %64 = arith.mulf %57, %63 : vector<16x128xf32>
    %65 = arith.index_cast %c1_i32 : i32 to index
    %c0_27 = arith.constant 0 : index
    %c0_28 = arith.constant 0 : index
    %66 = vector.load %arg6[%65, %c0_27, %c0_28] : memref<8x16x128xf32, #tpu.memory_space<vmem>>, vector<1x16x128xf32>
    %67 = vector.shape_cast %66 : vector<1x16x128xf32> to vector<16x128xf32>
    %68 = vector.shape_cast %64 : vector<16x128xf32> to vector<1x16x128xf32>
    tpu.vector_store %arg6[%65, %c0_27, %c0_28], %68 {strides = array<i32>} : memref<8x16x128xf32, #tpu.memory_space<vmem>>, vector<1x16x128xf32>,
    %c2_i32 = arith.constant 2 : i32
    %c16_i32_29 = arith.constant 16 : i32
    %69 = arith.muli %c2_i32, %c16_i32_29 : i32
    %70 = tpu.assume_multiple %69, 16 : i32
    %71 = arith.index_cast %70 : i32 to index
    %c0_30 = arith.constant 0 : index
    %72 = vector.load %arg9[%71, %c0_30] : memref<128x512xf32, #tpu.memory_space<vmem>>, vector<16x512xf32>
    %73 = arith.truncf %64 : vector<16x128xf32> to vector<16x128xbf16>
    %c0_31 = arith.constant 0 : index
    %c0_32 = arith.constant 0 : index
    %74 = vector.load %arg4[%c0_31, %c0_32] : memref<128x512xbf16, #tpu.memory_space<vmem>>, vector<128x512xbf16>
    %cst_33 = arith.constant dense<0.000000e+00> : vector<16x512xf32>
    %75 = tpu.matmul %73, %74, %cst_33 {dimension_numbers = #tpu.dot_dimension_numbers<[1], [0], [0], [1], [0, 0, 1, 1], [], []>} : vector<16x128xbf16>, vector<128x512xbf16>, vector<16x512xf32> -> vector<16x512xf32>
    %76 = arith.addf %72, %75 : vector<16x512xf32>
    %77 = vector.extract_strided_slice %76 {offsets = [0, 0], sizes = [16, 384], strides = [1, 1]} : vector<16x512xf32> to vector<16x384xf32>
    %78 = arith.negf %77 : vector<16x384xf32>
    %79 = math.exp %78 : vector<16x384xf32>
    %cst_34 = arith.constant 1.000000e+00 : f32
    %80 = vector.broadcast %cst_34 : f32 to vector<16x384xf32>
    %81 = arith.addf %80, %79 : vector<16x384xf32>
    %82 = arith.divf %80, %81 : vector<16x384xf32>
    %83 = vector.extract_strided_slice %82 {offsets = [0, 0], sizes = [16, 128], strides = [1, 1]} : vector<16x384xf32> to vector<16x128xf32>
    %84 = vector.extract_strided_slice %82 {offsets = [0, 128], sizes = [16, 128], strides = [1, 1]} : vector<16x384xf32> to vector<16x128xf32>
    %85 = vector.extract_strided_slice %82 {offsets = [0, 256], sizes = [16, 128], strides = [1, 1]} : vector<16x384xf32> to vector<16x128xf32>
    %86 = vector.extract_strided_slice %76 {offsets = [0, 384], sizes = [16, 128], strides = [1, 1]} : vector<16x512xf32> to vector<16x128xf32>
    %87 = math.tanh %86 : vector<16x128xf32>
    %88 = arith.mulf %84, %62 : vector<16x128xf32>
    %89 = arith.mulf %83, %87 : vector<16x128xf32>
    %90 = arith.addf %88, %89 : vector<16x128xf32>
    %91 = math.tanh %90 : vector<16x128xf32>
    %92 = arith.mulf %85, %91 : vector<16x128xf32>
    %93 = arith.index_cast %c2_i32 : i32 to index
    %c0_35 = arith.constant 0 : index
    %c0_36 = arith.constant 0 : index
    %94 = vector.load %arg6[%93, %c0_35, %c0_36] : memref<8x16x128xf32, #tpu.memory_space<vmem>>, vector<1x16x128xf32>
    %95 = vector.shape_cast %94 : vector<1x16x128xf32> to vector<16x128xf32>
    %96 = vector.shape_cast %92 : vector<16x128xf32> to vector<1x16x128xf32>
    tpu.vector_store %arg6[%93, %c0_35, %c0_36], %96 {strides = array<i32>} : memref<8x16x128xf32, #tpu.memory_space<vmem>>, vector<1x16x128xf32>,
    %c3_i32 = arith.constant 3 : i32
    %c16_i32_37 = arith.constant 16 : i32
    %97 = arith.muli %c3_i32, %c16_i32_37 : i32
    %98 = tpu.assume_multiple %97, 16 : i32
    %99 = arith.index_cast %98 : i32 to index
    %c0_38 = arith.constant 0 : index
    %100 = vector.load %arg9[%99, %c0_38] : memref<128x512xf32, #tpu.memory_space<vmem>>, vector<16x512xf32>
    %101 = arith.truncf %92 : vector<16x128xf32> to vector<16x128xbf16>
    %c0_39 = arith.constant 0 : index
    %c0_40 = arith.constant 0 : index
    %102 = vector.load %arg4[%c0_39, %c0_40] : memref<128x512xbf16, #tpu.memory_space<vmem>>, vector<128x512xbf16>
    %cst_41 = arith.constant dense<0.000000e+00> : vector<16x512xf32>
    %103 = tpu.matmul %101, %102, %cst_41 {dimension_numbers = #tpu.dot_dimension_numbers<[1], [0], [0], [1], [0, 0, 1, 1], [], []>} : vector<16x128xbf16>, vector<128x512xbf16>, vector<16x512xf32> -> vector<16x512xf32>
    %104 = arith.addf %100, %103 : vector<16x512xf32>
    %105 = vector.extract_strided_slice %104 {offsets = [0, 0], sizes = [16, 384], strides = [1, 1]} : vector<16x512xf32> to vector<16x384xf32>
    %106 = arith.negf %105 : vector<16x384xf32>
    %107 = math.exp %106 : vector<16x384xf32>
    %cst_42 = arith.constant 1.000000e+00 : f32
    %108 = vector.broadcast %cst_42 : f32 to vector<16x384xf32>
    %109 = arith.addf %108, %107 : vector<16x384xf32>
    %110 = arith.divf %108, %109 : vector<16x384xf32>
    %111 = vector.extract_strided_slice %110 {offsets = [0, 0], sizes = [16, 128], strides = [1, 1]} : vector<16x384xf32> to vector<16x128xf32>
    %112 = vector.extract_strided_slice %110 {offsets = [0, 128], sizes = [16, 128], strides = [1, 1]} : vector<16x384xf32> to vector<16x128xf32>
    %113 = vector.extract_strided_slice %110 {offsets = [0, 256], sizes = [16, 128], strides = [1, 1]} : vector<16x384xf32> to vector<16x128xf32>
    %114 = vector.extract_strided_slice %104 {offsets = [0, 384], sizes = [16, 128], strides = [1, 1]} : vector<16x512xf32> to vector<16x128xf32>
    %115 = math.tanh %114 : vector<16x128xf32>
    %116 = arith.mulf %112, %90 : vector<16x128xf32>
    %117 = arith.mulf %111, %115 : vector<16x128xf32>
    %118 = arith.addf %116, %117 : vector<16x128xf32>
    %119 = math.tanh %118 : vector<16x128xf32>
    %120 = arith.mulf %113, %119 : vector<16x128xf32>
    %121 = arith.index_cast %c3_i32 : i32 to index
    %c0_43 = arith.constant 0 : index
    %c0_44 = arith.constant 0 : index
    %122 = vector.load %arg6[%121, %c0_43, %c0_44] : memref<8x16x128xf32, #tpu.memory_space<vmem>>, vector<1x16x128xf32>
    %123 = vector.shape_cast %122 : vector<1x16x128xf32> to vector<16x128xf32>
    %124 = vector.shape_cast %120 : vector<16x128xf32> to vector<1x16x128xf32>
    tpu.vector_store %arg6[%121, %c0_43, %c0_44], %124 {strides = array<i32>} : memref<8x16x128xf32, #tpu.memory_space<vmem>>, vector<1x16x128xf32>,
    %c4_i32 = arith.constant 4 : i32
    %c16_i32_45 = arith.constant 16 : i32
    %125 = arith.muli %c4_i32, %c16_i32_45 : i32
    %126 = tpu.assume_multiple %125, 16 : i32
    %127 = arith.index_cast %126 : i32 to index
    %c0_46 = arith.constant 0 : index
    %128 = vector.load %arg9[%127, %c0_46] : memref<128x512xf32, #tpu.memory_space<vmem>>, vector<16x512xf32>
    %129 = arith.truncf %120 : vector<16x128xf32> to vector<16x128xbf16>
    %c0_47 = arith.constant 0 : index
    %c0_48 = arith.constant 0 : index
    %130 = vector.load %arg4[%c0_47, %c0_48] : memref<128x512xbf16, #tpu.memory_space<vmem>>, vector<128x512xbf16>
    %cst_49 = arith.constant dense<0.000000e+00> : vector<16x512xf32>
    %131 = tpu.matmul %129, %130, %cst_49 {dimension_numbers = #tpu.dot_dimension_numbers<[1], [0], [0], [1], [0, 0, 1, 1], [], []>} : vector<16x128xbf16>, vector<128x512xbf16>, vector<16x512xf32> -> vector<16x512xf32>
    %132 = arith.addf %128, %131 : vector<16x512xf32>
    %133 = vector.extract_strided_slice %132 {offsets = [0, 0], sizes = [16, 384], strides = [1, 1]} : vector<16x512xf32> to vector<16x384xf32>
    %134 = arith.negf %133 : vector<16x384xf32>
    %135 = math.exp %134 : vector<16x384xf32>
    %cst_50 = arith.constant 1.000000e+00 : f32
    %136 = vector.broadcast %cst_50 : f32 to vector<16x384xf32>
    %137 = arith.addf %136, %135 : vector<16x384xf32>
    %138 = arith.divf %136, %137 : vector<16x384xf32>
    %139 = vector.extract_strided_slice %138 {offsets = [0, 0], sizes = [16, 128], strides = [1, 1]} : vector<16x384xf32> to vector<16x128xf32>
    %140 = vector.extract_strided_slice %138 {offsets = [0, 128], sizes = [16, 128], strides = [1, 1]} : vector<16x384xf32> to vector<16x128xf32>
    %141 = vector.extract_strided_slice %138 {offsets = [0, 256], sizes = [16, 128], strides = [1, 1]} : vector<16x384xf32> to vector<16x128xf32>
    %142 = vector.extract_strided_slice %132 {offsets = [0, 384], sizes = [16, 128], strides = [1, 1]} : vector<16x512xf32> to vector<16x128xf32>
    %143 = math.tanh %142 : vector<16x128xf32>
    %144 = arith.mulf %140, %118 : vector<16x128xf32>
    %145 = arith.mulf %139, %143 : vector<16x128xf32>
    %146 = arith.addf %144, %145 : vector<16x128xf32>
    %147 = math.tanh %146 : vector<16x128xf32>
    %148 = arith.mulf %141, %147 : vector<16x128xf32>
    %149 = arith.index_cast %c4_i32 : i32 to index
    %c0_51 = arith.constant 0 : index
    %c0_52 = arith.constant 0 : index
    %150 = vector.load %arg6[%149, %c0_51, %c0_52] : memref<8x16x128xf32, #tpu.memory_space<vmem>>, vector<1x16x128xf32>
    %151 = vector.shape_cast %150 : vector<1x16x128xf32> to vector<16x128xf32>
    %152 = vector.shape_cast %148 : vector<16x128xf32> to vector<1x16x128xf32>
    tpu.vector_store %arg6[%149, %c0_51, %c0_52], %152 {strides = array<i32>} : memref<8x16x128xf32, #tpu.memory_space<vmem>>, vector<1x16x128xf32>,
    %c5_i32 = arith.constant 5 : i32
    %c16_i32_53 = arith.constant 16 : i32
    %153 = arith.muli %c5_i32, %c16_i32_53 : i32
    %154 = tpu.assume_multiple %153, 16 : i32
    %155 = arith.index_cast %154 : i32 to index
    %c0_54 = arith.constant 0 : index
    %156 = vector.load %arg9[%155, %c0_54] : memref<128x512xf32, #tpu.memory_space<vmem>>, vector<16x512xf32>
    %157 = arith.truncf %148 : vector<16x128xf32> to vector<16x128xbf16>
    %c0_55 = arith.constant 0 : index
    %c0_56 = arith.constant 0 : index
    %158 = vector.load %arg4[%c0_55, %c0_56] : memref<128x512xbf16, #tpu.memory_space<vmem>>, vector<128x512xbf16>
    %cst_57 = arith.constant dense<0.000000e+00> : vector<16x512xf32>
    %159 = tpu.matmul %157, %158, %cst_57 {dimension_numbers = #tpu.dot_dimension_numbers<[1], [0], [0], [1], [0, 0, 1, 1], [], []>} : vector<16x128xbf16>, vector<128x512xbf16>, vector<16x512xf32> -> vector<16x512xf32>
    %160 = arith.addf %156, %159 : vector<16x512xf32>
    %161 = vector.extract_strided_slice %160 {offsets = [0, 0], sizes = [16, 384], strides = [1, 1]} : vector<16x512xf32> to vector<16x384xf32>
    %162 = arith.negf %161 : vector<16x384xf32>
    %163 = math.exp %162 : vector<16x384xf32>
    %cst_58 = arith.constant 1.000000e+00 : f32
    %164 = vector.broadcast %cst_58 : f32 to vector<16x384xf32>
    %165 = arith.addf %164, %163 : vector<16x384xf32>
    %166 = arith.divf %164, %165 : vector<16x384xf32>
    %167 = vector.extract_strided_slice %166 {offsets = [0, 0], sizes = [16, 128], strides = [1, 1]} : vector<16x384xf32> to vector<16x128xf32>
    %168 = vector.extract_strided_slice %166 {offsets = [0, 128], sizes = [16, 128], strides = [1, 1]} : vector<16x384xf32> to vector<16x128xf32>
    %169 = vector.extract_strided_slice %166 {offsets = [0, 256], sizes = [16, 128], strides = [1, 1]} : vector<16x384xf32> to vector<16x128xf32>
    %170 = vector.extract_strided_slice %160 {offsets = [0, 384], sizes = [16, 128], strides = [1, 1]} : vector<16x512xf32> to vector<16x128xf32>
    %171 = math.tanh %170 : vector<16x128xf32>
    %172 = arith.mulf %168, %146 : vector<16x128xf32>
    %173 = arith.mulf %167, %171 : vector<16x128xf32>
    %174 = arith.addf %172, %173 : vector<16x128xf32>
    %175 = math.tanh %174 : vector<16x128xf32>
    %176 = arith.mulf %169, %175 : vector<16x128xf32>
    %177 = arith.index_cast %c5_i32 : i32 to index
    %c0_59 = arith.constant 0 : index
    %c0_60 = arith.constant 0 : index
    %178 = vector.load %arg6[%177, %c0_59, %c0_60] : memref<8x16x128xf32, #tpu.memory_space<vmem>>, vector<1x16x128xf32>
    %179 = vector.shape_cast %178 : vector<1x16x128xf32> to vector<16x128xf32>
    %180 = vector.shape_cast %176 : vector<16x128xf32> to vector<1x16x128xf32>
    tpu.vector_store %arg6[%177, %c0_59, %c0_60], %180 {strides = array<i32>} : memref<8x16x128xf32, #tpu.memory_space<vmem>>, vector<1x16x128xf32>,
    %c6_i32 = arith.constant 6 : i32
    %c16_i32_61 = arith.constant 16 : i32
    %181 = arith.muli %c6_i32, %c16_i32_61 : i32
    %182 = tpu.assume_multiple %181, 16 : i32
    %183 = arith.index_cast %182 : i32 to index
    %c0_62 = arith.constant 0 : index
    %184 = vector.load %arg9[%183, %c0_62] : memref<128x512xf32, #tpu.memory_space<vmem>>, vector<16x512xf32>
    %185 = arith.truncf %176 : vector<16x128xf32> to vector<16x128xbf16>
    %c0_63 = arith.constant 0 : index
    %c0_64 = arith.constant 0 : index
    %186 = vector.load %arg4[%c0_63, %c0_64] : memref<128x512xbf16, #tpu.memory_space<vmem>>, vector<128x512xbf16>
    %cst_65 = arith.constant dense<0.000000e+00> : vector<16x512xf32>
    %187 = tpu.matmul %185, %186, %cst_65 {dimension_numbers = #tpu.dot_dimension_numbers<[1], [0], [0], [1], [0, 0, 1, 1], [], []>} : vector<16x128xbf16>, vector<128x512xbf16>, vector<16x512xf32> -> vector<16x512xf32>
    %188 = arith.addf %184, %187 : vector<16x512xf32>
    %189 = vector.extract_strided_slice %188 {offsets = [0, 0], sizes = [16, 384], strides = [1, 1]} : vector<16x512xf32> to vector<16x384xf32>
    %190 = arith.negf %189 : vector<16x384xf32>
    %191 = math.exp %190 : vector<16x384xf32>
    %cst_66 = arith.constant 1.000000e+00 : f32
    %192 = vector.broadcast %cst_66 : f32 to vector<16x384xf32>
    %193 = arith.addf %192, %191 : vector<16x384xf32>
    %194 = arith.divf %192, %193 : vector<16x384xf32>
    %195 = vector.extract_strided_slice %194 {offsets = [0, 0], sizes = [16, 128], strides = [1, 1]} : vector<16x384xf32> to vector<16x128xf32>
    %196 = vector.extract_strided_slice %194 {offsets = [0, 128], sizes = [16, 128], strides = [1, 1]} : vector<16x384xf32> to vector<16x128xf32>
    %197 = vector.extract_strided_slice %194 {offsets = [0, 256], sizes = [16, 128], strides = [1, 1]} : vector<16x384xf32> to vector<16x128xf32>
    %198 = vector.extract_strided_slice %188 {offsets = [0, 384], sizes = [16, 128], strides = [1, 1]} : vector<16x512xf32> to vector<16x128xf32>
    %199 = math.tanh %198 : vector<16x128xf32>
    %200 = arith.mulf %196, %174 : vector<16x128xf32>
    %201 = arith.mulf %195, %199 : vector<16x128xf32>
    %202 = arith.addf %200, %201 : vector<16x128xf32>
    %203 = math.tanh %202 : vector<16x128xf32>
    %204 = arith.mulf %197, %203 : vector<16x128xf32>
    %205 = arith.index_cast %c6_i32 : i32 to index
    %c0_67 = arith.constant 0 : index
    %c0_68 = arith.constant 0 : index
    %206 = vector.load %arg6[%205, %c0_67, %c0_68] : memref<8x16x128xf32, #tpu.memory_space<vmem>>, vector<1x16x128xf32>
    %207 = vector.shape_cast %206 : vector<1x16x128xf32> to vector<16x128xf32>
    %208 = vector.shape_cast %204 : vector<16x128xf32> to vector<1x16x128xf32>
    tpu.vector_store %arg6[%205, %c0_67, %c0_68], %208 {strides = array<i32>} : memref<8x16x128xf32, #tpu.memory_space<vmem>>, vector<1x16x128xf32>,
    %c7_i32 = arith.constant 7 : i32
    %c16_i32_69 = arith.constant 16 : i32
    %209 = arith.muli %c7_i32, %c16_i32_69 : i32
    %210 = tpu.assume_multiple %209, 16 : i32
    %211 = arith.index_cast %210 : i32 to index
    %c0_70 = arith.constant 0 : index
    %212 = vector.load %arg9[%211, %c0_70] : memref<128x512xf32, #tpu.memory_space<vmem>>, vector<16x512xf32>
    %213 = arith.truncf %204 : vector<16x128xf32> to vector<16x128xbf16>
    %c0_71 = arith.constant 0 : index
    %c0_72 = arith.constant 0 : index
    %214 = vector.load %arg4[%c0_71, %c0_72] : memref<128x512xbf16, #tpu.memory_space<vmem>>, vector<128x512xbf16>
    %cst_73 = arith.constant dense<0.000000e+00> : vector<16x512xf32>
    %215 = tpu.matmul %213, %214, %cst_73 {dimension_numbers = #tpu.dot_dimension_numbers<[1], [0], [0], [1], [0, 0, 1, 1], [], []>} : vector<16x128xbf16>, vector<128x512xbf16>, vector<16x512xf32> -> vector<16x512xf32>
    %216 = arith.addf %212, %215 : vector<16x512xf32>
    %217 = vector.extract_strided_slice %216 {offsets = [0, 0], sizes = [16, 384], strides = [1, 1]} : vector<16x512xf32> to vector<16x384xf32>
    %218 = arith.negf %217 : vector<16x384xf32>
    %219 = math.exp %218 : vector<16x384xf32>
    %cst_74 = arith.constant 1.000000e+00 : f32
    %220 = vector.broadcast %cst_74 : f32 to vector<16x384xf32>
    %221 = arith.addf %220, %219 : vector<16x384xf32>
    %222 = arith.divf %220, %221 : vector<16x384xf32>
    %223 = vector.extract_strided_slice %222 {offsets = [0, 0], sizes = [16, 128], strides = [1, 1]} : vector<16x384xf32> to vector<16x128xf32>
    %224 = vector.extract_strided_slice %222 {offsets = [0, 128], sizes = [16, 128], strides = [1, 1]} : vector<16x384xf32> to vector<16x128xf32>
    %225 = vector.extract_strided_slice %222 {offsets = [0, 256], sizes = [16, 128], strides = [1, 1]} : vector<16x384xf32> to vector<16x128xf32>
    %226 = vector.extract_strided_slice %216 {offsets = [0, 384], sizes = [16, 128], strides = [1, 1]} : vector<16x512xf32> to vector<16x128xf32>
    %227 = math.tanh %226 : vector<16x128xf32>
    %228 = arith.mulf %224, %202 : vector<16x128xf32>
    %229 = arith.mulf %223, %227 : vector<16x128xf32>
    %230 = arith.addf %228, %229 : vector<16x128xf32>
    %231 = math.tanh %230 : vector<16x128xf32>
    %232 = arith.mulf %225, %231 : vector<16x128xf32>
    %233 = arith.index_cast %c7_i32 : i32 to index
    %c0_75 = arith.constant 0 : index
    %c0_76 = arith.constant 0 : index
    %234 = vector.load %arg6[%233, %c0_75, %c0_76] : memref<8x16x128xf32, #tpu.memory_space<vmem>>, vector<1x16x128xf32>
    %235 = vector.shape_cast %234 : vector<1x16x128xf32> to vector<16x128xf32>
    %236 = vector.shape_cast %232 : vector<16x128xf32> to vector<1x16x128xf32>
    tpu.vector_store %arg6[%233, %c0_75, %c0_76], %236 {strides = array<i32>} : memref<8x16x128xf32, #tpu.memory_space<vmem>>, vector<1x16x128xf32>,
    %c8_i32 = arith.constant 8 : i32
    %c0_77 = arith.constant 0 : index
    %c0_78 = arith.constant 0 : index
    %237 = vector.load %arg10[%c0_77, %c0_78] : memref<16x128xf32, #tpu.memory_space<vmem>>, vector<16x128xf32>
    tpu.vector_store %arg10[%c0_77, %c0_78], %232 {strides = array<i32>} : memref<16x128xf32, #tpu.memory_space<vmem>>, vector<16x128xf32>,
    %c0_79 = arith.constant 0 : index
    %c0_80 = arith.constant 0 : index
    %238 = vector.load %arg11[%c0_79, %c0_80] : memref<16x128xf32, #tpu.memory_space<vmem>>, vector<16x128xf32>
    tpu.vector_store %arg11[%c0_79, %c0_80], %230 {strides = array<i32>} : memref<16x128xf32, #tpu.memory_space<vmem>>, vector<16x128xf32>,
    %c0_i32_81 = arith.constant 0 : i32
    %239 = arith.cmpi eq, %arg1, %c0_i32_81 : i32
    %240 = arith.extui %239 : i1 to i32
    %c0_i32_82 = arith.constant 0 : i32
    %241 = arith.cmpi ne, %240, %c0_i32_82 : i32
    scf.if %241 {
      %c0_83 = arith.constant 0 : index
      %c0_84 = arith.constant 0 : index
      %242 = vector.load %arg10[%c0_83, %c0_84] : memref<16x128xf32, #tpu.memory_space<vmem>>, vector<16x128xf32>
      %c0_85 = arith.constant 0 : index
      %c0_86 = arith.constant 0 : index
      %243 = vector.load %arg7[%c0_85, %c0_86] : memref<16x128xf32, #tpu.memory_space<vmem>>, vector<16x128xf32>
      tpu.vector_store %arg7[%c0_85, %c0_86], %242 {strides = array<i32>} : memref<16x128xf32, #tpu.memory_space<vmem>>, vector<16x128xf32>,
      %c0_87 = arith.constant 0 : index
      %c0_88 = arith.constant 0 : index
      %244 = vector.load %arg11[%c0_87, %c0_88] : memref<16x128xf32, #tpu.memory_space<vmem>>, vector<16x128xf32>
      %c0_89 = arith.constant 0 : index
      %c0_90 = arith.constant 0 : index
      %245 = vector.load %arg8[%c0_89, %c0_90] : memref<16x128xf32, #tpu.memory_space<vmem>>, vector<16x128xf32>
      tpu.vector_store %arg8[%c0_89, %c0_90], %244 {strides = array<i32>} : memref<16x128xf32, #tpu.memory_space<vmem>>, vector<16x128xf32>,
    } else {
    }
    return
  }
  func.func @transform_0(%arg0: i32, %arg1: i32) -> (i32, i32, i32) {
    %c0_i32 = arith.constant 0 : i32
    %c0_i32_0 = arith.constant 0 : i32
    return %arg1, %arg0, %c0_i32 : i32, i32, i32
  }
  func.func @transform_1(%arg0: i32, %arg1: i32) -> (i32, i32) {
    %c0_i32 = arith.constant 0 : i32
    %c0_i32_0 = arith.constant 0 : i32
    %c0_i32_1 = arith.constant 0 : i32
    return %c0_i32, %c0_i32_0 : i32, i32
  }
  func.func @transform_2(%arg0: i32, %arg1: i32) -> (i32, i32) {
    %c0_i32 = arith.constant 0 : i32
    %c0_i32_0 = arith.constant 0 : i32
    %c0_i32_1 = arith.constant 0 : i32
    return %c0_i32, %c0_i32_0 : i32, i32
  }
  func.func @transform_3(%arg0: i32, %arg1: i32) -> (i32, i32) {
    %c0_i32 = arith.constant 0 : i32
    %c0_i32_0 = arith.constant 0 : i32
    %c0_i32_1 = arith.constant 0 : i32
    return %c0_i32, %c0_i32_0 : i32, i32
  }
  func.func @transform_4(%arg0: i32, %arg1: i32) -> (i32, i32, i32) {
    %c0_i32 = arith.constant 0 : i32
    %c0_i32_0 = arith.constant 0 : i32
    return %arg1, %arg0, %c0_i32 : i32, i32, i32
  }
  func.func @transform_5(%arg0: i32, %arg1: i32) -> (i32, i32) {
    %c0_i32 = arith.constant 0 : i32
    %c0_i32_0 = arith.constant 0 : i32
    return %arg0, %c0_i32 : i32, i32
  }
  func.func @transform_6(%arg0: i32, %arg1: i32) -> (i32, i32) {
    %c0_i32 = arith.constant 0 : i32
    %c0_i32_0 = arith.constant 0 : i32
    return %arg0, %c0_i32 : i32, i32
  }
}

module attributes {stable_mosaic.version = 11 : i64} {
  func.func @_lstm_chunk_kernel(%arg0: i32, %arg1: i32, %arg2: memref<8x16x128xbf16, #tpu.memory_space<vmem>>, %arg3: memref<128x512xbf16, #tpu.memory_space<vmem>>, %arg4: memref<128x512xbf16, #tpu.memory_space<vmem>>, %arg5: memref<1x512xf32, #tpu.memory_space<vmem>>, %arg6: memref<8x16x128xf32, #tpu.memory_space<vmem>>, %arg7: memref<16x128xf32, #tpu.memory_space<vmem>>, %arg8: memref<16x128xf32, #tpu.memory_space<vmem>>, %arg9: memref<128x512xf32, #tpu.memory_space<vmem>>, %arg10: memref<16x128xf32, #tpu.memory_space<vmem>>, %arg11: memref<16x128xf32, #tpu.memory_space<vmem>>) attributes {dimension_semantics = [#tpu.dimension_semantics<parallel>, #tpu.dimension_semantics<arbitrary>], iteration_bounds = array<i64: 1, 1>, scalar_prefetch = 0 : i64, scratch_operands = 3 : i64, tpu.core_type = #tpu.core_type<tc>, window_params = [{transform_indices = @transform_0, window_bounds = array<i64: 8, 16, 128>}, {pipeline_mode = #tpu.pipeline_mode<synchronous>, transform_indices = @transform_1, window_bounds = array<i64: 128, 512>}, {pipeline_mode = #tpu.pipeline_mode<synchronous>, transform_indices = @transform_2, window_bounds = array<i64: 128, 512>}, {pipeline_mode = #tpu.pipeline_mode<synchronous>, transform_indices = @transform_3, window_bounds = array<i64: 1, 512>}, {transform_indices = @transform_4, window_bounds = array<i64: 8, 16, 128>}, {transform_indices = @transform_5, window_bounds = array<i64: 16, 128>}, {transform_indices = @transform_6, window_bounds = array<i64: 16, 128>}]} {
    %c0 = arith.constant 0 : index
    %c0_0 = arith.constant 0 : index
    %c0_1 = arith.constant 0 : index
    %0 = vector.load %arg2[%c0, %c0_0, %c0_1] : memref<8x16x128xbf16, #tpu.memory_space<vmem>>, vector<8x16x128xbf16>
    %1 = vector.shape_cast %0 : vector<8x16x128xbf16> to vector<128x128xbf16>
    %c0_2 = arith.constant 0 : index
    %c0_3 = arith.constant 0 : index
    %2 = vector.load %arg3[%c0_2, %c0_3] : memref<128x512xbf16, #tpu.memory_space<vmem>>, vector<128x512xbf16>
    %cst = arith.constant dense<0.000000e+00> : vector<128x512xf32>
    %3 = tpu.matmul %1, %2, %cst {dimension_numbers = #tpu.dot_dimension_numbers<[1], [0], [0], [1], [0, 0, 1, 1], [], []>} : vector<128x128xbf16>, vector<128x512xbf16>, vector<128x512xf32> -> vector<128x512xf32>
    %c0_4 = arith.constant 0 : index
    %c0_5 = arith.constant 0 : index
    %4 = vector.load %arg5[%c0_4, %c0_5] : memref<1x512xf32, #tpu.memory_space<vmem>>, vector<1x512xf32>
    %5 = vector.broadcast %4 : vector<1x512xf32> to vector<128x512xf32>
    %6 = arith.addf %3, %5 : vector<128x512xf32>
    %c0_6 = arith.constant 0 : index
    %c0_7 = arith.constant 0 : index
    %7 = vector.load %arg9[%c0_6, %c0_7] : memref<128x512xf32, #tpu.memory_space<vmem>>, vector<128x512xf32>
    tpu.vector_store %arg9[%c0_6, %c0_7], %6 {strides = array<i32>} : memref<128x512xf32, #tpu.memory_space<vmem>>, vector<128x512xf32>,
    %c0_i32 = arith.constant 0 : i32
    %8 = arith.cmpi eq, %arg1, %c0_i32 : i32
    %9 = arith.extui %8 : i1 to i32
    %c0_i32_8 = arith.constant 0 : i32
    %10 = arith.cmpi ne, %9, %c0_i32_8 : i32
    scf.if %10 {
      %cst_83 = arith.constant 0.000000e+00 : f32
      %242 = vector.broadcast %cst_83 : f32 to vector<16x128xf32>
      %c0_84 = arith.constant 0 : index
      %c0_85 = arith.constant 0 : index
      %243 = vector.load %arg10[%c0_84, %c0_85] : memref<16x128xf32, #tpu.memory_space<vmem>>, vector<16x128xf32>
      tpu.vector_store %arg10[%c0_84, %c0_85], %242 {strides = array<i32>} : memref<16x128xf32, #tpu.memory_space<vmem>>, vector<16x128xf32>,
      %cst_86 = arith.constant 0.000000e+00 : f32
      %244 = vector.broadcast %cst_86 : f32 to vector<16x128xf32>
      %c0_87 = arith.constant 0 : index
      %c0_88 = arith.constant 0 : index
      %245 = vector.load %arg11[%c0_87, %c0_88] : memref<16x128xf32, #tpu.memory_space<vmem>>, vector<16x128xf32>
      tpu.vector_store %arg11[%c0_87, %c0_88], %244 {strides = array<i32>} : memref<16x128xf32, #tpu.memory_space<vmem>>, vector<16x128xf32>,
    } else {
    }
    %c0_9 = arith.constant 0 : index
    %c0_10 = arith.constant 0 : index
    %11 = vector.load %arg10[%c0_9, %c0_10] : memref<16x128xf32, #tpu.memory_space<vmem>>, vector<16x128xf32>
    %c0_11 = arith.constant 0 : index
    %c0_12 = arith.constant 0 : index
    %12 = vector.load %arg11[%c0_11, %c0_12] : memref<16x128xf32, #tpu.memory_space<vmem>>, vector<16x128xf32>
    %c0_i32_13 = arith.constant 0 : i32
    %c16_i32 = arith.constant 16 : i32
    %13 = arith.muli %c0_i32_13, %c16_i32 : i32
    %14 = tpu.assume_multiple %13, 16 : i32
    %15 = arith.index_cast %14 : i32 to index
    %c0_14 = arith.constant 0 : index
    %16 = vector.load %arg9[%15, %c0_14] : memref<128x512xf32, #tpu.memory_space<vmem>>, vector<16x512xf32>
    %17 = arith.truncf %11 : vector<16x128xf32> to vector<16x128xbf16>
    %c0_15 = arith.constant 0 : index
    %c0_16 = arith.constant 0 : index
    %18 = vector.load %arg4[%c0_15, %c0_16] : memref<128x512xbf16, #tpu.memory_space<vmem>>, vector<128x512xbf16>
    %cst_17 = arith.constant dense<0.000000e+00> : vector<16x512xf32>
    %19 = tpu.matmul %17, %18, %cst_17 {dimension_numbers = #tpu.dot_dimension_numbers<[1], [0], [0], [1], [0, 0, 1, 1], [], []>} : vector<16x128xbf16>, vector<128x512xbf16>, vector<16x512xf32> -> vector<16x512xf32>
    %20 = arith.addf %16, %19 : vector<16x512xf32>
    %21 = vector.extract_strided_slice %20 {offsets = [0, 0], sizes = [16, 384], strides = [1, 1]} : vector<16x512xf32> to vector<16x384xf32>
    %22 = arith.negf %21 : vector<16x384xf32>
    %23 = math.exp %22 : vector<16x384xf32>
    %cst_18 = arith.constant 1.000000e+00 : f32
    %24 = vector.broadcast %cst_18 : f32 to vector<16x384xf32>
    %25 = arith.addf %24, %23 : vector<16x384xf32>
    %26 = arith.divf %24, %25 : vector<16x384xf32>
    %27 = vector.extract_strided_slice %26 {offsets = [0, 0], sizes = [16, 128], strides = [1, 1]} : vector<16x384xf32> to vector<16x128xf32>
    %28 = vector.extract_strided_slice %26 {offsets = [0, 128], sizes = [16, 128], strides = [1, 1]} : vector<16x384xf32> to vector<16x128xf32>
    %29 = vector.extract_strided_slice %26 {offsets = [0, 256], sizes = [16, 128], strides = [1, 1]} : vector<16x384xf32> to vector<16x128xf32>
    %30 = vector.extract_strided_slice %20 {offsets = [0, 384], sizes = [16, 128], strides = [1, 1]} : vector<16x512xf32> to vector<16x128xf32>
    %31 = math.tanh %30 : vector<16x128xf32>
    %32 = arith.mulf %28, %12 : vector<16x128xf32>
    %33 = arith.mulf %27, %31 : vector<16x128xf32>
    %34 = arith.addf %32, %33 : vector<16x128xf32>
    %35 = math.tanh %34 : vector<16x128xf32>
    %36 = arith.mulf %29, %35 : vector<16x128xf32>
    %37 = arith.index_cast %c0_i32_13 : i32 to index
    %c0_19 = arith.constant 0 : index
    %c0_20 = arith.constant 0 : index
    %38 = vector.load %arg6[%37, %c0_19, %c0_20] : memref<8x16x128xf32, #tpu.memory_space<vmem>>, vector<1x16x128xf32>
    %39 = vector.shape_cast %38 : vector<1x16x128xf32> to vector<16x128xf32>
    %40 = vector.shape_cast %36 : vector<16x128xf32> to vector<1x16x128xf32>
    tpu.vector_store %arg6[%37, %c0_19, %c0_20], %40 {strides = array<i32>} : memref<8x16x128xf32, #tpu.memory_space<vmem>>, vector<1x16x128xf32>,
    %c1_i32 = arith.constant 1 : i32
    %c16_i32_21 = arith.constant 16 : i32
    %41 = arith.muli %c1_i32, %c16_i32_21 : i32
    %42 = tpu.assume_multiple %41, 16 : i32
    %43 = arith.index_cast %42 : i32 to index
    %c0_22 = arith.constant 0 : index
    %44 = vector.load %arg9[%43, %c0_22] : memref<128x512xf32, #tpu.memory_space<vmem>>, vector<16x512xf32>
    %45 = arith.truncf %36 : vector<16x128xf32> to vector<16x128xbf16>
    %c0_23 = arith.constant 0 : index
    %c0_24 = arith.constant 0 : index
    %46 = vector.load %arg4[%c0_23, %c0_24] : memref<128x512xbf16, #tpu.memory_space<vmem>>, vector<128x512xbf16>
    %cst_25 = arith.constant dense<0.000000e+00> : vector<16x512xf32>
    %47 = tpu.matmul %45, %46, %cst_25 {dimension_numbers = #tpu.dot_dimension_numbers<[1], [0], [0], [1], [0, 0, 1, 1], [], []>} : vector<16x128xbf16>, vector<128x512xbf16>, vector<16x512xf32> -> vector<16x512xf32>
    %48 = arith.addf %44, %47 : vector<16x512xf32>
    %49 = vector.extract_strided_slice %48 {offsets = [0, 0], sizes = [16, 384], strides = [1, 1]} : vector<16x512xf32> to vector<16x384xf32>
    %50 = arith.negf %49 : vector<16x384xf32>
    %51 = math.exp %50 : vector<16x384xf32>
    %cst_26 = arith.constant 1.000000e+00 : f32
    %52 = vector.broadcast %cst_26 : f32 to vector<16x384xf32>
    %53 = arith.addf %52, %51 : vector<16x384xf32>
    %54 = arith.divf %52, %53 : vector<16x384xf32>
    %55 = vector.extract_strided_slice %54 {offsets = [0, 0], sizes = [16, 128], strides = [1, 1]} : vector<16x384xf32> to vector<16x128xf32>
    %56 = vector.extract_strided_slice %54 {offsets = [0, 128], sizes = [16, 128], strides = [1, 1]} : vector<16x384xf32> to vector<16x128xf32>
    %57 = vector.extract_strided_slice %54 {offsets = [0, 256], sizes = [16, 128], strides = [1, 1]} : vector<16x384xf32> to vector<16x128xf32>
    %58 = vector.extract_strided_slice %48 {offsets = [0, 384], sizes = [16, 128], strides = [1, 1]} : vector<16x512xf32> to vector<16x128xf32>
    %59 = math.tanh %58 : vector<16x128xf32>
    %60 = arith.mulf %56, %34 : vector<16x128xf32>
    %61 = arith.mulf %55, %59 : vector<16x128xf32>
    %62 = arith.addf %60, %61 : vector<16x128xf32>
    %63 = math.tanh %62 : vector<16x128xf32>
    %64 = arith.mulf %57, %63 : vector<16x128xf32>
    %65 = arith.index_cast %c1_i32 : i32 to index
    %c0_27 = arith.constant 0 : index
    %c0_28 = arith.constant 0 : index
    %66 = vector.load %arg6[%65, %c0_27, %c0_28] : memref<8x16x128xf32, #tpu.memory_space<vmem>>, vector<1x16x128xf32>
    %67 = vector.shape_cast %66 : vector<1x16x128xf32> to vector<16x128xf32>
    %68 = vector.shape_cast %64 : vector<16x128xf32> to vector<1x16x128xf32>
    tpu.vector_store %arg6[%65, %c0_27, %c0_28], %68 {strides = array<i32>} : memref<8x16x128xf32, #tpu.memory_space<vmem>>, vector<1x16x128xf32>,
    %c2_i32 = arith.constant 2 : i32
    %c16_i32_29 = arith.constant 16 : i32
    %69 = arith.muli %c2_i32, %c16_i32_29 : i32
    %70 = tpu.assume_multiple %69, 16 : i32
    %71 = arith.index_cast %70 : i32 to index
    %c0_30 = arith.constant 0 : index
    %72 = vector.load %arg9[%71, %c0_30] : memref<128x512xf32, #tpu.memory_space<vmem>>, vector<16x512xf32>
    %73 = arith.truncf %64 : vector<16x128xf32> to vector<16x128xbf16>
    %c0_31 = arith.constant 0 : index
    %c0_32 = arith.constant 0 : index
    %74 = vector.load %arg4[%c0_31, %c0_32] : memref<128x512xbf16, #tpu.memory_space<vmem>>, vector<128x512xbf16>
    %cst_33 = arith.constant dense<0.000000e+00> : vector<16x512xf32>
    %75 = tpu.matmul %73, %74, %cst_33 {dimension_numbers = #tpu.dot_dimension_numbers<[1], [0], [0], [1], [0, 0, 1, 1], [], []>} : vector<16x128xbf16>, vector<128x512xbf16>, vector<16x512xf32> -> vector<16x512xf32>
    %76 = arith.addf %72, %75 : vector<16x512xf32>
    %77 = vector.extract_strided_slice %76 {offsets = [0, 0], sizes = [16, 384], strides = [1, 1]} : vector<16x512xf32> to vector<16x384xf32>
    %78 = arith.negf %77 : vector<16x384xf32>
    %79 = math.exp %78 : vector<16x384xf32>
    %cst_34 = arith.constant 1.000000e+00 : f32
    %80 = vector.broadcast %cst_34 : f32 to vector<16x384xf32>
    %81 = arith.addf %80, %79 : vector<16x384xf32>
    %82 = arith.divf %80, %81 : vector<16x384xf32>
    %83 = vector.extract_strided_slice %82 {offsets = [0, 0], sizes = [16, 128], strides = [1, 1]} : vector<16x384xf32> to vector<16x128xf32>
    %84 = vector.extract_strided_slice %82 {offsets = [0, 128], sizes = [16, 128], strides = [1, 1]} : vector<16x384xf32> to vector<16x128xf32>
    %85 = vector.extract_strided_slice %82 {offsets = [0, 256], sizes = [16, 128], strides = [1, 1]} : vector<16x384xf32> to vector<16x128xf32>
    %86 = vector.extract_strided_slice %76 {offsets = [0, 384], sizes = [16, 128], strides = [1, 1]} : vector<16x512xf32> to vector<16x128xf32>
    %87 = math.tanh %86 : vector<16x128xf32>
    %88 = arith.mulf %84, %62 : vector<16x128xf32>
    %89 = arith.mulf %83, %87 : vector<16x128xf32>
    %90 = arith.addf %88, %89 : vector<16x128xf32>
    %91 = math.tanh %90 : vector<16x128xf32>
    %92 = arith.mulf %85, %91 : vector<16x128xf32>
    %93 = arith.index_cast %c2_i32 : i32 to index
    %c0_35 = arith.constant 0 : index
    %c0_36 = arith.constant 0 : index
    %94 = vector.load %arg6[%93, %c0_35, %c0_36] : memref<8x16x128xf32, #tpu.memory_space<vmem>>, vector<1x16x128xf32>
    %95 = vector.shape_cast %94 : vector<1x16x128xf32> to vector<16x128xf32>
    %96 = vector.shape_cast %92 : vector<16x128xf32> to vector<1x16x128xf32>
    tpu.vector_store %arg6[%93, %c0_35, %c0_36], %96 {strides = array<i32>} : memref<8x16x128xf32, #tpu.memory_space<vmem>>, vector<1x16x128xf32>,
    %c3_i32 = arith.constant 3 : i32
    %c16_i32_37 = arith.constant 16 : i32
    %97 = arith.muli %c3_i32, %c16_i32_37 : i32
    %98 = tpu.assume_multiple %97, 16 : i32
    %99 = arith.index_cast %98 : i32 to index
    %c0_38 = arith.constant 0 : index
    %100 = vector.load %arg9[%99, %c0_38] : memref<128x512xf32, #tpu.memory_space<vmem>>, vector<16x512xf32>
    %101 = arith.truncf %92 : vector<16x128xf32> to vector<16x128xbf16>
    %c0_39 = arith.constant 0 : index
    %c0_40 = arith.constant 0 : index
    %102 = vector.load %arg4[%c0_39, %c0_40] : memref<128x512xbf16, #tpu.memory_space<vmem>>, vector<128x512xbf16>
    %cst_41 = arith.constant dense<0.000000e+00> : vector<16x512xf32>
    %103 = tpu.matmul %101, %102, %cst_41 {dimension_numbers = #tpu.dot_dimension_numbers<[1], [0], [0], [1], [0, 0, 1, 1], [], []>} : vector<16x128xbf16>, vector<128x512xbf16>, vector<16x512xf32> -> vector<16x512xf32>
    %104 = arith.addf %100, %103 : vector<16x512xf32>
    %105 = vector.extract_strided_slice %104 {offsets = [0, 0], sizes = [16, 384], strides = [1, 1]} : vector<16x512xf32> to vector<16x384xf32>
    %106 = arith.negf %105 : vector<16x384xf32>
    %107 = math.exp %106 : vector<16x384xf32>
    %cst_42 = arith.constant 1.000000e+00 : f32
    %108 = vector.broadcast %cst_42 : f32 to vector<16x384xf32>
    %109 = arith.addf %108, %107 : vector<16x384xf32>
    %110 = arith.divf %108, %109 : vector<16x384xf32>
    %111 = vector.extract_strided_slice %110 {offsets = [0, 0], sizes = [16, 128], strides = [1, 1]} : vector<16x384xf32> to vector<16x128xf32>
    %112 = vector.extract_strided_slice %110 {offsets = [0, 128], sizes = [16, 128], strides = [1, 1]} : vector<16x384xf32> to vector<16x128xf32>
    %113 = vector.extract_strided_slice %110 {offsets = [0, 256], sizes = [16, 128], strides = [1, 1]} : vector<16x384xf32> to vector<16x128xf32>
    %114 = vector.extract_strided_slice %104 {offsets = [0, 384], sizes = [16, 128], strides = [1, 1]} : vector<16x512xf32> to vector<16x128xf32>
    %115 = math.tanh %114 : vector<16x128xf32>
    %116 = arith.mulf %112, %90 : vector<16x128xf32>
    %117 = arith.mulf %111, %115 : vector<16x128xf32>
    %118 = arith.addf %116, %117 : vector<16x128xf32>
    %119 = math.tanh %118 : vector<16x128xf32>
    %120 = arith.mulf %113, %119 : vector<16x128xf32>
    %121 = arith.index_cast %c3_i32 : i32 to index
    %c0_43 = arith.constant 0 : index
    %c0_44 = arith.constant 0 : index
    %122 = vector.load %arg6[%121, %c0_43, %c0_44] : memref<8x16x128xf32, #tpu.memory_space<vmem>>, vector<1x16x128xf32>
    %123 = vector.shape_cast %122 : vector<1x16x128xf32> to vector<16x128xf32>
    %124 = vector.shape_cast %120 : vector<16x128xf32> to vector<1x16x128xf32>
    tpu.vector_store %arg6[%121, %c0_43, %c0_44], %124 {strides = array<i32>} : memref<8x16x128xf32, #tpu.memory_space<vmem>>, vector<1x16x128xf32>,
    %c4_i32 = arith.constant 4 : i32
    %c16_i32_45 = arith.constant 16 : i32
    %125 = arith.muli %c4_i32, %c16_i32_45 : i32
    %126 = tpu.assume_multiple %125, 16 : i32
    %127 = arith.index_cast %126 : i32 to index
    %c0_46 = arith.constant 0 : index
    %128 = vector.load %arg9[%127, %c0_46] : memref<128x512xf32, #tpu.memory_space<vmem>>, vector<16x512xf32>
    %129 = arith.truncf %120 : vector<16x128xf32> to vector<16x128xbf16>
    %c0_47 = arith.constant 0 : index
    %c0_48 = arith.constant 0 : index
    %130 = vector.load %arg4[%c0_47, %c0_48] : memref<128x512xbf16, #tpu.memory_space<vmem>>, vector<128x512xbf16>
    %cst_49 = arith.constant dense<0.000000e+00> : vector<16x512xf32>
    %131 = tpu.matmul %129, %130, %cst_49 {dimension_numbers = #tpu.dot_dimension_numbers<[1], [0], [0], [1], [0, 0, 1, 1], [], []>} : vector<16x128xbf16>, vector<128x512xbf16>, vector<16x512xf32> -> vector<16x512xf32>
    %132 = arith.addf %128, %131 : vector<16x512xf32>
    %133 = vector.extract_strided_slice %132 {offsets = [0, 0], sizes = [16, 384], strides = [1, 1]} : vector<16x512xf32> to vector<16x384xf32>
    %134 = arith.negf %133 : vector<16x384xf32>
    %135 = math.exp %134 : vector<16x384xf32>
    %cst_50 = arith.constant 1.000000e+00 : f32
    %136 = vector.broadcast %cst_50 : f32 to vector<16x384xf32>
    %137 = arith.addf %136, %135 : vector<16x384xf32>
    %138 = arith.divf %136, %137 : vector<16x384xf32>
    %139 = vector.extract_strided_slice %138 {offsets = [0, 0], sizes = [16, 128], strides = [1, 1]} : vector<16x384xf32> to vector<16x128xf32>
    %140 = vector.extract_strided_slice %138 {offsets = [0, 128], sizes = [16, 128], strides = [1, 1]} : vector<16x384xf32> to vector<16x128xf32>
    %141 = vector.extract_strided_slice %138 {offsets = [0, 256], sizes = [16, 128], strides = [1, 1]} : vector<16x384xf32> to vector<16x128xf32>
    %142 = vector.extract_strided_slice %132 {offsets = [0, 384], sizes = [16, 128], strides = [1, 1]} : vector<16x512xf32> to vector<16x128xf32>
    %143 = math.tanh %142 : vector<16x128xf32>
    %144 = arith.mulf %140, %118 : vector<16x128xf32>
    %145 = arith.mulf %139, %143 : vector<16x128xf32>
    %146 = arith.addf %144, %145 : vector<16x128xf32>
    %147 = math.tanh %146 : vector<16x128xf32>
    %148 = arith.mulf %141, %147 : vector<16x128xf32>
    %149 = arith.index_cast %c4_i32 : i32 to index
    %c0_51 = arith.constant 0 : index
    %c0_52 = arith.constant 0 : index
    %150 = vector.load %arg6[%149, %c0_51, %c0_52] : memref<8x16x128xf32, #tpu.memory_space<vmem>>, vector<1x16x128xf32>
    %151 = vector.shape_cast %150 : vector<1x16x128xf32> to vector<16x128xf32>
    %152 = vector.shape_cast %148 : vector<16x128xf32> to vector<1x16x128xf32>
    tpu.vector_store %arg6[%149, %c0_51, %c0_52], %152 {strides = array<i32>} : memref<8x16x128xf32, #tpu.memory_space<vmem>>, vector<1x16x128xf32>,
    %c5_i32 = arith.constant 5 : i32
    %c16_i32_53 = arith.constant 16 : i32
    %153 = arith.muli %c5_i32, %c16_i32_53 : i32
    %154 = tpu.assume_multiple %153, 16 : i32
    %155 = arith.index_cast %154 : i32 to index
    %c0_54 = arith.constant 0 : index
    %156 = vector.load %arg9[%155, %c0_54] : memref<128x512xf32, #tpu.memory_space<vmem>>, vector<16x512xf32>
    %157 = arith.truncf %148 : vector<16x128xf32> to vector<16x128xbf16>
    %c0_55 = arith.constant 0 : index
    %c0_56 = arith.constant 0 : index
    %158 = vector.load %arg4[%c0_55, %c0_56] : memref<128x512xbf16, #tpu.memory_space<vmem>>, vector<128x512xbf16>
    %cst_57 = arith.constant dense<0.000000e+00> : vector<16x512xf32>
    %159 = tpu.matmul %157, %158, %cst_57 {dimension_numbers = #tpu.dot_dimension_numbers<[1], [0], [0], [1], [0, 0, 1, 1], [], []>} : vector<16x128xbf16>, vector<128x512xbf16>, vector<16x512xf32> -> vector<16x512xf32>
    %160 = arith.addf %156, %159 : vector<16x512xf32>
    %161 = vector.extract_strided_slice %160 {offsets = [0, 0], sizes = [16, 384], strides = [1, 1]} : vector<16x512xf32> to vector<16x384xf32>
    %162 = arith.negf %161 : vector<16x384xf32>
    %163 = math.exp %162 : vector<16x384xf32>
    %cst_58 = arith.constant 1.000000e+00 : f32
    %164 = vector.broadcast %cst_58 : f32 to vector<16x384xf32>
    %165 = arith.addf %164, %163 : vector<16x384xf32>
    %166 = arith.divf %164, %165 : vector<16x384xf32>
    %167 = vector.extract_strided_slice %166 {offsets = [0, 0], sizes = [16, 128], strides = [1, 1]} : vector<16x384xf32> to vector<16x128xf32>
    %168 = vector.extract_strided_slice %166 {offsets = [0, 128], sizes = [16, 128], strides = [1, 1]} : vector<16x384xf32> to vector<16x128xf32>
    %169 = vector.extract_strided_slice %166 {offsets = [0, 256], sizes = [16, 128], strides = [1, 1]} : vector<16x384xf32> to vector<16x128xf32>
    %170 = vector.extract_strided_slice %160 {offsets = [0, 384], sizes = [16, 128], strides = [1, 1]} : vector<16x512xf32> to vector<16x128xf32>
    %171 = math.tanh %170 : vector<16x128xf32>
    %172 = arith.mulf %168, %146 : vector<16x128xf32>
    %173 = arith.mulf %167, %171 : vector<16x128xf32>
    %174 = arith.addf %172, %173 : vector<16x128xf32>
    %175 = math.tanh %174 : vector<16x128xf32>
    %176 = arith.mulf %169, %175 : vector<16x128xf32>
    %177 = arith.index_cast %c5_i32 : i32 to index
    %c0_59 = arith.constant 0 : index
    %c0_60 = arith.constant 0 : index
    %178 = vector.load %arg6[%177, %c0_59, %c0_60] : memref<8x16x128xf32, #tpu.memory_space<vmem>>, vector<1x16x128xf32>
    %179 = vector.shape_cast %178 : vector<1x16x128xf32> to vector<16x128xf32>
    %180 = vector.shape_cast %176 : vector<16x128xf32> to vector<1x16x128xf32>
    tpu.vector_store %arg6[%177, %c0_59, %c0_60], %180 {strides = array<i32>} : memref<8x16x128xf32, #tpu.memory_space<vmem>>, vector<1x16x128xf32>,
    %c6_i32 = arith.constant 6 : i32
    %c16_i32_61 = arith.constant 16 : i32
    %181 = arith.muli %c6_i32, %c16_i32_61 : i32
    %182 = tpu.assume_multiple %181, 16 : i32
    %183 = arith.index_cast %182 : i32 to index
    %c0_62 = arith.constant 0 : index
    %184 = vector.load %arg9[%183, %c0_62] : memref<128x512xf32, #tpu.memory_space<vmem>>, vector<16x512xf32>
    %185 = arith.truncf %176 : vector<16x128xf32> to vector<16x128xbf16>
    %c0_63 = arith.constant 0 : index
    %c0_64 = arith.constant 0 : index
    %186 = vector.load %arg4[%c0_63, %c0_64] : memref<128x512xbf16, #tpu.memory_space<vmem>>, vector<128x512xbf16>
    %cst_65 = arith.constant dense<0.000000e+00> : vector<16x512xf32>
    %187 = tpu.matmul %185, %186, %cst_65 {dimension_numbers = #tpu.dot_dimension_numbers<[1], [0], [0], [1], [0, 0, 1, 1], [], []>} : vector<16x128xbf16>, vector<128x512xbf16>, vector<16x512xf32> -> vector<16x512xf32>
    %188 = arith.addf %184, %187 : vector<16x512xf32>
    %189 = vector.extract_strided_slice %188 {offsets = [0, 0], sizes = [16, 384], strides = [1, 1]} : vector<16x512xf32> to vector<16x384xf32>
    %190 = arith.negf %189 : vector<16x384xf32>
    %191 = math.exp %190 : vector<16x384xf32>
    %cst_66 = arith.constant 1.000000e+00 : f32
    %192 = vector.broadcast %cst_66 : f32 to vector<16x384xf32>
    %193 = arith.addf %192, %191 : vector<16x384xf32>
    %194 = arith.divf %192, %193 : vector<16x384xf32>
    %195 = vector.extract_strided_slice %194 {offsets = [0, 0], sizes = [16, 128], strides = [1, 1]} : vector<16x384xf32> to vector<16x128xf32>
    %196 = vector.extract_strided_slice %194 {offsets = [0, 128], sizes = [16, 128], strides = [1, 1]} : vector<16x384xf32> to vector<16x128xf32>
    %197 = vector.extract_strided_slice %194 {offsets = [0, 256], sizes = [16, 128], strides = [1, 1]} : vector<16x384xf32> to vector<16x128xf32>
    %198 = vector.extract_strided_slice %188 {offsets = [0, 384], sizes = [16, 128], strides = [1, 1]} : vector<16x512xf32> to vector<16x128xf32>
    %199 = math.tanh %198 : vector<16x128xf32>
    %200 = arith.mulf %196, %174 : vector<16x128xf32>
    %201 = arith.mulf %195, %199 : vector<16x128xf32>
    %202 = arith.addf %200, %201 : vector<16x128xf32>
    %203 = math.tanh %202 : vector<16x128xf32>
    %204 = arith.mulf %197, %203 : vector<16x128xf32>
    %205 = arith.index_cast %c6_i32 : i32 to index
    %c0_67 = arith.constant 0 : index
    %c0_68 = arith.constant 0 : index
    %206 = vector.load %arg6[%205, %c0_67, %c0_68] : memref<8x16x128xf32, #tpu.memory_space<vmem>>, vector<1x16x128xf32>
    %207 = vector.shape_cast %206 : vector<1x16x128xf32> to vector<16x128xf32>
    %208 = vector.shape_cast %204 : vector<16x128xf32> to vector<1x16x128xf32>
    tpu.vector_store %arg6[%205, %c0_67, %c0_68], %208 {strides = array<i32>} : memref<8x16x128xf32, #tpu.memory_space<vmem>>, vector<1x16x128xf32>,
    %c7_i32 = arith.constant 7 : i32
    %c16_i32_69 = arith.constant 16 : i32
    %209 = arith.muli %c7_i32, %c16_i32_69 : i32
    %210 = tpu.assume_multiple %209, 16 : i32
    %211 = arith.index_cast %210 : i32 to index
    %c0_70 = arith.constant 0 : index
    %212 = vector.load %arg9[%211, %c0_70] : memref<128x512xf32, #tpu.memory_space<vmem>>, vector<16x512xf32>
    %213 = arith.truncf %204 : vector<16x128xf32> to vector<16x128xbf16>
    %c0_71 = arith.constant 0 : index
    %c0_72 = arith.constant 0 : index
    %214 = vector.load %arg4[%c0_71, %c0_72] : memref<128x512xbf16, #tpu.memory_space<vmem>>, vector<128x512xbf16>
    %cst_73 = arith.constant dense<0.000000e+00> : vector<16x512xf32>
    %215 = tpu.matmul %213, %214, %cst_73 {dimension_numbers = #tpu.dot_dimension_numbers<[1], [0], [0], [1], [0, 0, 1, 1], [], []>} : vector<16x128xbf16>, vector<128x512xbf16>, vector<16x512xf32> -> vector<16x512xf32>
    %216 = arith.addf %212, %215 : vector<16x512xf32>
    %217 = vector.extract_strided_slice %216 {offsets = [0, 0], sizes = [16, 384], strides = [1, 1]} : vector<16x512xf32> to vector<16x384xf32>
    %218 = arith.negf %217 : vector<16x384xf32>
    %219 = math.exp %218 : vector<16x384xf32>
    %cst_74 = arith.constant 1.000000e+00 : f32
    %220 = vector.broadcast %cst_74 : f32 to vector<16x384xf32>
    %221 = arith.addf %220, %219 : vector<16x384xf32>
    %222 = arith.divf %220, %221 : vector<16x384xf32>
    %223 = vector.extract_strided_slice %222 {offsets = [0, 0], sizes = [16, 128], strides = [1, 1]} : vector<16x384xf32> to vector<16x128xf32>
    %224 = vector.extract_strided_slice %222 {offsets = [0, 128], sizes = [16, 128], strides = [1, 1]} : vector<16x384xf32> to vector<16x128xf32>
    %225 = vector.extract_strided_slice %222 {offsets = [0, 256], sizes = [16, 128], strides = [1, 1]} : vector<16x384xf32> to vector<16x128xf32>
    %226 = vector.extract_strided_slice %216 {offsets = [0, 384], sizes = [16, 128], strides = [1, 1]} : vector<16x512xf32> to vector<16x128xf32>
    %227 = math.tanh %226 : vector<16x128xf32>
    %228 = arith.mulf %224, %202 : vector<16x128xf32>
    %229 = arith.mulf %223, %227 : vector<16x128xf32>
    %230 = arith.addf %228, %229 : vector<16x128xf32>
    %231 = math.tanh %230 : vector<16x128xf32>
    %232 = arith.mulf %225, %231 : vector<16x128xf32>
    %233 = arith.index_cast %c7_i32 : i32 to index
    %c0_75 = arith.constant 0 : index
    %c0_76 = arith.constant 0 : index
    %234 = vector.load %arg6[%233, %c0_75, %c0_76] : memref<8x16x128xf32, #tpu.memory_space<vmem>>, vector<1x16x128xf32>
    %235 = vector.shape_cast %234 : vector<1x16x128xf32> to vector<16x128xf32>
    %236 = vector.shape_cast %232 : vector<16x128xf32> to vector<1x16x128xf32>
    tpu.vector_store %arg6[%233, %c0_75, %c0_76], %236 {strides = array<i32>} : memref<8x16x128xf32, #tpu.memory_space<vmem>>, vector<1x16x128xf32>,
    %c8_i32 = arith.constant 8 : i32
    %c0_77 = arith.constant 0 : index
    %c0_78 = arith.constant 0 : index
    %237 = vector.load %arg10[%c0_77, %c0_78] : memref<16x128xf32, #tpu.memory_space<vmem>>, vector<16x128xf32>
    tpu.vector_store %arg10[%c0_77, %c0_78], %232 {strides = array<i32>} : memref<16x128xf32, #tpu.memory_space<vmem>>, vector<16x128xf32>,
    %c0_79 = arith.constant 0 : index
    %c0_80 = arith.constant 0 : index
    %238 = vector.load %arg11[%c0_79, %c0_80] : memref<16x128xf32, #tpu.memory_space<vmem>>, vector<16x128xf32>
    tpu.vector_store %arg11[%c0_79, %c0_80], %230 {strides = array<i32>} : memref<16x128xf32, #tpu.memory_space<vmem>>, vector<16x128xf32>,
    %c0_i32_81 = arith.constant 0 : i32
    %239 = arith.cmpi eq, %arg1, %c0_i32_81 : i32
    %240 = arith.extui %239 : i1 to i32
    %c0_i32_82 = arith.constant 0 : i32
    %241 = arith.cmpi ne, %240, %c0_i32_82 : i32
    scf.if %241 {
      %c0_83 = arith.constant 0 : index
      %c0_84 = arith.constant 0 : index
      %242 = vector.load %arg10[%c0_83, %c0_84] : memref<16x128xf32, #tpu.memory_space<vmem>>, vector<16x128xf32>
      %c0_85 = arith.constant 0 : index
      %c0_86 = arith.constant 0 : index
      %243 = vector.load %arg7[%c0_85, %c0_86] : memref<16x128xf32, #tpu.memory_space<vmem>>, vector<16x128xf32>
      tpu.vector_store %arg7[%c0_85, %c0_86], %242 {strides = array<i32>} : memref<16x128xf32, #tpu.memory_space<vmem>>, vector<16x128xf32>,
      %c0_87 = arith.constant 0 : index
      %c0_88 = arith.constant 0 : index
      %244 = vector.load %arg11[%c0_87, %c0_88] : memref<16x128xf32, #tpu.memory_space<vmem>>, vector<16x128xf32>
      %c0_89 = arith.constant 0 : index
      %c0_90 = arith.constant 0 : index
      %245 = vector.load %arg8[%c0_89, %c0_90] : memref<16x128xf32, #tpu.memory_space<vmem>>, vector<16x128xf32>
      tpu.vector_store %arg8[%c0_89, %c0_90], %244 {strides = array<i32>} : memref<16x128xf32, #tpu.memory_space<vmem>>, vector<16x128xf32>,
    } else {
    }
    return
  }
  func.func @transform_0(%arg0: i32, %arg1: i32) -> (i32, i32, i32) {
    %c0_i32 = arith.constant 0 : i32
    %c0_i32_0 = arith.constant 0 : i32
    return %arg1, %arg0, %c0_i32 : i32, i32, i32
  }
  func.func @transform_1(%arg0: i32, %arg1: i32) -> (i32, i32) {
    %c0_i32 = arith.constant 0 : i32
    %c0_i32_0 = arith.constant 0 : i32
    %c0_i32_1 = arith.constant 0 : i32
    return %c0_i32, %c0_i32_0 : i32, i32
  }
  func.func @transform_2(%arg0: i32, %arg1: i32) -> (i32, i32) {
    %c0_i32 = arith.constant 0 : i32
    %c0_i32_0 = arith.constant 0 : i32
    %c0_i32_1 = arith.constant 0 : i32
    return %c0_i32, %c0_i32_0 : i32, i32
  }
  func.func @transform_3(%arg0: i32, %arg1: i32) -> (i32, i32) {
    %c0_i32 = arith.constant 0 : i32
    %c0_i32_0 = arith.constant 0 : i32
    %c0_i32_1 = arith.constant 0 : i32
    return %c0_i32, %c0_i32_0 : i32, i32
  }
  func.func @transform_4(%arg0: i32, %arg1: i32) -> (i32, i32, i32) {
    %c0_i32 = arith.constant 0 : i32
    %c0_i32_0 = arith.constant 0 : i32
    return %arg1, %arg0, %c0_i32 : i32, i32, i32
  }
  func.func @transform_5(%arg0: i32, %arg1: i32) -> (i32, i32) {
    %c0_i32 = arith.constant 0 : i32
    %c0_i32_0 = arith.constant 0 : i32
    return %arg0, %c0_i32 : i32, i32
  }
  func.func @transform_6(%arg0: i32, %arg1: i32) -> (i32, i32) {
    %c0_i32 = arith.constant 0 : i32
    %c0_i32_0 = arith.constant 0 : i32
    return %arg0, %c0_i32 : i32, i32
  }
}

</mosaic_0001>

<bundles_post_ra>
// kernel: tpu_custom_call.1
= control target key start
LH: loop header
LB: loop body
LE: loop exit
PB: predicated region body
PF: predicated region fallthrough
CT: control target
= control target key end

     0   :  { %12 = vsyncpa [#allocation6], 0  ;;  %s5240_s0 = inlined_call_operand.hbm [shape: bf16[8,16,128], index: 0, kind: input, shape index: {}]   ;;  %s5241_s1 = inlined_call_operand.hbm [shape: bf16[128,512], index: 1, kind: input, shape index: {}]   ;;  %s5242_s2 = inlined_call_operand.hbm [shape: bf16[128,512], index: 2, kind: input, shape index: {}]   ;;  %s5243_s3 = inlined_call_operand.vmem [shape: f32[1,512], index: 3, kind: input, shape index: {}]   ;;  %s5244_s4 = inlined_call_operand.hbm [shape: f32[8,16,128], index: 4, kind: output, shape index: {0}]   ;;  %s5245_s5 = inlined_call_operand.hbm [shape: f32[16,128], index: 5, kind: output, shape index: {1}]   ;;  %s5246_s6 = inlined_call_operand.hbm [shape: f32[16,128], index: 6, kind: output, shape index: {2}]  }
   0x1   :  { %13 = vsyncpa [#allocation9], 0 }
   0x2   :  { %14 = vsyncpa [#allocation7], 0 }
   0x3   :  { %15 = vsyncpa [#allocation13], 0  ;;  %s4549_s21 = smov [#allocation8]   ;;  %s4409_s25 = scalar_lea.hbm %s5241_s1, 4096 }
   0x4   :  { %s33_s22 = sshll.u32 %s4549_s21, 4  ;;  %p4410_p0 = scmp.ne.s32.totalorder %s5241_s1, %s4409_s25  ;;  %s34_s22 = int_to_ptr.vmem [resolvable:$true] %s33_s22 }
   0x5   :  { %p4413_p1 = scmp.lt.u32.totalorder %s4409_s25, %s5241_s1 }
   0x7   :  { %p4415_p2 = pnand %p4413_p1, %p4410_p0 }
   0x9   :  { %4418 = shalt.err (!%p4415_p2)
}
   0xa   :  { %s4419_s30 = scalar_lea.vmem %s34_s22, 4096  ;;  %p4424_p4 = scmp.lt.s32.totalorder %s34_s22, %s34_s22 }
   0xb   :  { %p4420_p3 = scmp.ne.s32.totalorder %s34_s22, %s4419_s30  ;;  %p4425_p5 = scmp.lt.s32.totalorder %s4419_s30, %s4419_s30 }
   0xd   :  { %p4426_p6 = por %p4425_p5, %p4424_p4 }
   0xf   :  { %p4427_p7 = pnand %p4426_p6, %p4420_p3 }
  0x11   :  { %4430 = shalt.err (!%p4427_p7)
}
  0x12   :  { %s4550_s7 = smov 256   ;;  %s4551_s8 = smov 16  }
  0x13   :  { %39 = dma.hbm_to_vmem [thread:$0]  %s5241_s1, 4096, %s34_s22, [#allocation9], %s4550_s7, %s4550_s7, %s4551_s8  }
  0x14   :  { %s4552_s11 = smov [#allocation5]   ;;  %s4431_s15 = scalar_lea.hbm %s5240_s0, 1024 }
  0x15   :  { %s21_s12 = sshll.u32 %s4552_s11, 4  ;;  %p4432_p8 = scmp.ne.s32.totalorder %s5240_s0, %s4431_s15  ;;  %s22_s12 = int_to_ptr.vmem [resolvable:$true] %s21_s12 }
  0x16   :  { %p4435_p9 = scmp.lt.u32.totalorder %s4431_s15, %s5240_s0 }
  0x18   :  { %p4437_p10 = pnand %p4435_p9, %p4432_p8 }
  0x1a   :  { %4440 = shalt.err (!%p4437_p10)
}
  0x1b   :  { %s4441_s20 = scalar_lea.vmem %s22_s12, 1024  ;;  %p4446_p12 = scmp.lt.s32.totalorder %s22_s12, %s22_s12 }
  0x1c   :  { %p4442_p11 = scmp.ne.s32.totalorder %s22_s12, %s4441_s20  ;;  %p4447_p13 = scmp.lt.s32.totalorder %s4441_s20, %s4441_s20 }
  0x1e   :  { %p4448_p0 = por %p4447_p13, %p4446_p12 }
  0x20   :  { %p4449_p1 = pnand %p4448_p0, %p4442_p11 }
  0x22   :  { %4452 = shalt.err (!%p4449_p1)
}
  0x23   :  { %s4553_s1 = smov 64   ;;  %s4554_s21 = smov 4  }
  0x24   :  { %27 = dma.hbm_to_vmem [thread:$0]  %s5240_s0, 1024, %s22_s12, [#allocation6], %s4553_s1, %s4553_s1, %s4554_s21  }
  0x25   :  { %s4555_s24 = smov [#allocation10]   ;;  %s4453_s28 = scalar_lea.hbm %s5242_s2, 4096 }
  0x26   :  { %s45_s25 = sshll.u32 %s4555_s24, 4  ;;  %p4454_p2 = scmp.ne.s32.totalorder %s5242_s2, %s4453_s28  ;;  %s46_s25 = int_to_ptr.vmem [resolvable:$true] %s45_s25 }
  0x27   :  { %p4457_p3 = scmp.lt.u32.totalorder %s4453_s28, %s5242_s2 }
  0x29   :  { %p4459_p4 = pnand %p4457_p3, %p4454_p2 }
  0x2b   :  { %4462 = shalt.err (!%p4459_p4)
}
  0x2c   :  { %s4463_s11 = scalar_lea.vmem %s46_s25, 4096  ;;  %p4468_p6 = scmp.lt.s32.totalorder %s46_s25, %s46_s25 }
  0x2d   :  { %p4464_p5 = scmp.ne.s32.totalorder %s46_s25, %s4463_s11  ;;  %p4469_p7 = scmp.lt.s32.totalorder %s4463_s11, %s4463_s11 }
  0x2f   :  { %p4470_p8 = por %p4469_p7, %p4468_p6 }
  0x31   :  { %p4471_p9 = pnand %p4470_p8, %p4464_p5 }
  0x33   :  { %4474 = shalt.err (!%p4471_p9)
}
  0x34   :  { %51 = dma.hbm_to_vmem [thread:$0]  %s5242_s2, 4096, %s46_s25, [#allocation9], %s4550_s7, %s4550_s7, %s4551_s8  }
  0x35   :  { %4541 = dma.done.wait [#allocation6], 1024  }
  0x36   :  { %4542 = vsyncadd [#allocation6], 4294966272 }
  0x37   :  { %4543 = dma.done.wait [#allocation9], 8192  }
  0x38   :  { %4544 = vsyncadd [#allocation9], 4294959104  ;;  %v4556_v0 = vmov 0   ;;  %v3992_v1 = vld [vmem:[#allocation8 + $0x4] ss:$16 sps:$4 sm:$0xff]   ;;  %v4044_v43 = vld [vmem:[#allocation5 + $0x8] sm:$0xff]  }
  0x39   :  { %374 = vmatprep.mubr.bf16.mxu0 %v4556_v0  ;;  %487 = vmatprep.mubr.bf16.mxu1 %v4556_v0  ;;  %v3994_v2 = vld [vmem:[#allocation8 + $0xc] ss:$16 sps:$4 sm:$0xff]   ;;  %v3996_v3 = vld [vmem:[#allocation8] ss:$16 sps:$4 sm:$0xff]   ;;  %v3997_v4 = vld [vmem:[#allocation8 + $0x8] ss:$16 sps:$4 sm:$0xff]  }
  0x3a   :  { %342 = vmatprep.subr.bf16.mxu0 %v3992_v1  ;;  %455 = vmatprep.subr.bf16.mxu1 %v3994_v2  ;;  %v3998_v5 = vld [vmem:[#allocation8 + $0x24] ss:$16 sps:$4 sm:$0xff]   ;;  %v4000_v6 = vld [vmem:[#allocation8 + $0x2c] ss:$16 sps:$4 sm:$0xff]   ;;  %v4002_v7 = vld [vmem:[#allocation8 + $0x20] ss:$16 sps:$4 sm:$0xff]  }
  0x3b   :  { %343 = vmatpush1.bf16.msra.mxu0 %v3996_v3  ;;  %456 = vmatpush1.bf16.msra.mxu1 %v3997_v4  ;;  %v4003_v8 = vld [vmem:[#allocation8 + $0x28] ss:$16 sps:$4 sm:$0xff]   ;;  %v4004_v9 = vld [vmem:[#allocation8 + $0x44] ss:$16 sps:$4 sm:$0xff]   ;;  %v4006_v10 = vld [vmem:[#allocation8 + $0x4c] ss:$16 sps:$4 sm:$0xff]  }
  0x3c   :  { %344 = vmatprep.subr.bf16.mxu0 %v3998_v5  ;;  %457 = vmatprep.subr.bf16.mxu1 %v4000_v6  ;;  %v4008_v11 = vld [vmem:[#allocation8 + $0x40] ss:$16 sps:$4 sm:$0xff]   ;;  %v4009_v12 = vld [vmem:[#allocation8 + $0x48] ss:$16 sps:$4 sm:$0xff]   ;;  %v4010_v13 = vld [vmem:[#allocation8 + $0x64] ss:$16 sps:$4 sm:$0xff]  }
  0x3d   :  { %v4012_v14 = vld [vmem:[#allocation8 + $0x6c] ss:$16 sps:$4 sm:$0xff]   ;;  %v4014_v15 = vld [vmem:[#allocation8 + $0x60] ss:$16 sps:$4 sm:$0xff]   ;;  %v4015_v16 = vld [vmem:[#allocation8 + $0x68] ss:$16 sps:$4 sm:$0xff]  }
  0x3e   :  { %v4016_v17 = vld [vmem:[#allocation8 + $0x84] ss:$16 sps:$4 sm:$0xff]   ;;  %v4018_v18 = vld [vmem:[#allocation8 + $0x8c] ss:$16 sps:$4 sm:$0xff]   ;;  %v4020_v19 = vld [vmem:[#allocation8 + $0x80] ss:$16 sps:$4 sm:$0xff]  }
  0x3f   :  { %345 = vmatpush1.bf16.msra.mxu0 %v4002_v7  ;;  %458 = vmatpush1.bf16.msra.mxu1 %v4003_v8  ;;  %v4021_v20 = vld [vmem:[#allocation8 + $0x88] ss:$16 sps:$4 sm:$0xff]   ;;  %v4022_v21 = vld [vmem:[#allocation8 + $0xa4] ss:$16 sps:$4 sm:$0xff]   ;;  %v4024_v22 = vld [vmem:[#allocation8 + $0xac] ss:$16 sps:$4 sm:$0xff]  }
  0x40   :  { %346 = vmatprep.subr.bf16.mxu0 %v4004_v9  ;;  %459 = vmatprep.subr.bf16.mxu1 %v4006_v10  ;;  %v4026_v23 = vld [vmem:[#allocation8 + $0xa0] ss:$16 sps:$4 sm:$0xff]   ;;  %v4027_v24 = vld [vmem:[#allocation8 + $0xa8] ss:$16 sps:$4 sm:$0xff]   ;;  %v4028_v25 = vld [vmem:[#allocation8 + $0xc4] ss:$16 sps:$4 sm:$0xff]  }
  0x41   :  { %v4030_v26 = vld [vmem:[#allocation8 + $0xcc] ss:$16 sps:$4 sm:$0xff]   ;;  %v4032_v27 = vld [vmem:[#allocation8 + $0xc0] ss:$16 sps:$4 sm:$0xff]   ;;  %v4033_v28 = vld [vmem:[#allocation8 + $0xc8] ss:$16 sps:$4 sm:$0xff]  }
  0x42   :  { %v4034_v29 = vld [vmem:[#allocation8 + $0xe4] ss:$16 sps:$4 sm:$0xff]   ;;  %v4036_v30 = vld [vmem:[#allocation8 + $0xec] ss:$16 sps:$4 sm:$0xff]   ;;  %v4038_v31 = vld [vmem:[#allocation8 + $0xe0] ss:$16 sps:$4 sm:$0xff]  }
  0x43   :  { %347 = vmatpush1.bf16.msra.mxu0 %v4008_v11  ;;  %460 = vmatpush1.bf16.msra.mxu1 %v4009_v12  ;;  %v4039_v32 = vld [vmem:[#allocation8 + $0xe8] ss:$16 sps:$4 sm:$0xff]   ;;  %v4642_v33 = vld [vmem:[#allocation10 + $0x4] ss:$16 sps:$4 sm:$0xff]   ;;  %v4644_v34 = vld [vmem:[#allocation10 + $0xc] ss:$16 sps:$4 sm:$0xff]   ;;  %v114_v11 = vlaneseq }
  0x44   :  { %348 = vmatprep.subr.bf16.mxu0 %v4010_v13  ;;  %461 = vmatprep.subr.bf16.mxu1 %v4012_v14  ;;  %v4040_v35 = vld [vmem:[#allocation5] sm:$0xff]   ;;  %v4652_v38 = vld [vmem:[#allocation10 + $0x8] ss:$16 sps:$4 sm:$0xff]   ;;  %v4654_v39 = vld [vmem:[#allocation10 + $0x2c] ss:$16 sps:$4 sm:$0xff]   ;;  %v4557_v10 = vmov 0.0|0.0  }
  0x45   :  { %v4646_v36 = vld [vmem:[#allocation10] ss:$16 sps:$4 sm:$0xff]   ;;  %v4649_v37 = vld [vmem:[#allocation10 + $0x24] ss:$16 sps:$4 sm:$0xff]   ;;  %v4665_v42 = vld [vmem:[#allocation10 + $0x28] ss:$16 sps:$4 sm:$0xff]  }
  0x46   :  { %v4658_v40 = vld [vmem:[#allocation10 + $0x20] ss:$16 sps:$4 sm:$0xff]   ;;  %v4662_v41 = vld [vmem:[#allocation10 + $0x44] ss:$16 sps:$4 sm:$0xff]   ;;  %v4674_v46 = vld [vmem:[#allocation10 + $0x4c] ss:$16 sps:$4 sm:$0xff]  }
  0x47   :  { %349 = vmatpush1.bf16.msra.mxu0 %v4014_v15  ;;  %462 = vmatpush1.bf16.msra.mxu1 %v4015_v16  ;;  %v4669_v44 = vld [vmem:[#allocation10 + $0x40] ss:$16 sps:$4 sm:$0xff]   ;;  %v4672_v45 = vld [vmem:[#allocation10 + $0x64] ss:$16 sps:$4 sm:$0xff]   ;;  %v4677_v47 = vld [vmem:[#allocation10 + $0x48] ss:$16 sps:$4 sm:$0xff]  }
  0x48   :  { %350 = vmatprep.subr.bf16.mxu0 %v4016_v17  ;;  %463 = vmatprep.subr.bf16.mxu1 %v4018_v18  ;;  %v4679_v48 = vld [vmem:[#allocation10 + $0x6c] ss:$16 sps:$4 sm:$0xff]   ;;  %v4684_v49 = vld [vmem:[#allocation10 + $0x60] ss:$16 sps:$4 sm:$0xff]   ;;  %v4687_v50 = vld [vmem:[#allocation10 + $0x84] ss:$16 sps:$4 sm:$0xff]  }
  0x49   :  { %v4691_v51 = vld [vmem:[#allocation10 + $0x68] ss:$16 sps:$4 sm:$0xff]   ;;  %v4051_v52 = vld [vmem:[#allocation5 + $0x10] sm:$0xff]   ;;  %v4697_v54 = vld [vmem:[#allocation10 + $0x8c] ss:$16 sps:$4 sm:$0xff]   ;;  %v115_v12 = vshrl.u32 %v114_v11, 7 }
  0x4a   :  { %v4694_v53 = vld [vmem:[#allocation10 + $0x80] ss:$16 sps:$4 sm:$0xff]   ;;  %v4700_v55 = vld [vmem:[#allocation10 + $0xa4] ss:$16 sps:$4 sm:$0xff]   ;;  %v4703_v56 = vld [vmem:[#allocation10 + $0x88] ss:$16 sps:$4 sm:$0xff]  }
  0x4b   :  { %351 = vmatpush1.bf16.msra.mxu0 %v4020_v19  ;;  %464 = vmatpush1.bf16.msra.mxu1 %v4021_v20  ;;  %v4705_v57 = vld [vmem:[#allocation10 + $0xac] ss:$16 sps:$4 sm:$0xff]   ;;  %v4707_v58 = vld [vmem:[#allocation10 + $0xa0] ss:$16 sps:$4 sm:$0xff]   ;;  %v4711_v59 = vld [vmem:[#allocation10 + $0xc4] ss:$16 sps:$4 sm:$0xff]  }
  0x4c   :  { %352 = vmatprep.subr.bf16.mxu0 %v4022_v21  ;;  %465 = vmatprep.subr.bf16.mxu1 %v4024_v22  ;;  %v4713_v60 = vld [vmem:[#allocation10 + $0xa8] ss:$16 sps:$4 sm:$0xff]   ;;  %v4719_v62 = vld [vmem:[#allocation10 + $0xc0] ss:$16 sps:$4 sm:$0xff]   ;;  %v4722_v63 = vld [vmem:[#allocation10 + $0xcc] ss:$16 sps:$4 sm:$0xff]  }
  0x4d   :  { %v4058_v61 = vld [vmem:[#allocation5 + $0x18] sm:$0xff]   ;;  %v4724_v1 = vld [vmem:[#allocation10 + $0xe4] ss:$16 sps:$4 sm:$0xff]   ;;  %v4733_v4 = vld [vmem:[#allocation10 + $0xe0] ss:$16 sps:$4 sm:$0xff]   ;;  %v116_v13 = vsub.s32 0, %v115_v12 }
  0x4e   :  { %v4726_v2 = vld [vmem:[#allocation10 + $0xc8] ss:$16 sps:$4 sm:$0xff]   ;;  %v4729_v3 = vld [vmem:[#allocation10 + $0xec] ss:$16 sps:$4 sm:$0xff]   ;;  %v4065_v6 = vld [vmem:[#allocation5 + $0x20] sm:$0xff]   ;;  %v120_v15 = vsub.s32 1, %v115_v12 }
  0x4f   :  { %353 = vmatpush1.bf16.msra.mxu0 %v4026_v23  ;;  %466 = vmatpush1.bf16.msra.mxu1 %v4027_v24  ;;  %v4737_v5 = vld [vmem:[#allocation10 + $0xe8] ss:$16 sps:$4 sm:$0xff]   ;;  %v4079_v8 = vld [vmem:[#allocation5 + $0x30] sm:$0xff]   ;;  %v112_v14 = vld [vmem:[%s5243_s3] sm:$0xf]  ;;  %v124_v19 = vsub.s32 2, %v115_v12 }
  0x50   :  { %354 = vmatprep.subr.bf16.mxu0 %v4028_v25  ;;  %467 = vmatprep.subr.bf16.mxu1 %v4030_v26  ;;  %v4072_v7 = vld [vmem:[#allocation5 + $0x28] sm:$0xff]   ;;  %v4086_v9 = vld [vmem:[#allocation5 + $0x38] sm:$0xff]   ;;  %v4793_v16 = vrot.slane %v112_v14, %v116_v13  ;;  %v4795_v17 = vrot.slane %v112_v14, %v120_v15  ;;  %s4558_s3 = smov [#allocation12]   ;;  %s4559_s13 = smov [#allocation11]  }
  0x51   :  { %s3467_s8 = sshll.u32 %s4558_s3, 4  ;;  %s3455_s14 = sshll.u32 %s4559_s13, 4  ;;  %s3468_s8 = int_to_ptr.vmem [resolvable:$true] %s3467_s8  ;;  %s5181_s14 = int_to_ptr.vmem [resolvable:$true] %s3455_s14 }
  0x52   :  { %s4560_s15 = smov [#allocation14]   ;;  %s4475_s17 = scalar_lea.vmem %s3468_s8, 256 }
  0x53   :  { %355 = vmatpush1.bf16.msra.mxu0 %v4032_v27  ;;  %468 = vmatpush1.bf16.msra.mxu1 %v4033_v28  ;;  %v128_v28 = vsub.s32 3, %v115_v12  ;;  %s3479_s16 = sshll.u32 %s4560_s15, 4  ;;  %p4476_p10 = scmp.ne.s32.totalorder %s3468_s8, %s4475_s17  ;;  %s5183_s16 = int_to_ptr.vmem [resolvable:$true] %s3479_s16 }
  0x54   :  { %356 = vmatprep.subr.bf16.mxu0 %v4034_v29  ;;  %469 = vmatprep.subr.bf16.mxu1 %v4036_v30  ;;  %p4480_p11 = scmp.lt.s32.totalorder %s3468_s8, %s3468_s8  ;;  %p4481_p12 = scmp.lt.s32.totalorder %s4475_s17, %s4475_s17 }
  0x56   :  { %p4482_p13 = por %p4481_p12, %p4480_p11 }
  0x57   :  { %357 = vmatpush1.bf16.msra.mxu0 %v4038_v31  ;;  %470 = vmatpush1.bf16.msra.mxu1 %v4039_v32  ;;  %v4800_v32 = vrot.slane %v112_v14, %v124_v19 }
  0x58   :  { %848 = vmatprep.subr.bf16.mxu0 %v4642_v33  ;;  %891 = vmatprep.subr.bf16.mxu1 %v4644_v34  ;;  %p4483_p0 = pnand %p4482_p13, %p4476_p10 }
  0x5a   :  { %375 = vmatmul.mubr.bf16.vlgmr.msra.gmra.mrb[0].mxu0 %v4040_v35  ;;  %488 = vmatmul.mubr.bf16.vlgmr.msra.gmra.mrb[0].mxu1 %v4040_v35 }
  0x5b   :  { %849 = vmatpush1.bf16.msra.mxu0 %v4646_v36  ;;  %384 = vmatprep.mubr.bf16.mxu0 %v4556_v0 }
  0x5c   :  { %497 = vmatprep.mubr.bf16.mxu1 %v4556_v0  ;;  %850 = vmatprep.subr.bf16.mxu0 %v4649_v37 }
  0x5d   :  { %892 = vmatpush1.bf16.msra.mxu1 %v4652_v38 }
  0x5e   :  { %893 = vmatprep.subr.bf16.mxu1 %v4654_v39 }
  0x5f   :  { %851 = vmatpush1.bf16.msra.mxu0 %v4658_v40 }
  0x60   :  { %852 = vmatprep.subr.bf16.mxu0 %v4662_v41 }
  0x61   :  { %894 = vmatpush1.bf16.msra.mxu1 %v4665_v42 }
  0x62   :  { %385 = vmatmul.mubr.bf16.gmra.mrb[4].mxu0 %v4044_v43  ;;  %498 = vmatmul.mubr.bf16.gmra.mrb[4].mxu1 %v4044_v43 }
  0x63   :  { %394 = vmatprep.mubr.bf16.mxu0 %v4556_v0  ;;  %507 = vmatprep.mubr.bf16.mxu1 %v4556_v0 }
  0x64   :  { %853 = vmatpush1.bf16.msra.mxu0 %v4669_v44  ;;  %895 = vmatprep.subr.bf16.mxu1 %v4674_v46 }
  0x65   :  { %854 = vmatprep.subr.bf16.mxu0 %v4672_v45  ;;  %896 = vmatpush1.bf16.msra.mxu1 %v4677_v47 }
  0x66   :  { %897 = vmatprep.subr.bf16.mxu1 %v4679_v48 }
  0x68   :  { %855 = vmatpush1.bf16.msra.mxu0 %v4684_v49 }
  0x69   :  { %856 = vmatprep.subr.bf16.mxu0 %v4687_v50  ;;  %898 = vmatpush1.bf16.msra.mxu1 %v4691_v51 }
  0x6a   :  { %395 = vmatmul.mubr.bf16.gmra.mrb[8].mxu0 %v4051_v52  ;;  %508 = vmatmul.mubr.bf16.gmra.mrb[8].mxu1 %v4051_v52 }
  0x6b   :  { %404 = vmatprep.mubr.bf16.mxu0 %v4556_v0  ;;  %517 = vmatprep.mubr.bf16.mxu1 %v4556_v0 }
  0x6c   :  { %857 = vmatpush1.bf16.msra.mxu0 %v4694_v53  ;;  %899 = vmatprep.subr.bf16.mxu1 %v4697_v54 }
  0x6d   :  { %858 = vmatprep.subr.bf16.mxu0 %v4700_v55  ;;  %900 = vmatpush1.bf16.msra.mxu1 %v4703_v56 }
  0x6e   :  { %901 = vmatprep.subr.bf16.mxu1 %v4705_v57 }
  0x70   :  { %859 = vmatpush1.bf16.msra.mxu0 %v4707_v58 }
  0x71   :  { %860 = vmatprep.subr.bf16.mxu0 %v4711_v59  ;;  %902 = vmatpush1.bf16.msra.mxu1 %v4713_v60 }
  0x72   :  { %405 = vmatmul.mubr.bf16.gmra.mrb[12].mxu0 %v4058_v61  ;;  %518 = vmatmul.mubr.bf16.gmra.mrb[12].mxu1 %v4058_v61  ;;  %v4803_v61 = vrot.slane %v112_v14, %v128_v28 }
  0x73   :  { %414 = vmatprep.mubr.bf16.mxu0 %v4556_v0  ;;  %527 = vmatprep.mubr.bf16.mxu1 %v4556_v0 }
  0x74   :  { %861 = vmatpush1.bf16.msra.mxu0 %v4719_v62  ;;  %903 = vmatprep.subr.bf16.mxu1 %v4722_v63 }
  0x75   :  { %862 = vmatprep.subr.bf16.mxu0 %v4724_v1  ;;  %904 = vmatpush1.bf16.msra.mxu1 %v4726_v2 }
  0x76   :  { %905 = vmatprep.subr.bf16.mxu1 %v4729_v3 }
  0x78   :  { %863 = vmatpush1.bf16.msra.mxu0 %v4733_v4 }
  0x79   :  { %906 = vmatpush1.bf16.msra.mxu1 %v4737_v5  ;;  %1196 = vmatprep.subr.bf16.mxu0 %v4642_v33 }
  0x7a   :  { %415 = vmatmul.mubr.bf16.gmra.mrb[16].mxu0 %v4065_v6  ;;  %528 = vmatmul.mubr.bf16.gmra.mrb[16].mxu1 %v4065_v6 }
  0x7b   :  { %424 = vmatprep.mubr.bf16.mxu0 %v4556_v0  ;;  %537 = vmatprep.mubr.bf16.mxu1 %v4556_v0 }
  0x7c   :  { %1239 = vmatprep.subr.bf16.mxu1 %v4644_v34 }
  0x82   :  { %425 = vmatmul.mubr.bf16.gmra.mrb[20].mxu0 %v4072_v7  ;;  %538 = vmatmul.mubr.bf16.gmra.mrb[20].mxu1 %v4072_v7 }
  0x83   :  { %434 = vmatprep.mubr.bf16.mxu0 %v4556_v0  ;;  %547 = vmatprep.mubr.bf16.mxu1 %v4556_v0 }
  0x8a   :  { %435 = vmatmul.mubr.bf16.gmra.mrb[24].mxu0 %v4079_v8  ;;  %548 = vmatmul.mubr.bf16.gmra.mrb[24].mxu1 %v4079_v8 }
  0x8b   :  { %444 = vmatprep.mubr.bf16.mxu0 %v4556_v0  ;;  %557 = vmatprep.mubr.bf16.mxu1 %v4556_v0 }
  0x92   :  { %445 = vmatmul.mubr.bf16.gmra.mrb[28].mxu0 %v4086_v9  ;;  %558 = vmatmul.mubr.bf16.gmra.mrb[28].mxu1 %v4086_v9 }
  0x93   :  { %880 = vmatprep.mubr.bf16.mxu0 %v4556_v0  ;;  %923 = vmatprep.mubr.bf16.mxu1 %v4556_v0 }
  0x9a   :  { %881 = vmatmul.mubr.bf16.vlgmr.msra.gmra.mrb[0].mxu0 %v4557_v10  ;;  %924 = vmatmul.mubr.bf16.vlgmr.msra.gmra.mrb[0].mxu1 %v4557_v10 }
  0x9b   :  { %1197 = vmatpush1.bf16.msra.mxu0 %v4646_v36  ;;  %1240 = vmatpush1.bf16.msra.mxu1 %v4652_v38 }
  0x9c   :  { %1198 = vmatprep.subr.bf16.mxu0 %v4649_v37  ;;  %1241 = vmatprep.subr.bf16.mxu1 %v4654_v39 }
  0x9d   :  { %1228 = vmatprep.mubr.bf16.mxu0 %v4556_v0  ;;  %1271 = vmatprep.mubr.bf16.mxu1 %v4556_v0 }
  0x9f   :  { %1199 = vmatpush1.bf16.msra.mxu0 %v4658_v40  ;;  %1242 = vmatpush1.bf16.msra.mxu1 %v4665_v42 }
  0xa0   :  { %1200 = vmatprep.subr.bf16.mxu0 %v4662_v41  ;;  %1243 = vmatprep.subr.bf16.mxu1 %v4674_v46 }
  0xa3   :  { %1201 = vmatpush1.bf16.msra.mxu0 %v4669_v44  ;;  %1244 = vmatpush1.bf16.msra.mxu1 %v4677_v47 }
  0xa4   :  { %1202 = vmatprep.subr.bf16.mxu0 %v4672_v45  ;;  %1245 = vmatprep.subr.bf16.mxu1 %v4679_v48 }
  0xa7   :  { %1203 = vmatpush1.bf16.msra.mxu0 %v4684_v49  ;;  %1246 = vmatpush1.bf16.msra.mxu1 %v4691_v51 }
  0xa8   :  { %1204 = vmatprep.subr.bf16.mxu0 %v4687_v50  ;;  %1247 = vmatprep.subr.bf16.mxu1 %v4697_v54 }
  0xab   :  { %1205 = vmatpush1.bf16.msra.mxu0 %v4694_v53  ;;  %1248 = vmatpush1.bf16.msra.mxu1 %v4703_v56 }
  0xac   :  { %1206 = vmatprep.subr.bf16.mxu0 %v4700_v55  ;;  %1249 = vmatprep.subr.bf16.mxu1 %v4705_v57 }
  0xaf   :  { %1207 = vmatpush1.bf16.msra.mxu0 %v4707_v58  ;;  %1250 = vmatpush1.bf16.msra.mxu1 %v4713_v60 }
  0xb0   :  { %1208 = vmatprep.subr.bf16.mxu0 %v4711_v59  ;;  %1251 = vmatprep.subr.bf16.mxu1 %v4722_v63 }
  0xb3   :  { %1209 = vmatpush1.bf16.msra.mxu0 %v4719_v62  ;;  %1252 = vmatpush1.bf16.msra.mxu1 %v4726_v2 }
  0xb4   :  { %1210 = vmatprep.subr.bf16.mxu0 %v4724_v1  ;;  %1253 = vmatprep.subr.bf16.mxu1 %v4729_v3 }
  0xb7   :  { %1211 = vmatpush1.bf16.msra.mxu0 %v4733_v4  ;;  %1254 = vmatpush1.bf16.msra.mxu1 %v4737_v5 }
  0xb8   :  { %1545 = vmatprep.subr.bf16.mxu0 %v4642_v33  ;;  %1588 = vmatprep.subr.bf16.mxu1 %v4644_v34 }
 0x16d   :  { %v882_v18 = vpop.f32.mrb[0].mxu0  ;;  %v925_v20 = vpop.f32.mrb[0].mxu1 }
 0x16e   :  { %v3850_v21 = vadd.f32 %v882_v18, %v4793_v16  ;;  %v884_v22 = vpop.f32.mrb[1].mxu0  ;;  %v927_v23 = vpop.f32.mrb[1].mxu1  ;;  %v3882_v6 = vadd.f32 %v925_v20, %v4800_v32 }
 0x16f   :  { %v3851_v24 = vadd.f32 %v884_v22, %v4795_v17  ;;  %v886_v25 = vpop.f32.mrb[2].mxu0  ;;  %v929_v26 = vpop.f32.mrb[2].mxu1  ;;  %v3883_v8 = vadd.f32 %v927_v23, %v4803_v61 }
 0x170   :  { %v3578_v27 = vmul.f32 -1.442695, %v3850_v21  ;;  %v3852_v29 = vadd.f32 %v886_v25, %v4793_v16  ;;  %v888_v30 = vpop.f32.mrb[3].mxu0  ;;  %v931_v31 = vpop.f32.mrb[3].mxu1  ;;  %v3884_v7 = vadd.f32 %v929_v26, %v4800_v32  ;;  %v3580_v9 = vmul.f32 -1.442695, %v3882_v6 }
 0x171   :  { %v3579_v33 = vmul.f32 -1.442695, %v3851_v24  ;;  %v3853_v35 = vadd.f32 %v888_v30, %v4795_v17  ;;  %v3885_v12 = vadd.f32 %v931_v31, %v4803_v61 }
 0x172   :  { %4153 = vpow2.f32 %v3578_v27  ;;  %v3581_v43 = vmul.f32 -1.442695, %v3852_v29  ;;  %v3583_v10 = vmul.f32 -1.442695, %v3884_v7 }
 0x173   :  { %v3582_v52 = vmul.f32 -1.442695, %v3853_v35  ;;  %4155 = vpow2.f32 %v3579_v33 }
 0x174   :  { %4157 = vpow2.f32 %v3581_v43 }
 0x175   :  { %4159 = vpow2.f32 %v3582_v52 }
 0x176   :  { %4161 = vtanh.f32 %v3883_v8 }
 0x177   :  { %4163 = vpow2.f32 %v3580_v9 }
 0x178   :  { %4165 = vpow2.f32 %v3583_v10 }
 0x17c   :  { %v4154_v11 = vpop.eup %4153 }
 0x17d   :  { %v960_v13 = vadd.f32 1.0, %v4154_v11  ;;  %v4156_v15 = vpop.eup %4155 }
 0x17e   :  { %v4158_v14 = vpop.eup %4157  ;;  %v961_v18 = vadd.f32 1.0, %v4156_v15 }
 0x17f   :  { %4167 = vrcp.f32 %v960_v13  ;;  %v963_v19 = vadd.f32 1.0, %v4158_v14  ;;  %v4160_v20 = vpop.eup %4159 }
 0x180   :  { %4169 = vtanh.f32 %v3885_v12  ;;  %v964_v21 = vadd.f32 1.0, %v4160_v20  ;;  %v4162_v22 = vpop.eup %4161 }
 0x181   :  { %4171 = vrcp.f32 %v961_v18  ;;  %v4164_v23 = vpop.eup %4163 }
 0x182   :  { %4173 = vrcp.f32 %v963_v19  ;;  %v4166_v24 = vpop.eup %4165  ;;  %v962_v29 = vadd.f32 1.0, %v4164_v23 }
 0x183   :  { %4175 = vrcp.f32 %v964_v21  ;;  %v965_v52 = vadd.f32 1.0, %v4166_v24 }
 0x184   :  { %4177 = vrcp.f32 %v962_v29 }
 0x189   :  { %v4168_v25 = vpop.eup %4167 }
 0x18a   :  { %v4170_v26 = vpop.eup %4169  ;;  %v982_v27 = vmul.f32 %v4168_v25, %v4162_v22 }
 0x18b   :  { %v4172_v28 = vpop.eup %4171 }
 0x18c   :  { %v4174_v30 = vpop.eup %4173  ;;  %v980_v31 = vmul.f32 0.0, %v4172_v28 }
 0x18d   :  { %v983_v33 = vmul.f32 %v4174_v30, %v4170_v26  ;;  %v4176_v35 = vpop.eup %4175 }
 0x18e   :  { %v4809_v43 = vadd.f32 %v982_v27, %v980_v31  ;;  %v981_v6 = vmul.f32 0.0, %v4176_v35  ;;  %v4178_v8 = vpop.eup %4177 }
 0x190   :  { %4179 = vtanh.f32 %v4809_v43  ;;  %v4812_v7 = vadd.f32 %v983_v33, %v981_v6 }
 0x191   :  { %4181 = vrcp.f32 %v965_v52 }
 0x192   :  { %4183 = vtanh.f32 %v4812_v7 }
 0x19a   :  { %v4180_v9 = vpop.eup %4179 }
 0x19b   :  { %v988_v10 = vmul.f32 %v4180_v9, %v4178_v8  ;;  %v4182_v11 = vpop.eup %4181 }
 0x19c   :  { %v4184_v12 = vpop.eup %4183 }
 0x19d   :  { %990 = vst [vmem:[#allocation11] sm:$0xff] %v988_v10  ;;  %v989_v13 = vmul.f32 %v4184_v12, %v4182_v11 }
 0x19f   :  { %991 = vst [vmem:[#allocation11 + $0x8] sm:$0xff] %v989_v13  ;;  %v1003_v15 = vpack.c.bf16 %v989_v13, %v988_v10 }
 0x1a1   :  { %1229 = vmatmul.mubr.bf16.vlgmr.msra.gmra.mrb[4].mxu0 %v1003_v15  ;;  %1272 = vmatmul.mubr.bf16.vlgmr.msra.gmra.mrb[4].mxu1 %v1003_v15 }
 0x1a2   :  { %1546 = vmatpush1.bf16.msra.mxu0 %v4646_v36  ;;  %1589 = vmatpush1.bf16.msra.mxu1 %v4652_v38 }
 0x1a3   :  { %1547 = vmatprep.subr.bf16.mxu0 %v4649_v37  ;;  %1590 = vmatprep.subr.bf16.mxu1 %v4654_v39 }
 0x1a4   :  { %1577 = vmatprep.mubr.bf16.mxu0 %v4556_v0  ;;  %1620 = vmatprep.mubr.bf16.mxu1 %v4556_v0 }
 0x1a6   :  { %1548 = vmatpush1.bf16.msra.mxu0 %v4658_v40  ;;  %1591 = vmatpush1.bf16.msra.mxu1 %v4665_v42 }
 0x1a7   :  { %1549 = vmatprep.subr.bf16.mxu0 %v4662_v41  ;;  %1592 = vmatprep.subr.bf16.mxu1 %v4674_v46 }
 0x1aa   :  { %1550 = vmatpush1.bf16.msra.mxu0 %v4669_v44  ;;  %1593 = vmatpush1.bf16.msra.mxu1 %v4677_v47 }
 0x1ab   :  { %1551 = vmatprep.subr.bf16.mxu0 %v4672_v45  ;;  %1594 = vmatprep.subr.bf16.mxu1 %v4679_v48 }
 0x1ae   :  { %1552 = vmatpush1.bf16.msra.mxu0 %v4684_v49  ;;  %1595 = vmatpush1.bf16.msra.mxu1 %v4691_v51 }
 0x1af   :  { %1553 = vmatprep.subr.bf16.mxu0 %v4687_v50  ;;  %1596 = vmatprep.subr.bf16.mxu1 %v4697_v54 }
 0x1b2   :  { %1554 = vmatpush1.bf16.msra.mxu0 %v4694_v53  ;;  %1597 = vmatpush1.bf16.msra.mxu1 %v4703_v56 }
 0x1b3   :  { %1555 = vmatprep.subr.bf16.mxu0 %v4700_v55  ;;  %1598 = vmatprep.subr.bf16.mxu1 %v4705_v57 }
 0x1b6   :  { %1556 = vmatpush1.bf16.msra.mxu0 %v4707_v58  ;;  %1599 = vmatpush1.bf16.msra.mxu1 %v4713_v60 }
 0x1b7   :  { %1557 = vmatprep.subr.bf16.mxu0 %v4711_v59  ;;  %1600 = vmatprep.subr.bf16.mxu1 %v4722_v63 }
 0x1ba   :  { %1558 = vmatpush1.bf16.msra.mxu0 %v4719_v62  ;;  %1601 = vmatpush1.bf16.msra.mxu1 %v4726_v2 }
 0x1bb   :  { %1559 = vmatprep.subr.bf16.mxu0 %v4724_v1  ;;  %1602 = vmatprep.subr.bf16.mxu1 %v4729_v3 }
 0x1be   :  { %1560 = vmatpush1.bf16.msra.mxu0 %v4733_v4  ;;  %1603 = vmatpush1.bf16.msra.mxu1 %v4737_v5 }
 0x1bf   :  { %1937 = vmatprep.subr.bf16.mxu1 %v4644_v34 }
 0x274   :  { %v1230_v36 = vpop.f32.mrb[4].mxu0  ;;  %v1273_v37 = vpop.f32.mrb[4].mxu1 }
 0x275   :  { %v3854_v40 = vadd.f32 %v1230_v36, %v4793_v16  ;;  %v1232_v41 = vpop.f32.mrb[5].mxu0  ;;  %v1275_v44 = vpop.f32.mrb[5].mxu1  ;;  %v3886_v27 = vadd.f32 %v1273_v37, %v4800_v32 }
 0x276   :  { %v3855_v14 = vadd.f32 %v1232_v41, %v4795_v17  ;;  %v1234_v18 = vpop.f32.mrb[6].mxu0  ;;  %v1277_v19 = vpop.f32.mrb[6].mxu1  ;;  %v3887_v29 = vadd.f32 %v1275_v44, %v4803_v61 }
 0x277   :  { %v3616_v20 = vmul.f32 -1.442695, %v3854_v40  ;;  %v3856_v21 = vadd.f32 %v1234_v18, %v4793_v16  ;;  %v1236_v22 = vpop.f32.mrb[7].mxu0  ;;  %v1279_v23 = vpop.f32.mrb[7].mxu1  ;;  %v3888_v28 = vadd.f32 %v1277_v19, %v4800_v32  ;;  %v3618_v30 = vmul.f32 -1.442695, %v3886_v27 }
 0x278   :  { %v3617_v24 = vmul.f32 -1.442695, %v3855_v14  ;;  %v3857_v25 = vadd.f32 %v1236_v22, %v4795_v17  ;;  %v3889_v35 = vadd.f32 %v1279_v23, %v4803_v61 }
 0x279   :  { %4185 = vpow2.f32 %v3616_v20  ;;  %v3619_v34 = vmul.f32 -1.442695, %v3856_v21  ;;  %v3621_v31 = vmul.f32 -1.442695, %v3888_v28 }
 0x27a   :  { %v3620_v26 = vmul.f32 -1.442695, %v3857_v25  ;;  %4187 = vpow2.f32 %v3617_v24 }
 0x27b   :  { %4189 = vpow2.f32 %v3619_v34 }
 0x27c   :  { %4191 = vpow2.f32 %v3620_v26 }
 0x27d   :  { %4193 = vtanh.f32 %v3887_v29 }
 0x27e   :  { %4195 = vpow2.f32 %v3618_v30 }
 0x27f   :  { %4197 = vpow2.f32 %v3621_v31 }
 0x283   :  { %v4186_v33 = vpop.eup %4185 }
 0x284   :  { %v1308_v52 = vadd.f32 1.0, %v4186_v33  ;;  %v4188_v6 = vpop.eup %4187 }
 0x285   :  { %v4190_v8 = vpop.eup %4189  ;;  %v1309_v9 = vadd.f32 1.0, %v4188_v6 }
 0x286   :  { %4199 = vrcp.f32 %v1308_v52  ;;  %v1311_v10 = vadd.f32 1.0, %v4190_v8  ;;  %v4192_v11 = vpop.eup %4191 }
 0x287   :  { %4201 = vtanh.f32 %v3889_v35  ;;  %v1312_v12 = vadd.f32 1.0, %v4192_v11  ;;  %v4194_v13 = vpop.eup %4193 }
 0x288   :  { %4203 = vrcp.f32 %v1309_v9  ;;  %v4196_v15 = vpop.eup %4195 }
 0x289   :  { %4205 = vrcp.f32 %v1311_v10  ;;  %v4198_v36 = vpop.eup %4197  ;;  %v1310_v14 = vadd.f32 1.0, %v4196_v15 }
 0x28a   :  { %4207 = vrcp.f32 %v1312_v12  ;;  %v1313_v23 = vadd.f32 1.0, %v4198_v36 }
 0x28b   :  { %4209 = vrcp.f32 %v1310_v14 }
 0x290   :  { %v4200_v37 = vpop.eup %4199 }
 0x291   :  { %v4202_v40 = vpop.eup %4201  ;;  %v1330_v41 = vmul.f32 %v4200_v37, %v4194_v13 }
 0x292   :  { %v4204_v44 = vpop.eup %4203 }
 0x293   :  { %v4206_v18 = vpop.eup %4205  ;;  %v1328_v19 = vmul.f32 %v4204_v44, %v4809_v43 }
 0x294   :  { %v1331_v20 = vmul.f32 %v4206_v18, %v4202_v40  ;;  %v4208_v21 = vpop.eup %4207 }
 0x295   :  { %v4857_v22 = vadd.f32 %v1330_v41, %v1328_v19  ;;  %v1329_v24 = vmul.f32 %v4208_v21, %v4812_v7  ;;  %v4210_v34 = vpop.eup %4209 }
 0x297   :  { %4211 = vtanh.f32 %v4857_v22  ;;  %v4861_v25 = vadd.f32 %v1331_v20, %v1329_v24 }
 0x298   :  { %4213 = vrcp.f32 %v1313_v23 }
 0x299   :  { %4215 = vtanh.f32 %v4861_v25 }
 0x2a1   :  { %v4212_v26 = vpop.eup %4211 }
 0x2a2   :  { %v1336_v27 = vmul.f32 %v4212_v26, %v4210_v34  ;;  %v4214_v28 = vpop.eup %4213 }
 0x2a3   :  { %v4216_v43 = vpop.eup %4215 }
 0x2a4   :  { %1339 = vst [vmem:[#allocation11 + $0x10] sm:$0xff] %v1336_v27  ;;  %v1337_v29 = vmul.f32 %v4216_v43, %v4214_v28 }
 0x2a6   :  { %1340 = vst [vmem:[#allocation11 + $0x18] sm:$0xff] %v1337_v29  ;;  %v1352_v30 = vpack.c.bf16 %v1337_v29, %v1336_v27 }
 0x2a8   :  { %1578 = vmatmul.mubr.bf16.vlgmr.msra.gmra.mrb[8].mxu0 %v1352_v30  ;;  %1621 = vmatmul.mubr.bf16.vlgmr.msra.gmra.mrb[8].mxu1 %v1352_v30 }
 0x2a9   :  { %1938 = vmatpush1.bf16.msra.mxu1 %v4652_v38  ;;  %1926 = vmatprep.mubr.bf16.mxu0 %v4556_v0  ;;  %v4881_v38 = vld [vmem:[#allocation10 + $0x4] ss:$16 sps:$4 sm:$0xff]  }
 0x2aa   :  { %1939 = vmatprep.subr.bf16.mxu1 %v4654_v39  ;;  %1969 = vmatprep.mubr.bf16.mxu1 %v4556_v0  ;;  %v4883_v39 = vld [vmem:[#allocation10] ss:$16 sps:$4 sm:$0xff]  }
 0x2ab   :  { %1894 = vmatprep.subr.bf16.mxu0 %v4881_v38 }
 0x2ac   :  { %1895 = vmatpush1.bf16.msra.mxu0 %v4883_v39 }
 0x2ad   :  { %1940 = vmatpush1.bf16.msra.mxu1 %v4665_v42  ;;  %v4887_v42 = vld [vmem:[#allocation10 + $0x24] ss:$16 sps:$4 sm:$0xff]  }
 0x2ae   :  { %1941 = vmatprep.subr.bf16.mxu1 %v4674_v46  ;;  %v4889_v46 = vld [vmem:[#allocation10 + $0x20] ss:$16 sps:$4 sm:$0xff]   ;;  %1896 = vmatprep.subr.bf16.mxu0 %v4887_v42 }
 0x2b0   :  { %1897 = vmatpush1.bf16.msra.mxu0 %v4889_v46 }
 0x2b1   :  { %1942 = vmatpush1.bf16.msra.mxu1 %v4677_v47  ;;  %v4893_v47 = vld [vmem:[#allocation10 + $0x44] ss:$16 sps:$4 sm:$0xff]  }
 0x2b2   :  { %1943 = vmatprep.subr.bf16.mxu1 %v4679_v48  ;;  %v4895_v48 = vld [vmem:[#allocation10 + $0x40] ss:$16 sps:$4 sm:$0xff]   ;;  %1898 = vmatprep.subr.bf16.mxu0 %v4893_v47 }
 0x2b4   :  { %1899 = vmatpush1.bf16.msra.mxu0 %v4895_v48 }
 0x2b5   :  { %1944 = vmatpush1.bf16.msra.mxu1 %v4691_v51  ;;  %1900 = vmatprep.subr.bf16.mxu0 %v4672_v45 }
 0x2b6   :  { %1945 = vmatprep.subr.bf16.mxu1 %v4697_v54 }
 0x2b8   :  { %1901 = vmatpush1.bf16.msra.mxu0 %v4684_v49 }
 0x2b9   :  { %1946 = vmatpush1.bf16.msra.mxu1 %v4703_v56  ;;  %1902 = vmatprep.subr.bf16.mxu0 %v4687_v50 }
 0x2ba   :  { %1947 = vmatprep.subr.bf16.mxu1 %v4705_v57 }
 0x2bc   :  { %1903 = vmatpush1.bf16.msra.mxu0 %v4694_v53 }
 0x2bd   :  { %1948 = vmatpush1.bf16.msra.mxu1 %v4713_v60  ;;  %1904 = vmatprep.subr.bf16.mxu0 %v4700_v55 }
 0x2be   :  { %1949 = vmatprep.subr.bf16.mxu1 %v4722_v63 }
 0x2c0   :  { %1905 = vmatpush1.bf16.msra.mxu0 %v4707_v58 }
 0x2c1   :  { %1950 = vmatpush1.bf16.msra.mxu1 %v4726_v2  ;;  %1906 = vmatprep.subr.bf16.mxu0 %v4711_v59 }
 0x2c2   :  { %1951 = vmatprep.subr.bf16.mxu1 %v4729_v3 }
 0x2c4   :  { %1907 = vmatpush1.bf16.msra.mxu0 %v4719_v62 }
 0x2c5   :  { %1952 = vmatpush1.bf16.msra.mxu1 %v4737_v5  ;;  %1908 = vmatprep.subr.bf16.mxu0 %v4724_v1 }
 0x2c8   :  { %1909 = vmatpush1.bf16.msra.mxu0 %v4733_v4 }
 0x2c9   :  { %2243 = vmatprep.subr.bf16.mxu0 %v4881_v38 }
 0x37b   :  { %v1579_v45 = vpop.f32.mrb[8].mxu0  ;;  %v1622_v49 = vpop.f32.mrb[8].mxu1 }
 0x37c   :  { %v3858_v50 = vadd.f32 %v1579_v45, %v4793_v16  ;;  %v1581_v51 = vpop.f32.mrb[9].mxu0  ;;  %v1624_v53 = vpop.f32.mrb[9].mxu1  ;;  %v3890_v3 = vadd.f32 %v1622_v49, %v4800_v32  ;;  %v4935_v49 = vld [vmem:[#allocation10 + $0x8] ss:$16 sps:$4 sm:$0xff]  }
 0x37d   :  { %v3859_v54 = vadd.f32 %v1581_v51, %v4795_v17  ;;  %v1583_v55 = vpop.f32.mrb[10].mxu0  ;;  %v1626_v56 = vpop.f32.mrb[10].mxu1  ;;  %v3891_v5 = vadd.f32 %v1624_v53, %v4803_v61  ;;  %v4941_v51 = vld [vmem:[#allocation10 + $0x28] ss:$16 sps:$4 sm:$0xff]   ;;  %v4945_v53 = vld [vmem:[#allocation10 + $0x4c] ss:$16 sps:$4 sm:$0xff]  }
 0x37e   :  { %v3654_v57 = vmul.f32 -1.442695, %v3858_v50  ;;  %v3860_v58 = vadd.f32 %v1583_v55, %v4793_v16  ;;  %v1585_v59 = vpop.f32.mrb[11].mxu0  ;;  %v1628_v60 = vpop.f32.mrb[11].mxu1  ;;  %v3892_v4 = vadd.f32 %v1626_v56, %v4800_v32  ;;  %v3656_v7 = vmul.f32 -1.442695, %v3890_v3 }
 0x37f   :  { %v3655_v62 = vmul.f32 -1.442695, %v3859_v54  ;;  %v3861_v63 = vadd.f32 %v1585_v59, %v4795_v17  ;;  %v3893_v35 = vadd.f32 %v1628_v60, %v4803_v61  ;;  %v4939_v50 = vld [vmem:[#allocation10 + $0x2c] ss:$16 sps:$4 sm:$0xff]   ;;  %v4947_v54 = vld [vmem:[#allocation10 + $0x48] ss:$16 sps:$4 sm:$0xff]  }
 0x380   :  { %4217 = vpow2.f32 %v3654_v57  ;;  %v3657_v1 = vmul.f32 -1.442695, %v3860_v58  ;;  %v3659_v31 = vmul.f32 -1.442695, %v3892_v4  ;;  %v4951_v55 = vld [vmem:[#allocation10 + $0x64] ss:$16 sps:$4 sm:$0xff]  }
 0x381   :  { %v3658_v2 = vmul.f32 -1.442695, %v3861_v63  ;;  %4219 = vpow2.f32 %v3655_v62  ;;  %v4953_v56 = vld [vmem:[#allocation10 + $0x6c] ss:$16 sps:$4 sm:$0xff]   ;;  %v4955_v57 = vld [vmem:[#allocation10 + $0x60] ss:$16 sps:$4 sm:$0xff]  }
 0x382   :  { %4221 = vpow2.f32 %v3657_v1  ;;  %v4957_v58 = vld [vmem:[#allocation10 + $0x68] ss:$16 sps:$4 sm:$0xff]   ;;  %v4963_v59 = vld [vmem:[#allocation10 + $0x80] ss:$16 sps:$4 sm:$0xff]   ;;  %v4965_v60 = vld [vmem:[#allocation10 + $0x84] ss:$16 sps:$4 sm:$0xff]  }
 0x383   :  { %4223 = vpow2.f32 %v3658_v2  ;;  %v4967_v62 = vld [vmem:[#allocation10 + $0x88] ss:$16 sps:$4 sm:$0xff]   ;;  %v4969_v63 = vld [vmem:[#allocation10 + $0x8c] ss:$16 sps:$4 sm:$0xff]   ;;  %v4971_v1 = vld [vmem:[#allocation10 + $0xa4] ss:$16 sps:$4 sm:$0xff]  }
 0x384   :  { %4225 = vtanh.f32 %v3891_v5  ;;  %v4974_v2 = vld [vmem:[#allocation10 + $0xac] ss:$16 sps:$4 sm:$0xff]   ;;  %v4978_v3 = vld [vmem:[#allocation10 + $0xa0] ss:$16 sps:$4 sm:$0xff]   ;;  %v4982_v4 = vld [vmem:[#allocation10 + $0xa8] ss:$16 sps:$4 sm:$0xff]  }
 0x385   :  { %4227 = vpow2.f32 %v3656_v7  ;;  %v4984_v5 = vld [vmem:[#allocation10 + $0xc4] ss:$16 sps:$4 sm:$0xff]   ;;  %v4987_v7 = vld [vmem:[#allocation10 + $0xcc] ss:$16 sps:$4 sm:$0xff]  }
 0x386   :  { %4229 = vpow2.f32 %v3659_v31  ;;  %v4990_v31 = vld [vmem:[#allocation10 + $0xc0] ss:$16 sps:$4 sm:$0xff]  }
 0x38a   :  { %v4218_v33 = vpop.eup %4217 }
 0x38b   :  { %v1657_v52 = vadd.f32 1.0, %v4218_v33  ;;  %v4220_v6 = vpop.eup %4219  ;;  %v4994_v33 = vld [vmem:[#allocation10 + $0xc8] ss:$16 sps:$4 sm:$0xff]  }
 0x38c   :  { %v4222_v8 = vpop.eup %4221  ;;  %v1658_v9 = vadd.f32 1.0, %v4220_v6  ;;  %v5002_v6 = vld [vmem:[#allocation10 + $0xe0] ss:$16 sps:$4 sm:$0xff]  }
 0x38d   :  { %4231 = vrcp.f32 %v1657_v52  ;;  %v1660_v10 = vadd.f32 1.0, %v4222_v8  ;;  %v4224_v11 = vpop.eup %4223  ;;  %v4999_v52 = vld [vmem:[#allocation10 + $0xec] ss:$16 sps:$4 sm:$0xff]   ;;  %v5006_v8 = vld [vmem:[#allocation10 + $0xe8] ss:$16 sps:$4 sm:$0xff]  }
 0x38e   :  { %4233 = vtanh.f32 %v3893_v35  ;;  %v1661_v12 = vadd.f32 1.0, %v4224_v11  ;;  %v4226_v13 = vpop.eup %4225  ;;  %v4996_v35 = vld [vmem:[#allocation10 + $0xe4] ss:$16 sps:$4 sm:$0xff]  }
 0x38f   :  { %4235 = vrcp.f32 %v1658_v9  ;;  %v4228_v15 = vpop.eup %4227 }
 0x390   :  { %4237 = vrcp.f32 %v1660_v10  ;;  %v4230_v36 = vpop.eup %4229  ;;  %v1659_v14 = vadd.f32 1.0, %v4228_v15 }
 0x391   :  { %4239 = vrcp.f32 %v1661_v12  ;;  %v1662_v24 = vadd.f32 1.0, %v4230_v36 }
 0x392   :  { %4241 = vrcp.f32 %v1659_v14 }
 0x397   :  { %v4232_v37 = vpop.eup %4231 }
 0x398   :  { %v4234_v40 = vpop.eup %4233  ;;  %v1679_v41 = vmul.f32 %v4232_v37, %v4226_v13 }
 0x399   :  { %v4236_v44 = vpop.eup %4235 }
 0x39a   :  { %v4238_v18 = vpop.eup %4237  ;;  %v1677_v19 = vmul.f32 %v4236_v44, %v4857_v22 }
 0x39b   :  { %v1680_v20 = vmul.f32 %v4238_v18, %v4234_v40  ;;  %v4240_v21 = vpop.eup %4239 }
 0x39c   :  { %v4919_v23 = vadd.f32 %v1679_v41, %v1677_v19  ;;  %v1678_v34 = vmul.f32 %v4240_v21, %v4861_v25  ;;  %v4242_v27 = vpop.eup %4241  ;;  %v4933_v25 = vld [vmem:[#allocation10 + $0xc] ss:$16 sps:$4 sm:$0xff]  }
 0x39d   :  { %2286 = vmatprep.subr.bf16.mxu1 %v4933_v25 }
 0x39e   :  { %4243 = vtanh.f32 %v4919_v23  ;;  %v4923_v26 = vadd.f32 %v1680_v20, %v1678_v34 }
 0x39f   :  { %4245 = vrcp.f32 %v1662_v24 }
 0x3a0   :  { %4247 = vtanh.f32 %v4923_v26 }
 0x3a8   :  { %v4244_v28 = vpop.eup %4243 }
 0x3a9   :  { %v1685_v43 = vmul.f32 %v4244_v28, %v4242_v27  ;;  %v4246_v29 = vpop.eup %4245 }
 0x3aa   :  { %v4248_v22 = vpop.eup %4247 }
 0x3ab   :  { %1688 = vst [vmem:[#allocation11 + $0x20] sm:$0xff] %v1685_v43  ;;  %v1686_v30 = vmul.f32 %v4248_v22, %v4246_v29 }
 0x3ad   :  { %1689 = vst [vmem:[#allocation11 + $0x28] sm:$0xff] %v1686_v30  ;;  %v1701_v45 = vpack.c.bf16 %v1686_v30, %v1685_v43 }
 0x3af   :  { %1927 = vmatmul.mubr.bf16.vlgmr.msra.gmra.mrb[12].mxu0 %v1701_v45  ;;  %1970 = vmatmul.mubr.bf16.vlgmr.msra.gmra.mrb[12].mxu1 %v1701_v45 }
 0x3b0   :  { %2244 = vmatpush1.bf16.msra.mxu0 %v4883_v39  ;;  %2275 = vmatprep.mubr.bf16.mxu0 %v4556_v0 }
 0x3b1   :  { %2245 = vmatprep.subr.bf16.mxu0 %v4887_v42  ;;  %2318 = vmatprep.mubr.bf16.mxu1 %v4556_v0 }
 0x3b2   :  { %2287 = vmatpush1.bf16.msra.mxu1 %v4935_v49 }
 0x3b3   :  { %2288 = vmatprep.subr.bf16.mxu1 %v4939_v50 }
 0x3b4   :  { %2246 = vmatpush1.bf16.msra.mxu0 %v4889_v46 }
 0x3b5   :  { %2247 = vmatprep.subr.bf16.mxu0 %v4893_v47 }
 0x3b6   :  { %2289 = vmatpush1.bf16.msra.mxu1 %v4941_v51 }
 0x3b7   :  { %2290 = vmatprep.subr.bf16.mxu1 %v4945_v53 }
 0x3b8   :  { %2248 = vmatpush1.bf16.msra.mxu0 %v4895_v48 }
 0x3b9   :  { %2249 = vmatprep.subr.bf16.mxu0 %v4951_v55 }
 0x3ba   :  { %2291 = vmatpush1.bf16.msra.mxu1 %v4947_v54 }
 0x3bb   :  { %2292 = vmatprep.subr.bf16.mxu1 %v4953_v56 }
 0x3bc   :  { %2250 = vmatpush1.bf16.msra.mxu0 %v4955_v57 }
 0x3bd   :  { %2251 = vmatprep.subr.bf16.mxu0 %v4965_v60 }
 0x3be   :  { %2293 = vmatpush1.bf16.msra.mxu1 %v4957_v58 }
 0x3bf   :  { %2294 = vmatprep.subr.bf16.mxu1 %v4969_v63 }
 0x3c0   :  { %2252 = vmatpush1.bf16.msra.mxu0 %v4963_v59 }
 0x3c1   :  { %2253 = vmatprep.subr.bf16.mxu0 %v4971_v1 }
 0x3c2   :  { %2295 = vmatpush1.bf16.msra.mxu1 %v4967_v62 }
 0x3c3   :  { %2296 = vmatprep.subr.bf16.mxu1 %v4974_v2 }
 0x3c4   :  { %2254 = vmatpush1.bf16.msra.mxu0 %v4978_v3 }
 0x3c5   :  { %2255 = vmatprep.subr.bf16.mxu0 %v4984_v5 }
 0x3c6   :  { %2297 = vmatpush1.bf16.msra.mxu1 %v4982_v4 }
 0x3c7   :  { %2298 = vmatprep.subr.bf16.mxu1 %v4987_v7 }
 0x3c8   :  { %2256 = vmatpush1.bf16.msra.mxu0 %v4990_v31 }
 0x3c9   :  { %2257 = vmatprep.subr.bf16.mxu0 %v4996_v35 }
 0x3ca   :  { %2299 = vmatpush1.bf16.msra.mxu1 %v4994_v33 }
 0x3cb   :  { %2300 = vmatprep.subr.bf16.mxu1 %v4999_v52 }
 0x3cc   :  { %2258 = vmatpush1.bf16.msra.mxu0 %v5002_v6 }
 0x3cd   :  { %2592 = vmatprep.subr.bf16.mxu0 %v4881_v38 }
 0x3ce   :  { %2301 = vmatpush1.bf16.msra.mxu1 %v5006_v8 }
 0x3cf   :  { %2635 = vmatprep.subr.bf16.mxu1 %v4933_v25 }
 0x482   :  { %v1928_v9 = vpop.f32.mrb[12].mxu0  ;;  %v1971_v10 = vpop.f32.mrb[12].mxu1 }
 0x483   :  { %v3862_v11 = vadd.f32 %v1928_v9, %v4793_v16  ;;  %v1930_v12 = vpop.f32.mrb[13].mxu0  ;;  %v1973_v13 = vpop.f32.mrb[13].mxu1  ;;  %v3894_v24 = vadd.f32 %v1971_v10, %v4800_v32 }
 0x484   :  { %v3863_v15 = vadd.f32 %v1930_v12, %v4795_v17  ;;  %v1932_v36 = vpop.f32.mrb[14].mxu0  ;;  %v1975_v37 = vpop.f32.mrb[14].mxu1  ;;  %v3895_v27 = vadd.f32 %v1973_v13, %v4803_v61 }
 0x485   :  { %v3692_v40 = vmul.f32 -1.442695, %v3862_v11  ;;  %v3864_v41 = vadd.f32 %v1932_v36, %v4793_v16  ;;  %v1934_v44 = vpop.f32.mrb[15].mxu0  ;;  %v1977_v14 = vpop.f32.mrb[15].mxu1  ;;  %v3896_v34 = vadd.f32 %v1975_v37, %v4800_v32  ;;  %v3694_v28 = vmul.f32 -1.442695, %v3894_v24 }
 0x486   :  { %v3693_v18 = vmul.f32 -1.442695, %v3863_v15  ;;  %v3865_v19 = vadd.f32 %v1934_v44, %v4795_v17  ;;  %v3897_v22 = vadd.f32 %v1977_v14, %v4803_v61 }
 0x487   :  { %4249 = vpow2.f32 %v3692_v40  ;;  %v3695_v20 = vmul.f32 -1.442695, %v3864_v41  ;;  %v3697_v43 = vmul.f32 -1.442695, %v3896_v34 }
 0x488   :  { %v3696_v21 = vmul.f32 -1.442695, %v3865_v19  ;;  %4251 = vpow2.f32 %v3693_v18 }
 0x489   :  { %4253 = vpow2.f32 %v3695_v20 }
 0x48a   :  { %4255 = vpow2.f32 %v3696_v21 }
 0x48b   :  { %4257 = vtanh.f32 %v3895_v27 }
 0x48c   :  { %4259 = vpow2.f32 %v3694_v28 }
 0x48d   :  { %4261 = vpow2.f32 %v3697_v43 }
 0x491   :  { %v4250_v29 = vpop.eup %4249 }
 0x492   :  { %v2006_v30 = vadd.f32 1.0, %v4250_v29  ;;  %v4252_v45 = vpop.eup %4251 }
 0x493   :  { %v4254_v9 = vpop.eup %4253  ;;  %v2007_v11 = vadd.f32 1.0, %v4252_v45 }
 0x494   :  { %4263 = vrcp.f32 %v2006_v30  ;;  %v2009_v10 = vadd.f32 1.0, %v4254_v9  ;;  %v4256_v12 = vpop.eup %4255 }
 0x495   :  { %4265 = vtanh.f32 %v3897_v22  ;;  %v2010_v15 = vadd.f32 1.0, %v4256_v12  ;;  %v4258_v13 = vpop.eup %4257 }
 0x496   :  { %4267 = vrcp.f32 %v2007_v11  ;;  %v4260_v36 = vpop.eup %4259 }
 0x497   :  { %4269 = vrcp.f32 %v2009_v10  ;;  %v4262_v37 = vpop.eup %4261  ;;  %v2008_v18 = vadd.f32 1.0, %v4260_v36 }
 0x498   :  { %4271 = vrcp.f32 %v2010_v15  ;;  %v2011_v27 = vadd.f32 1.0, %v4262_v37 }
 0x499   :  { %4273 = vrcp.f32 %v2008_v18 }
 0x49e   :  { %v4264_v40 = vpop.eup %4263 }
 0x49f   :  { %v4266_v41 = vpop.eup %4265  ;;  %v2028_v44 = vmul.f32 %v4264_v40, %v4258_v13 }
 0x4a0   :  { %v4268_v14 = vpop.eup %4267 }
 0x4a1   :  { %v4270_v19 = vpop.eup %4269  ;;  %v2026_v20 = vmul.f32 %v4268_v14, %v4919_v23 }
 0x4a2   :  { %v2029_v21 = vmul.f32 %v4270_v19, %v4266_v41  ;;  %v4272_v24 = vpop.eup %4271 }
 0x4a3   :  { %v5022_v34 = vadd.f32 %v2028_v44, %v2026_v20  ;;  %v2027_v28 = vmul.f32 %v4272_v24, %v4923_v26  ;;  %v4274_v29 = vpop.eup %4273 }
 0x4a5   :  { %4275 = vtanh.f32 %v5022_v34  ;;  %v5026_v43 = vadd.f32 %v2029_v21, %v2027_v28 }
 0x4a6   :  { %4277 = vrcp.f32 %v2011_v27 }
 0x4a7   :  { %4279 = vtanh.f32 %v5026_v43 }
 0x4af   :  { %v4276_v22 = vpop.eup %4275 }
 0x4b0   :  { %v2034_v30 = vmul.f32 %v4276_v22, %v4274_v29  ;;  %v4278_v45 = vpop.eup %4277 }
 0x4b1   :  { %v4280_v23 = vpop.eup %4279 }
 0x4b2   :  { %2037 = vst [vmem:[#allocation11 + $0x30] sm:$0xff] %v2034_v30  ;;  %v2035_v9 = vmul.f32 %v4280_v23, %v4278_v45 }
 0x4b4   :  { %2038 = vst [vmem:[#allocation11 + $0x38] sm:$0xff] %v2035_v9  ;;  %v2050_v11 = vpack.c.bf16 %v2035_v9, %v2034_v30 }
 0x4b6   :  { %2276 = vmatmul.mubr.bf16.vlgmr.msra.gmra.mrb[16].mxu0 %v2050_v11  ;;  %2319 = vmatmul.mubr.bf16.vlgmr.msra.gmra.mrb[16].mxu1 %v2050_v11 }
 0x4b7   :  { %2593 = vmatpush1.bf16.msra.mxu0 %v4883_v39  ;;  %2636 = vmatpush1.bf16.msra.mxu1 %v4935_v49 }
 0x4b8   :  { %2594 = vmatprep.subr.bf16.mxu0 %v4887_v42  ;;  %2637 = vmatprep.subr.bf16.mxu1 %v4939_v50 }
 0x4b9   :  { %2624 = vmatprep.mubr.bf16.mxu0 %v4556_v0  ;;  %2667 = vmatprep.mubr.bf16.mxu1 %v4556_v0 }
 0x4bb   :  { %2595 = vmatpush1.bf16.msra.mxu0 %v4889_v46  ;;  %2638 = vmatpush1.bf16.msra.mxu1 %v4941_v51 }
 0x4bc   :  { %2596 = vmatprep.subr.bf16.mxu0 %v4893_v47  ;;  %2639 = vmatprep.subr.bf16.mxu1 %v4945_v53 }
 0x4bf   :  { %2597 = vmatpush1.bf16.msra.mxu0 %v4895_v48  ;;  %2640 = vmatpush1.bf16.msra.mxu1 %v4947_v54 }
 0x4c0   :  { %2598 = vmatprep.subr.bf16.mxu0 %v4951_v55  ;;  %2641 = vmatprep.subr.bf16.mxu1 %v4953_v56 }
 0x4c3   :  { %2599 = vmatpush1.bf16.msra.mxu0 %v4955_v57  ;;  %2642 = vmatpush1.bf16.msra.mxu1 %v4957_v58 }
 0x4c4   :  { %2600 = vmatprep.subr.bf16.mxu0 %v4965_v60  ;;  %2643 = vmatprep.subr.bf16.mxu1 %v4969_v63 }
 0x4c7   :  { %2601 = vmatpush1.bf16.msra.mxu0 %v4963_v59  ;;  %2644 = vmatpush1.bf16.msra.mxu1 %v4967_v62 }
 0x4c8   :  { %2602 = vmatprep.subr.bf16.mxu0 %v4971_v1  ;;  %2645 = vmatprep.subr.bf16.mxu1 %v4974_v2 }
 0x4cb   :  { %2603 = vmatpush1.bf16.msra.mxu0 %v4978_v3  ;;  %2646 = vmatpush1.bf16.msra.mxu1 %v4982_v4 }
 0x4cc   :  { %2604 = vmatprep.subr.bf16.mxu0 %v4984_v5  ;;  %2647 = vmatprep.subr.bf16.mxu1 %v4987_v7 }
 0x4cf   :  { %2605 = vmatpush1.bf16.msra.mxu0 %v4990_v31  ;;  %2648 = vmatpush1.bf16.msra.mxu1 %v4994_v33 }
 0x4d0   :  { %2606 = vmatprep.subr.bf16.mxu0 %v4996_v35  ;;  %2649 = vmatprep.subr.bf16.mxu1 %v4999_v52 }
 0x4d3   :  { %2607 = vmatpush1.bf16.msra.mxu0 %v5002_v6  ;;  %2650 = vmatpush1.bf16.msra.mxu1 %v5006_v8 }
 0x4d4   :  { %2941 = vmatprep.subr.bf16.mxu0 %v4881_v38  ;;  %2984 = vmatprep.subr.bf16.mxu1 %v4933_v25 }
 0x589   :  { %v2277_v26 = vpop.f32.mrb[16].mxu0  ;;  %v2320_v10 = vpop.f32.mrb[16].mxu1 }
 0x58a   :  { %v3866_v12 = vadd.f32 %v2277_v26, %v4793_v16  ;;  %v2279_v15 = vpop.f32.mrb[17].mxu0  ;;  %v2322_v13 = vpop.f32.mrb[17].mxu1  ;;  %v3898_v24 = vadd.f32 %v2320_v10, %v4800_v32 }
 0x58b   :  { %v3867_v36 = vadd.f32 %v2279_v15, %v4795_v17  ;;  %v2281_v37 = vpop.f32.mrb[18].mxu0  ;;  %v2324_v40 = vpop.f32.mrb[18].mxu1  ;;  %v3899_v28 = vadd.f32 %v2322_v13, %v4803_v61 }
 0x58c   :  { %v3730_v41 = vmul.f32 -1.442695, %v3866_v12  ;;  %v3868_v44 = vadd.f32 %v2281_v37, %v4793_v16  ;;  %v2283_v14 = vpop.f32.mrb[19].mxu0  ;;  %v2326_v18 = vpop.f32.mrb[19].mxu1  ;;  %v3900_v27 = vadd.f32 %v2324_v40, %v4800_v32  ;;  %v3732_v29 = vmul.f32 -1.442695, %v3898_v24 }
 0x58d   :  { %v3731_v19 = vmul.f32 -1.442695, %v3867_v36  ;;  %v3869_v38 = vadd.f32 %v2283_v14, %v4795_v17  ;;  %v3901_v45 = vadd.f32 %v2326_v18, %v4803_v61 }
 0x58e   :  { %4281 = vpow2.f32 %v3730_v41  ;;  %v3733_v20 = vmul.f32 -1.442695, %v3868_v44  ;;  %v3735_v22 = vmul.f32 -1.442695, %v3900_v27 }
 0x58f   :  { %v3734_v21 = vmul.f32 -1.442695, %v3869_v38  ;;  %4283 = vpow2.f32 %v3731_v19 }
 0x590   :  { %4285 = vpow2.f32 %v3733_v20 }
 0x591   :  { %4287 = vpow2.f32 %v3734_v21 }
 0x592   :  { %4289 = vtanh.f32 %v3899_v28 }
 0x593   :  { %4291 = vpow2.f32 %v3732_v29 }
 0x594   :  { %4293 = vpow2.f32 %v3735_v22 }
 0x598   :  { %v4282_v30 = vpop.eup %4281 }
 0x599   :  { %v2355_v23 = vadd.f32 1.0, %v4282_v30  ;;  %v4284_v9 = vpop.eup %4283 }
 0x59a   :  { %v4286_v11 = vpop.eup %4285  ;;  %v2356_v26 = vadd.f32 1.0, %v4284_v9 }
 0x59b   :  { %4295 = vrcp.f32 %v2355_v23  ;;  %v2358_v10 = vadd.f32 1.0, %v4286_v11  ;;  %v4288_v12 = vpop.eup %4287 }
 0x59c   :  { %4297 = vtanh.f32 %v3901_v45  ;;  %v2359_v15 = vadd.f32 1.0, %v4288_v12  ;;  %v4290_v13 = vpop.eup %4289 }
 0x59d   :  { %4299 = vrcp.f32 %v2356_v26  ;;  %v4292_v36 = vpop.eup %4291 }
 0x59e   :  { %4301 = vrcp.f32 %v2358_v10  ;;  %v4294_v37 = vpop.eup %4293  ;;  %v2357_v18 = vadd.f32 1.0, %v4292_v36 }
 0x59f   :  { %4303 = vrcp.f32 %v2359_v15  ;;  %v2360_v27 = vadd.f32 1.0, %v4294_v37 }
 0x5a0   :  { %4305 = vrcp.f32 %v2357_v18 }
 0x5a5   :  { %v4296_v40 = vpop.eup %4295 }
 0x5a6   :  { %v4298_v41 = vpop.eup %4297  ;;  %v2377_v44 = vmul.f32 %v4296_v40, %v4290_v13 }
 0x5a7   :  { %v4300_v14 = vpop.eup %4299 }
 0x5a8   :  { %v4302_v19 = vpop.eup %4301  ;;  %v2375_v38 = vmul.f32 %v4300_v14, %v5022_v34 }
 0x5a9   :  { %v2378_v20 = vmul.f32 %v4302_v19, %v4298_v41  ;;  %v4304_v21 = vpop.eup %4303 }
 0x5aa   :  { %v5072_v24 = vadd.f32 %v2377_v44, %v2375_v38  ;;  %v2376_v28 = vmul.f32 %v4304_v21, %v5026_v43  ;;  %v4306_v22 = vpop.eup %4305 }
 0x5ac   :  { %4307 = vtanh.f32 %v5072_v24  ;;  %v5076_v29 = vadd.f32 %v2378_v20, %v2376_v28 }
 0x5ad   :  { %4309 = vrcp.f32 %v2360_v27 }
 0x5ae   :  { %4311 = vtanh.f32 %v5076_v29 }
 0x5b6   :  { %v4308_v30 = vpop.eup %4307 }
 0x5b7   :  { %v2383_v45 = vmul.f32 %v4308_v30, %v4306_v22  ;;  %v4310_v23 = vpop.eup %4309 }
 0x5b8   :  { %v4312_v34 = vpop.eup %4311 }
 0x5b9   :  { %2386 = vst [vmem:[#allocation11 + $0x40] sm:$0xff] %v2383_v45  ;;  %v2384_v9 = vmul.f32 %v4312_v34, %v4310_v23 }
 0x5bb   :  { %2387 = vst [vmem:[#allocation11 + $0x48] sm:$0xff] %v2384_v9  ;;  %v2399_v11 = vpack.c.bf16 %v2384_v9, %v2383_v45 }
 0x5bd   :  { %2625 = vmatmul.mubr.bf16.vlgmr.msra.gmra.mrb[20].mxu0 %v2399_v11  ;;  %2668 = vmatmul.mubr.bf16.vlgmr.msra.gmra.mrb[20].mxu1 %v2399_v11 }
 0x5be   :  { %2942 = vmatpush1.bf16.msra.mxu0 %v4883_v39  ;;  %2985 = vmatpush1.bf16.msra.mxu1 %v4935_v49 }
 0x5bf   :  { %2943 = vmatprep.subr.bf16.mxu0 %v4887_v42  ;;  %2986 = vmatprep.subr.bf16.mxu1 %v4939_v50 }
 0x5c0   :  { %2973 = vmatprep.mubr.bf16.mxu0 %v4556_v0  ;;  %3016 = vmatprep.mubr.bf16.mxu1 %v4556_v0 }
 0x5c2   :  { %2944 = vmatpush1.bf16.msra.mxu0 %v4889_v46  ;;  %2987 = vmatpush1.bf16.msra.mxu1 %v4941_v51 }
 0x5c3   :  { %2945 = vmatprep.subr.bf16.mxu0 %v4893_v47  ;;  %2988 = vmatprep.subr.bf16.mxu1 %v4945_v53 }
 0x5c6   :  { %2946 = vmatpush1.bf16.msra.mxu0 %v4895_v48  ;;  %2989 = vmatpush1.bf16.msra.mxu1 %v4947_v54 }
 0x5c7   :  { %2947 = vmatprep.subr.bf16.mxu0 %v4951_v55  ;;  %2990 = vmatprep.subr.bf16.mxu1 %v4953_v56 }
 0x5ca   :  { %2948 = vmatpush1.bf16.msra.mxu0 %v4955_v57  ;;  %2991 = vmatpush1.bf16.msra.mxu1 %v4957_v58 }
 0x5cb   :  { %2949 = vmatprep.subr.bf16.mxu0 %v4965_v60  ;;  %2992 = vmatprep.subr.bf16.mxu1 %v4969_v63 }
 0x5ce   :  { %2950 = vmatpush1.bf16.msra.mxu0 %v4963_v59  ;;  %2993 = vmatpush1.bf16.msra.mxu1 %v4967_v62 }
 0x5cf   :  { %2951 = vmatprep.subr.bf16.mxu0 %v4971_v1  ;;  %2994 = vmatprep.subr.bf16.mxu1 %v4974_v2 }
 0x5d2   :  { %2952 = vmatpush1.bf16.msra.mxu0 %v4978_v3  ;;  %2995 = vmatpush1.bf16.msra.mxu1 %v4982_v4 }
 0x5d3   :  { %2953 = vmatprep.subr.bf16.mxu0 %v4984_v5  ;;  %2996 = vmatprep.subr.bf16.mxu1 %v4987_v7 }
 0x5d6   :  { %2954 = vmatpush1.bf16.msra.mxu0 %v4990_v31  ;;  %2997 = vmatpush1.bf16.msra.mxu1 %v4994_v33 }
 0x5d7   :  { %2955 = vmatprep.subr.bf16.mxu0 %v4996_v35  ;;  %2998 = vmatprep.subr.bf16.mxu1 %v4999_v52 }
 0x5da   :  { %2956 = vmatpush1.bf16.msra.mxu0 %v5002_v6  ;;  %2999 = vmatpush1.bf16.msra.mxu1 %v5006_v8 }
 0x5db   :  { %3333 = vmatprep.subr.bf16.mxu1 %v4933_v25 }
 0x690   :  { %v2626_v39 = vpop.f32.mrb[20].mxu0  ;;  %v2669_v42 = vpop.f32.mrb[20].mxu1 }
 0x691   :  { %v3870_v46 = vadd.f32 %v2626_v39, %v4793_v16  ;;  %v2628_v47 = vpop.f32.mrb[21].mxu0  ;;  %v2671_v48 = vpop.f32.mrb[21].mxu1  ;;  %v3902_v44 = vadd.f32 %v2669_v42, %v4800_v32 }
 0x692   :  { %v3871_v43 = vadd.f32 %v2628_v47, %v4795_v17  ;;  %v2630_v26 = vpop.f32.mrb[22].mxu0  ;;  %v2673_v10 = vpop.f32.mrb[22].mxu1  ;;  %v3903_v18 = vadd.f32 %v2671_v48, %v4803_v61 }
 0x693   :  { %v3768_v12 = vmul.f32 -1.442695, %v3870_v46  ;;  %v3872_v15 = vadd.f32 %v2630_v26, %v4793_v16  ;;  %v2632_v13 = vpop.f32.mrb[23].mxu0  ;;  %v2675_v36 = vpop.f32.mrb[23].mxu1  ;;  %v3904_v14 = vadd.f32 %v2673_v10, %v4800_v32  ;;  %v3770_v19 = vmul.f32 -1.442695, %v3902_v44 }
 0x694   :  { %v3769_v37 = vmul.f32 -1.442695, %v3871_v43  ;;  %v3873_v40 = vadd.f32 %v2632_v13, %v4795_v17  ;;  %v3905_v21 = vadd.f32 %v2675_v36, %v4803_v61 }
 0x695   :  { %4313 = vpow2.f32 %v3768_v12  ;;  %v3771_v25 = vmul.f32 -1.442695, %v3872_v15  ;;  %v3773_v38 = vmul.f32 -1.442695, %v3904_v14 }
 0x696   :  { %v3772_v41 = vmul.f32 -1.442695, %v3873_v40  ;;  %4315 = vpow2.f32 %v3769_v37 }
 0x697   :  { %4317 = vpow2.f32 %v3771_v25 }
 0x698   :  { %4319 = vpow2.f32 %v3772_v41 }
 0x699   :  { %4321 = vtanh.f32 %v3903_v18 }
 0x69a   :  { %4323 = vpow2.f32 %v3770_v19 }
 0x69b   :  { %4325 = vpow2.f32 %v3773_v38 }
 0x69f   :  { %v4314_v20 = vpop.eup %4313 }
 0x6a0   :  { %v2704_v27 = vadd.f32 1.0, %v4314_v20  ;;  %v4316_v28 = vpop.eup %4315 }
 0x6a1   :  { %v4318_v22 = vpop.eup %4317  ;;  %v2705_v30 = vadd.f32 1.0, %v4316_v28 }
 0x6a2   :  { %4327 = vrcp.f32 %v2704_v27  ;;  %v2707_v45 = vadd.f32 1.0, %v4318_v22  ;;  %v4320_v23 = vpop.eup %4319 }
 0x6a3   :  { %4329 = vtanh.f32 %v3905_v21  ;;  %v2708_v34 = vadd.f32 1.0, %v4320_v23  ;;  %v4322_v9 = vpop.eup %4321 }
 0x6a4   :  { %4331 = vrcp.f32 %v2705_v30  ;;  %v4324_v11 = vpop.eup %4323 }
 0x6a5   :  { %4333 = vrcp.f32 %v2707_v45  ;;  %v4326_v39 = vpop.eup %4325  ;;  %v2706_v43 = vadd.f32 1.0, %v4324_v11 }
 0x6a6   :  { %4335 = vrcp.f32 %v2708_v34  ;;  %v2709_v36 = vadd.f32 1.0, %v4326_v39 }
 0x6a7   :  { %4337 = vrcp.f32 %v2706_v43 }
 0x6ac   :  { %v4328_v42 = vpop.eup %4327 }
 0x6ad   :  { %v4330_v46 = vpop.eup %4329  ;;  %v2726_v47 = vmul.f32 %v4328_v42, %v4322_v9 }
 0x6ae   :  { %v4332_v48 = vpop.eup %4331 }
 0x6af   :  { %v4334_v26 = vpop.eup %4333  ;;  %v2724_v10 = vmul.f32 %v4332_v48, %v5072_v24 }
 0x6b0   :  { %v2727_v12 = vmul.f32 %v4334_v26, %v4330_v46  ;;  %v4336_v15 = vpop.eup %4335 }
 0x6b1   :  { %v5121_v13 = vadd.f32 %v2726_v47, %v2724_v10  ;;  %v2725_v37 = vmul.f32 %v4336_v15, %v5076_v29  ;;  %v4338_v25 = vpop.eup %4337 }
 0x6b3   :  { %4339 = vtanh.f32 %v5121_v13  ;;  %v5125_v40 = vadd.f32 %v2727_v12, %v2725_v37 }
 0x6b4   :  { %4341 = vrcp.f32 %v2709_v36 }
 0x6b5   :  { %4343 = vtanh.f32 %v5125_v40 }
 0x6bd   :  { %v4340_v41 = vpop.eup %4339 }
 0x6be   :  { %v2732_v44 = vmul.f32 %v4340_v41, %v4338_v25  ;;  %v4342_v14 = vpop.eup %4341 }
 0x6bf   :  { %v4344_v24 = vpop.eup %4343 }
 0x6c0   :  { %2735 = vst [vmem:[#allocation11 + $0x50] sm:$0xff] %v2732_v44  ;;  %v2733_v18 = vmul.f32 %v4344_v24, %v4342_v14 }
 0x6c2   :  { %2736 = vst [vmem:[#allocation11 + $0x58] sm:$0xff] %v2733_v18  ;;  %v2748_v19 = vpack.c.bf16 %v2733_v18, %v2732_v44 }
 0x6c4   :  { %2974 = vmatmul.mubr.bf16.vlgmr.msra.gmra.mrb[24].mxu0 %v2748_v19  ;;  %3017 = vmatmul.mubr.bf16.vlgmr.msra.gmra.mrb[24].mxu1 %v2748_v19 }
 0x6c5   :  { %3334 = vmatpush1.bf16.msra.mxu1 %v4935_v49  ;;  %3322 = vmatprep.mubr.bf16.mxu0 %v4556_v0  ;;  %v4144_v49 = vld [vmem:[#allocation10] ss:$16 sps:$4 sm:$0xff]  }
 0x6c6   :  { %3335 = vmatprep.subr.bf16.mxu1 %v4939_v50  ;;  %3365 = vmatprep.mubr.bf16.mxu1 %v4556_v0  ;;  %v4146_v0 = vld [vmem:[#allocation10 + $0x4] ss:$16 sps:$4 sm:$0xff]  }
 0x6c7   :  { %3290 = vmatprep.subr.bf16.mxu0 %v4146_v0  ;;  %v4149_v50 = vld [vmem:[#allocation10 + $0x24] ss:$16 sps:$4 sm:$0xff]  }
 0x6c8   :  { %3291 = vmatpush1.bf16.msra.mxu0 %v4144_v49 }
 0x6c9   :  { %3336 = vmatpush1.bf16.msra.mxu1 %v4941_v51  ;;  %v4147_v51 = vld [vmem:[#allocation10 + $0x20] ss:$16 sps:$4 sm:$0xff]   ;;  %3292 = vmatprep.subr.bf16.mxu0 %v4149_v50 }
 0x6ca   :  { %3337 = vmatprep.subr.bf16.mxu1 %v4945_v53  ;;  %v4152_v53 = vld [vmem:[#allocation10 + $0x44] ss:$16 sps:$4 sm:$0xff]  }
 0x6cc   :  { %3293 = vmatpush1.bf16.msra.mxu0 %v4147_v51 }
 0x6cd   :  { %3338 = vmatpush1.bf16.msra.mxu1 %v4947_v54  ;;  %v4150_v54 = vld [vmem:[#allocation10 + $0x40] ss:$16 sps:$4 sm:$0xff]   ;;  %3294 = vmatprep.subr.bf16.mxu0 %v4152_v53 }
 0x6ce   :  { %3339 = vmatprep.subr.bf16.mxu1 %v4953_v56 }
 0x6d0   :  { %3295 = vmatpush1.bf16.msra.mxu0 %v4150_v54 }
 0x6d1   :  { %3340 = vmatpush1.bf16.msra.mxu1 %v4957_v58  ;;  %3296 = vmatprep.subr.bf16.mxu0 %v4951_v55 }
 0x6d2   :  { %3341 = vmatprep.subr.bf16.mxu1 %v4969_v63 }
 0x6d4   :  { %3297 = vmatpush1.bf16.msra.mxu0 %v4955_v57 }
 0x6d5   :  { %3342 = vmatpush1.bf16.msra.mxu1 %v4967_v62  ;;  %3298 = vmatprep.subr.bf16.mxu0 %v4965_v60 }
 0x6d6   :  { %3343 = vmatprep.subr.bf16.mxu1 %v4974_v2 }
 0x6d8   :  { %3299 = vmatpush1.bf16.msra.mxu0 %v4963_v59 }
 0x6d9   :  { %3344 = vmatpush1.bf16.msra.mxu1 %v4982_v4  ;;  %3300 = vmatprep.subr.bf16.mxu0 %v4971_v1 }
 0x6da   :  { %3345 = vmatprep.subr.bf16.mxu1 %v4987_v7 }
 0x6dc   :  { %3301 = vmatpush1.bf16.msra.mxu0 %v4978_v3 }
 0x6dd   :  { %3346 = vmatpush1.bf16.msra.mxu1 %v4994_v33  ;;  %3302 = vmatprep.subr.bf16.mxu0 %v4984_v5 }
 0x6de   :  { %3347 = vmatprep.subr.bf16.mxu1 %v4999_v52 }
 0x6e0   :  { %3303 = vmatpush1.bf16.msra.mxu0 %v4990_v31 }
 0x6e1   :  { %3348 = vmatpush1.bf16.msra.mxu1 %v5006_v8  ;;  %3304 = vmatprep.subr.bf16.mxu0 %v4996_v35 }
 0x6e4   :  { %3305 = vmatpush1.bf16.msra.mxu0 %v5002_v6 }
 0x797   :  { %v2975_v56 = vpop.f32.mrb[24].mxu0  ;;  %v3018_v55 = vpop.f32.mrb[24].mxu1 }
 0x798   :  { %v3874_v57 = vadd.f32 %v2975_v56, %v4793_v16  ;;  %v2977_v58 = vpop.f32.mrb[25].mxu0  ;;  %v3020_v60 = vpop.f32.mrb[25].mxu1  ;;  %v3906_v35 = vadd.f32 %v3018_v55, %v4800_v32 }
 0x799   :  { %v3875_v59 = vadd.f32 %v2977_v58, %v4795_v17  ;;  %v2979_v62 = vpop.f32.mrb[26].mxu0  ;;  %v3022_v63 = vpop.f32.mrb[26].mxu1  ;;  %v3907_v6 = vadd.f32 %v3020_v60, %v4803_v61 }
 0x79a   :  { %v3806_v1 = vmul.f32 -1.442695, %v3874_v57  ;;  %v3876_v2 = vadd.f32 %v2979_v62, %v4793_v16  ;;  %v2981_v3 = vpop.f32.mrb[27].mxu0  ;;  %v3024_v4 = vpop.f32.mrb[27].mxu1  ;;  %v3908_v52 = vadd.f32 %v3022_v63, %v4800_v32  ;;  %v3808_v8 = vmul.f32 -1.442695, %v3906_v35 }
 0x79b   :  { %v3807_v5 = vmul.f32 -1.442695, %v3875_v59  ;;  %v3877_v7 = vadd.f32 %v2981_v3, %v4795_v17  ;;  %v3909_v20 = vadd.f32 %v3024_v4, %v4803_v61 }
 0x79c   :  { %4345 = vpow2.f32 %v3806_v1  ;;  %v3809_v31 = vmul.f32 -1.442695, %v3876_v2  ;;  %v3811_v29 = vmul.f32 -1.442695, %v3908_v52 }
 0x79d   :  { %v3810_v33 = vmul.f32 -1.442695, %v3877_v7  ;;  %4347 = vpow2.f32 %v3807_v5 }
 0x79e   :  { %4349 = vpow2.f32 %v3809_v31 }
 0x79f   :  { %4351 = vpow2.f32 %v3810_v33 }
 0x7a0   :  { %4353 = vtanh.f32 %v3907_v6 }
 0x7a1   :  { %4355 = vpow2.f32 %v3808_v8 }
 0x7a2   :  { %4357 = vpow2.f32 %v3811_v29 }
 0x7a6   :  { %v4346_v38 = vpop.eup %4345 }
 0x7a7   :  { %v3053_v21 = vadd.f32 1.0, %v4346_v38  ;;  %v4348_v27 = vpop.eup %4347 }
 0x7a8   :  { %v4350_v28 = vpop.eup %4349  ;;  %v3054_v22 = vadd.f32 1.0, %v4348_v27 }
 0x7a9   :  { %4359 = vrcp.f32 %v3053_v21  ;;  %v3056_v30 = vadd.f32 1.0, %v4350_v28  ;;  %v4352_v45 = vpop.eup %4351 }
 0x7aa   :  { %4361 = vtanh.f32 %v3909_v20  ;;  %v3057_v23 = vadd.f32 1.0, %v4352_v45  ;;  %v4354_v34 = vpop.eup %4353 }
 0x7ab   :  { %4363 = vrcp.f32 %v3054_v22  ;;  %v4356_v9 = vpop.eup %4355 }
 0x7ac   :  { %4365 = vrcp.f32 %v3056_v30  ;;  %v4358_v11 = vpop.eup %4357  ;;  %v3055_v48 = vadd.f32 1.0, %v4356_v9 }
 0x7ad   :  { %4367 = vrcp.f32 %v3057_v23  ;;  %v3058_v36 = vadd.f32 1.0, %v4358_v11 }
 0x7ae   :  { %4369 = vrcp.f32 %v3055_v48 }
 0x7b3   :  { %v4360_v39 = vpop.eup %4359 }
 0x7b4   :  { %v4362_v42 = vpop.eup %4361  ;;  %v3075_v46 = vmul.f32 %v4360_v39, %v4354_v34 }
 0x7b5   :  { %v4364_v47 = vpop.eup %4363 }
 0x7b6   :  { %v4366_v43 = vpop.eup %4365  ;;  %v3073_v26 = vmul.f32 %v4364_v47, %v5121_v13 }
 0x7b7   :  { %v3076_v10 = vmul.f32 %v4366_v43, %v4362_v42  ;;  %v4368_v12 = vpop.eup %4367 }
 0x7b8   :  { %v5164_v15 = vadd.f32 %v3075_v46, %v3073_v26  ;;  %v3074_v37 = vmul.f32 %v4368_v12, %v5125_v40  ;;  %v4370_v41 = vpop.eup %4369 }
 0x7ba   :  { %4371 = vtanh.f32 %v5164_v15  ;;  %v5168_v25 = vadd.f32 %v3076_v10, %v3074_v37 }
 0x7bb   :  { %4373 = vrcp.f32 %v3058_v36 }
 0x7bc   :  { %4375 = vtanh.f32 %v5168_v25 }
 0x7c4   :  { %v4372_v44 = vpop.eup %4371 }
 0x7c5   :  { %v3081_v14 = vmul.f32 %v4372_v44, %v4370_v41  ;;  %v4374_v24 = vpop.eup %4373 }
 0x7c6   :  { %v4376_v13 = vpop.eup %4375 }
 0x7c7   :  { %3084 = vst [vmem:[#allocation11 + $0x60] sm:$0xff] %v3081_v14  ;;  %v3082_v18 = vmul.f32 %v4376_v13, %v4374_v24 }
 0x7c9   :  { %3085 = vst [vmem:[#allocation11 + $0x68] sm:$0xff] %v3082_v18  ;;  %v3097_v19 = vpack.c.bf16 %v3082_v18, %v3081_v14 }
 0x7cb   :  { %3323 = vmatmul.mubr.bf16.vlgmr.msra.gmra.mrb[28].mxu0 %v3097_v19  ;;  %3366 = vmatmul.mubr.bf16.vlgmr.msra.gmra.mrb[28].mxu1 %v3097_v19 }
 0x89e   :  { %v3324_v0 = vpop.f32.mrb[28].mxu0  ;;  %v3367_v40 = vpop.f32.mrb[28].mxu1 }
 0x89f   :  { %v3878_v49 = vadd.f32 %v3324_v0, %v4793_v16  ;;  %v3326_v50 = vpop.f32.mrb[29].mxu0  ;;  %v3369_v51 = vpop.f32.mrb[29].mxu1  ;;  %v3910_v2 = vadd.f32 %v3367_v40, %v4800_v32 }
 0x8a0   :  { %v3879_v53 = vadd.f32 %v3326_v50, %v4795_v17  ;;  %v3328_v54 = vpop.f32.mrb[30].mxu0  ;;  %v3371_v56 = vpop.f32.mrb[30].mxu1  ;;  %v3911_v4 = vadd.f32 %v3369_v51, %v4803_v61 }
 0x8a1   :  { %v3844_v55 = vmul.f32 -1.442695, %v3878_v49  ;;  %v3880_v57 = vadd.f32 %v3328_v54, %v4793_v16  ;;  %v3330_v58 = vpop.f32.mrb[31].mxu0  ;;  %v3373_v60 = vpop.f32.mrb[31].mxu1  ;;  %v3912_v3 = vadd.f32 %v3371_v56, %v4800_v32  ;;  %v3846_v5 = vmul.f32 -1.442695, %v3910_v2 }
 0x8a2   :  { %v3845_v59 = vmul.f32 -1.442695, %v3879_v53  ;;  %v3881_v62 = vadd.f32 %v3330_v58, %v4795_v17  ;;  %v3913_v31 = vadd.f32 %v3373_v60, %v4803_v61 }
 0x8a3   :  { %4377 = vpow2.f32 %v3844_v55  ;;  %v3847_v63 = vmul.f32 -1.442695, %v3880_v57  ;;  %v3849_v7 = vmul.f32 -1.442695, %v3912_v3 }
 0x8a4   :  { %v3848_v1 = vmul.f32 -1.442695, %v3881_v62  ;;  %4379 = vpow2.f32 %v3845_v59 }
 0x8a5   :  { %4381 = vpow2.f32 %v3847_v63 }
 0x8a6   :  { %4383 = vpow2.f32 %v3848_v1 }
 0x8a7   :  { %4385 = vtanh.f32 %v3911_v4 }
 0x8a8   :  { %4387 = vpow2.f32 %v3846_v5 }
 0x8a9   :  { %4389 = vpow2.f32 %v3849_v7 }
 0x8ad   :  { %v4378_v16 = vpop.eup %4377 }
 0x8ae   :  { %v3402_v33 = vadd.f32 1.0, %v4378_v16  ;;  %v4380_v17 = vpop.eup %4379 }
 0x8af   :  { %v4382_v35 = vpop.eup %4381  ;;  %v3403_v52 = vadd.f32 1.0, %v4380_v17 }
 0x8b0   :  { %4391 = vrcp.f32 %v3402_v33  ;;  %v3405_v6 = vadd.f32 1.0, %v4382_v35  ;;  %v4384_v8 = vpop.eup %4383 }
 0x8b1   :  { %4393 = vtanh.f32 %v3913_v31  ;;  %v3406_v32 = vadd.f32 1.0, %v4384_v8  ;;  %v4386_v29 = vpop.eup %4385 }
 0x8b2   :  { %4395 = vrcp.f32 %v3403_v52  ;;  %v4388_v38 = vpop.eup %4387 }
 0x8b3   :  { %4397 = vrcp.f32 %v3405_v6  ;;  %v4390_v20 = vpop.eup %4389  ;;  %v3404_v22 = vadd.f32 1.0, %v4388_v38 }
 0x8b4   :  { %4399 = vrcp.f32 %v3406_v32  ;;  %v3407_v11 = vadd.f32 1.0, %v4390_v20 }
 0x8b5   :  { %4401 = vrcp.f32 %v3404_v22 }
 0x8ba   :  { %v4392_v21 = vpop.eup %4391 }
 0x8bb   :  { %v4394_v27 = vpop.eup %4393  ;;  %v3424_v61 = vmul.f32 %v4392_v21, %v4386_v29 }
 0x8bc   :  { %v4396_v28 = vpop.eup %4395 }
 0x8bd   :  { %v4398_v30 = vpop.eup %4397  ;;  %v3422_v45 = vmul.f32 %v4396_v28, %v5164_v15 }
 0x8be   :  { %v3425_v23 = vmul.f32 %v4398_v30, %v4394_v27  ;;  %v4400_v34 = vpop.eup %4399 }
 0x8bf   :  { %v3426_v9 = vadd.f32 %v3424_v61, %v3422_v45  ;;  %v3423_v39 = vmul.f32 %v4400_v34, %v5168_v25  ;;  %v4402_v46 = vpop.eup %4401 }
 0x8c1   :  { %4403 = vtanh.f32 %v3426_v9  ;;  %3448 = vst [vmem:[#allocation14] sm:$0xff] %v3426_v9  ;;  %v3427_v42 = vadd.f32 %v3425_v23, %v3423_v39 }
 0x8c2   :  { %4405 = vrcp.f32 %v3407_v11 }
 0x8c3   :  { %4407 = vtanh.f32 %v3427_v42  ;;  %3449 = vst [vmem:[#allocation14 + $0x8] sm:$0xff] %v3427_v42 }
 0x8cb   :  { %v4404_v47 = vpop.eup %4403 }
 0x8cc   :  { %v3430_v48 = vmul.f32 %v4404_v47, %v4402_v46  ;;  %v4406_v43 = vpop.eup %4405 }
 0x8cd   :  { %v4408_v26 = vpop.eup %4407 }
 0x8ce   :  { %3433 = vst [vmem:[#allocation11 + $0x70] sm:$0xff] %v3430_v48  ;;  %3444 = vst [vmem:[#allocation12] sm:$0xff] %v3430_v48  ;;  %v3431_v10 = vmul.f32 %v4408_v26, %v4406_v43 }
 0x8d0   :  { %3434 = vst [vmem:[#allocation11 + $0x78] sm:$0xff] %v3431_v10  ;;  %3445 = vst [vmem:[#allocation12 + $0x8] sm:$0xff] %v3431_v10 }
 0x8d1   :  { %4486 = shalt.err (!%p4483_p0)
}
 0x8d2   :  { %s4487_s20 = scalar_lea.hbm %s5245_s5, 256 }
 0x8d3   :  { %p4488_p1 = scmp.ne.s32.totalorder %s5245_s5, %s4487_s20  ;;  %p4491_p2 = scmp.lt.u32.totalorder %s4487_s20, %s5245_s5 }
 0x8d5   :  { %p4493_p3 = pnand %p4491_p2, %p4488_p1 }
 0x8d7   :  { %4496 = shalt.err (!%p4493_p3)
}
 0x8d8   :  { %s4561_s24 = smov 128   ;;  %s4562_s25 = smov 8  }
 0x8d9   :  { %3473 = dma.vmem_to_hbm [thread:$0]  %s3468_s8, 256, %s5245_s5, [#allocation13], %s4561_s24, %s4561_s24, %s4562_s25  }
 0x8da   :  { %s4497_s28 = scalar_lea.vmem %s5181_s14, 2048  ;;  %p4502_p5 = scmp.lt.s32.totalorder %s5181_s14, %s5181_s14 }
 0x8db   :  { %p4498_p4 = scmp.ne.s32.totalorder %s5181_s14, %s4497_s28  ;;  %p4503_p6 = scmp.lt.s32.totalorder %s4497_s28, %s4497_s28 }
 0x8dd   :  { %p4504_p7 = por %p4503_p6, %p4502_p5 }
 0x8df   :  { %p4505_p8 = pnand %p4504_p7, %p4498_p4 }
 0x8e1   :  { %4508 = shalt.err (!%p4505_p8)
}
 0x8e2   :  { %s4509_s9 = scalar_lea.hbm %s5244_s4, 2048 }
 0x8e3   :  { %p4510_p9 = scmp.ne.s32.totalorder %s5244_s4, %s4509_s9  ;;  %p4513_p10 = scmp.lt.u32.totalorder %s4509_s9, %s5244_s4 }
 0x8e5   :  { %p4515_p11 = pnand %p4513_p10, %p4510_p9 }
 0x8e7   :  { %4518 = shalt.err (!%p4515_p11)
}
 0x8e8   :  { %3461 = dma.vmem_to_hbm [thread:$0]  %s5181_s14, 2048, %s5244_s4, [#allocation7], %s4561_s24, %s4561_s24, %s4562_s25  }
 0x8e9   :  { %s4519_s7 = scalar_lea.vmem %s5183_s16, 256  ;;  %p4524_p13 = scmp.lt.s32.totalorder %s5183_s16, %s5183_s16 }
 0x8ea   :  { %p4520_p12 = scmp.ne.s32.totalorder %s5183_s16, %s4519_s7  ;;  %p4525_p0 = scmp.lt.s32.totalorder %s4519_s7, %s4519_s7 }
 0x8ec   :  { %p4526_p1 = por %p4525_p0, %p4524_p13 }
 0x8ee   :  { %p4527_p2 = pnand %p4526_p1, %p4520_p12 }
 0x8f0   :  { %4530 = shalt.err (!%p4527_p2)
}
 0x8f1   :  { %s4531_s13 = scalar_lea.hbm %s5246_s6, 256 }
 0x8f2   :  { %p4532_p3 = scmp.ne.s32.totalorder %s5246_s6, %s4531_s13  ;;  %p4535_p4 = scmp.lt.u32.totalorder %s4531_s13, %s5246_s6 }
 0x8f4   :  { %p4537_p5 = pnand %p4535_p4, %p4532_p3 }
 0x8f6   :  { %4540 = shalt.err (!%p4537_p5)
}
 0x8f7   :  { %3485 = dma.vmem_to_hbm [thread:$0]  %s5183_s16, 256, %s5246_s6, [#allocation13], %s4561_s24, %s4561_s24, %s4562_s25  }
 0x8f8   :  { %4545 = dma.done.wait [#allocation7], 2048  }
 0x8f9   :  { %4546 = vsyncadd [#allocation7], 4294965248 }
 0x8fa   :  { %4547 = dma.done.wait [#allocation13], 512  }
 0x8fb   :  { %4548 = vsyncadd [#allocation13], 4294966784 }
 0x8fc   :  { %3495 = vsyncpa [#allocation6], 1 }
 0x8fd   :  { %3496 = vsyncpa [#allocation9], 1 }
 0x8fe   :  { %3497 = vsyncpa [#allocation7], 1 }
 0x8ff   :  { %3498 = vsyncpa [#allocation13], 1 }

// kernel: tpu_custom_call.1
= control target key start
LH: loop header
LB: loop body
LE: loop exit
PB: predicated region body
PF: predicated region fallthrough
CT: control target
= control target key end

     0   :  { %12 = vsyncpa [#allocation6], 0  ;;  %s5240_s0 = inlined_call_operand.hbm [shape: bf16[8,16,128], index: 0, kind: input, shape index: {}]   ;;  %s5241_s1 = inlined_call_operand.hbm [shape: bf16[128,512], index: 1, kind: input, shape index: {}]   ;;  %s5242_s2 = inlined_call_operand.hbm [shape: bf16[128,512], index: 2, kind: input, shape index: {}]   ;;  %s5243_s3 = inlined_call_operand.vmem [shape: f32[1,512], index: 3, kind: input, shape index: {}]   ;;  %s5244_s4 = inlined_call_operand.hbm [shape: f32[8,16,128], index: 4, kind: output, shape index: {0}]   ;;  %s5245_s5 = inlined_call_operand.hbm [shape: f32[16,128], index: 5, kind: output, shape index: {1}]   ;;  %s5246_s6 = inlined_call_operand.hbm [shape: f32[16,128], index: 6, kind: output, shape index: {2}]  }
   0x1   :  { %13 = vsyncpa [#allocation9], 0 }
   0x2   :  { %14 = vsyncpa [#allocation7], 0 }
   0x3   :  { %15 = vsyncpa [#allocation13], 0  ;;  %s4549_s21 = smov [#allocation8]   ;;  %s4409_s25 = scalar_lea.hbm %s5241_s1, 4096 }
   0x4   :  { %s33_s22 = sshll.u32 %s4549_s21, 4  ;;  %p4410_p0 = scmp.ne.s32.totalorder %s5241_s1, %s4409_s25  ;;  %s34_s22 = int_to_ptr.vmem [resolvable:$true] %s33_s22 }
   0x5   :  { %p4413_p1 = scmp.lt.u32.totalorder %s4409_s25, %s5241_s1 }
   0x7   :  { %p4415_p2 = pnand %p4413_p1, %p4410_p0 }
   0x9   :  { %4418 = shalt.err (!%p4415_p2)
}
   0xa   :  { %s4419_s30 = scalar_lea.vmem %s34_s22, 4096  ;;  %p4424_p4 = scmp.lt.s32.totalorder %s34_s22, %s34_s22 }
   0xb   :  { %p4420_p3 = scmp.ne.s32.totalorder %s34_s22, %s4419_s30  ;;  %p4425_p5 = scmp.lt.s32.totalorder %s4419_s30, %s4419_s30 }
   0xd   :  { %p4426_p6 = por %p4425_p5, %p4424_p4 }
   0xf   :  { %p4427_p7 = pnand %p4426_p6, %p4420_p3 }
  0x11   :  { %4430 = shalt.err (!%p4427_p7)
}
  0x12   :  { %s4550_s7 = smov 256   ;;  %s4551_s8 = smov 16  }
  0x13   :  { %39 = dma.hbm_to_vmem [thread:$0]  %s5241_s1, 4096, %s34_s22, [#allocation9], %s4550_s7, %s4550_s7, %s4551_s8  }
  0x14   :  { %s4552_s11 = smov [#allocation5]   ;;  %s4431_s15 = scalar_lea.hbm %s5240_s0, 1024 }
  0x15   :  { %s21_s12 = sshll.u32 %s4552_s11, 4  ;;  %p4432_p8 = scmp.ne.s32.totalorder %s5240_s0, %s4431_s15  ;;  %s22_s12 = int_to_ptr.vmem [resolvable:$true] %s21_s12 }
  0x16   :  { %p4435_p9 = scmp.lt.u32.totalorder %s4431_s15, %s5240_s0 }
  0x18   :  { %p4437_p10 = pnand %p4435_p9, %p4432_p8 }
  0x1a   :  { %4440 = shalt.err (!%p4437_p10)
}
  0x1b   :  { %s4441_s20 = scalar_lea.vmem %s22_s12, 1024  ;;  %p4446_p12 = scmp.lt.s32.totalorder %s22_s12, %s22_s12 }
  0x1c   :  { %p4442_p11 = scmp.ne.s32.totalorder %s22_s12, %s4441_s20  ;;  %p4447_p13 = scmp.lt.s32.totalorder %s4441_s20, %s4441_s20 }
  0x1e   :  { %p4448_p0 = por %p4447_p13, %p4446_p12 }
  0x20   :  { %p4449_p1 = pnand %p4448_p0, %p4442_p11 }
  0x22   :  { %4452 = shalt.err (!%p4449_p1)
}
  0x23   :  { %s4553_s1 = smov 64   ;;  %s4554_s21 = smov 4  }
  0x24   :  { %27 = dma.hbm_to_vmem [thread:$0]  %s5240_s0, 1024, %s22_s12, [#allocation6], %s4553_s1, %s4553_s1, %s4554_s21  }
  0x25   :  { %s4555_s24 = smov [#allocation10]   ;;  %s4453_s28 = scalar_lea.hbm %s5242_s2, 4096 }
  0x26   :  { %s45_s25 = sshll.u32 %s4555_s24, 4  ;;  %p4454_p2 = scmp.ne.s32.totalorder %s5242_s2, %s4453_s28  ;;  %s46_s25 = int_to_ptr.vmem [resolvable:$true] %s45_s25 }
  0x27   :  { %p4457_p3 = scmp.lt.u32.totalorder %s4453_s28, %s5242_s2 }
  0x29   :  { %p4459_p4 = pnand %p4457_p3, %p4454_p2 }
  0x2b   :  { %4462 = shalt.err (!%p4459_p4)
}
  0x2c   :  { %s4463_s11 = scalar_lea.vmem %s46_s25, 4096  ;;  %p4468_p6 = scmp.lt.s32.totalorder %s46_s25, %s46_s25 }
  0x2d   :  { %p4464_p5 = scmp.ne.s32.totalorder %s46_s25, %s4463_s11  ;;  %p4469_p7 = scmp.lt.s32.totalorder %s4463_s11, %s4463_s11 }
  0x2f   :  { %p4470_p8 = por %p4469_p7, %p4468_p6 }
  0x31   :  { %p4471_p9 = pnand %p4470_p8, %p4464_p5 }
  0x33   :  { %4474 = shalt.err (!%p4471_p9)
}
  0x34   :  { %51 = dma.hbm_to_vmem [thread:$0]  %s5242_s2, 4096, %s46_s25, [#allocation9], %s4550_s7, %s4550_s7, %s4551_s8  }
  0x35   :  { %4541 = dma.done.wait [#allocation6], 1024  }
  0x36   :  { %4542 = vsyncadd [#allocation6], 4294966272 }
  0x37   :  { %4543 = dma.done.wait [#allocation9], 8192  }
  0x38   :  { %4544 = vsyncadd [#allocation9], 4294959104  ;;  %v4556_v0 = vmov 0   ;;  %v3992_v1 = vld [vmem:[#allocation8 + $0x4] ss:$16 sps:$4 sm:$0xff]   ;;  %v4044_v43 = vld [vmem:[#allocation5 + $0x8] sm:$0xff]  }
  0x39   :  { %374 = vmatprep.mubr.bf16.mxu0 %v4556_v0  ;;  %487 = vmatprep.mubr.bf16.mxu1 %v4556_v0  ;;  %v3994_v2 = vld [vmem:[#allocation8 + $0xc] ss:$16 sps:$4 sm:$0xff]   ;;  %v3996_v3 = vld [vmem:[#allocation8] ss:$16 sps:$4 sm:$0xff]   ;;  %v3997_v4 = vld [vmem:[#allocation8 + $0x8] ss:$16 sps:$4 sm:$0xff]  }
  0x3a   :  { %342 = vmatprep.subr.bf16.mxu0 %v3992_v1  ;;  %455 = vmatprep.subr.bf16.mxu1 %v3994_v2  ;;  %v3998_v5 = vld [vmem:[#allocation8 + $0x24] ss:$16 sps:$4 sm:$0xff]   ;;  %v4000_v6 = vld [vmem:[#allocation8 + $0x2c] ss:$16 sps:$4 sm:$0xff]   ;;  %v4002_v7 = vld [vmem:[#allocation8 + $0x20] ss:$16 sps:$4 sm:$0xff]  }
  0x3b   :  { %343 = vmatpush1.bf16.msra.mxu0 %v3996_v3  ;;  %456 = vmatpush1.bf16.msra.mxu1 %v3997_v4  ;;  %v4003_v8 = vld [vmem:[#allocation8 + $0x28] ss:$16 sps:$4 sm:$0xff]   ;;  %v4004_v9 = vld [vmem:[#allocation8 + $0x44] ss:$16 sps:$4 sm:$0xff]   ;;  %v4006_v10 = vld [vmem:[#allocation8 + $0x4c] ss:$16 sps:$4 sm:$0xff]  }
  0x3c   :  { %344 = vmatprep.subr.bf16.mxu0 %v3998_v5  ;;  %457 = vmatprep.subr.bf16.mxu1 %v4000_v6  ;;  %v4008_v11 = vld [vmem:[#allocation8 + $0x40] ss:$16 sps:$4 sm:$0xff]   ;;  %v4009_v12 = vld [vmem:[#allocation8 + $0x48] ss:$16 sps:$4 sm:$0xff]   ;;  %v4010_v13 = vld [vmem:[#allocation8 + $0x64] ss:$16 sps:$4 sm:$0xff]  }
  0x3d   :  { %v4012_v14 = vld [vmem:[#allocation8 + $0x6c] ss:$16 sps:$4 sm:$0xff]   ;;  %v4014_v15 = vld [vmem:[#allocation8 + $0x60] ss:$16 sps:$4 sm:$0xff]   ;;  %v4015_v16 = vld [vmem:[#allocation8 + $0x68] ss:$16 sps:$4 sm:$0xff]  }
  0x3e   :  { %v4016_v17 = vld [vmem:[#allocation8 + $0x84] ss:$16 sps:$4 sm:$0xff]   ;;  %v4018_v18 = vld [vmem:[#allocation8 + $0x8c] ss:$16 sps:$4 sm:$0xff]   ;;  %v4020_v19 = vld [vmem:[#allocation8 + $0x80] ss:$16 sps:$4 sm:$0xff]  }
  0x3f   :  { %345 = vmatpush1.bf16.msra.mxu0 %v4002_v7  ;;  %458 = vmatpush1.bf16.msra.mxu1 %v4003_v8  ;;  %v4021_v20 = vld [vmem:[#allocation8 + $0x88] ss:$16 sps:$4 sm:$0xff]   ;;  %v4022_v21 = vld [vmem:[#allocation8 + $0xa4] ss:$16 sps:$4 sm:$0xff]   ;;  %v4024_v22 = vld [vmem:[#allocation8 + $0xac] ss:$16 sps:$4 sm:$0xff]  }
  0x40   :  { %346 = vmatprep.subr.bf16.mxu0 %v4004_v9  ;;  %459 = vmatprep.subr.bf16.mxu1 %v4006_v10  ;;  %v4026_v23 = vld [vmem:[#allocation8 + $0xa0] ss:$16 sps:$4 sm:$0xff]   ;;  %v4027_v24 = vld [vmem:[#allocation8 + $0xa8] ss:$16 sps:$4 sm:$0xff]   ;;  %v4028_v25 = vld [vmem:[#allocation8 + $0xc4] ss:$16 sps:$4 sm:$0xff]  }
  0x41   :  { %v4030_v26 = vld [vmem:[#allocation8 + $0xcc] ss:$16 sps:$4 sm:$0xff]   ;;  %v4032_v27 = vld [vmem:[#allocation8 + $0xc0] ss:$16 sps:$4 sm:$0xff]   ;;  %v4033_v28 = vld [vmem:[#allocation8 + $0xc8] ss:$16 sps:$4 sm:$0xff]  }
  0x42   :  { %v4034_v29 = vld [vmem:[#allocation8 + $0xe4] ss:$16 sps:$4 sm:$0xff]   ;;  %v4036_v30 = vld [vmem:[#allocation8 + $0xec] ss:$16 sps:$4 sm:$0xff]   ;;  %v4038_v31 = vld [vmem:[#allocation8 + $0xe0] ss:$16 sps:$4 sm:$0xff]  }
  0x43   :  { %347 = vmatpush1.bf16.msra.mxu0 %v4008_v11  ;;  %460 = vmatpush1.bf16.msra.mxu1 %v4009_v12  ;;  %v4039_v32 = vld [vmem:[#allocation8 + $0xe8] ss:$16 sps:$4 sm:$0xff]   ;;  %v4642_v33 = vld [vmem:[#allocation10 + $0x4] ss:$16 sps:$4 sm:$0xff]   ;;  %v4644_v34 = vld [vmem:[#allocation10 + $0xc] ss:$16 sps:$4 sm:$0xff]   ;;  %v114_v11 = vlaneseq }
  0x44   :  { %348 = vmatprep.subr.bf16.mxu0 %v4010_v13  ;;  %461 = vmatprep.subr.bf16.mxu1 %v4012_v14  ;;  %v4040_v35 = vld [vmem:[#allocation5] sm:$0xff]   ;;  %v4652_v38 = vld [vmem:[#allocation10 + $0x8] ss:$16 sps:$4 sm:$0xff]   ;;  %v4654_v39 = vld [vmem:[#allocation10 + $0x2c] ss:$16 sps:$4 sm:$0xff]   ;;  %v4557_v10 = vmov 0.0|0.0  }
  0x45   :  { %v4646_v36 = vld [vmem:[#allocation10] ss:$16 sps:$4 sm:$0xff]   ;;  %v4649_v37 = vld [vmem:[#allocation10 + $0x24] ss:$16 sps:$4 sm:$0xff]   ;;  %v4665_v42 = vld [vmem:[#allocation10 + $0x28] ss:$16 sps:$4 sm:$0xff]  }
  0x46   :  { %v4658_v40 = vld [vmem:[#allocation10 + $0x20] ss:$16 sps:$4 sm:$0xff]   ;;  %v4662_v41 = vld [vmem:[#allocation10 + $0x44] ss:$16 sps:$4 sm:$0xff]   ;;  %v4674_v46 = vld [vmem:[#allocation10 + $0x4c] ss:$16 sps:$4 sm:$0xff]  }
  0x47   :  { %349 = vmatpush1.bf16.msra.mxu0 %v4014_v15  ;;  %462 = vmatpush1.bf16.msra.mxu1 %v4015_v16  ;;  %v4669_v44 = vld [vmem:[#allocation10 + $0x40] ss:$16 sps:$4 sm:$0xff]   ;;  %v4672_v45 = vld [vmem:[#allocation10 + $0x64] ss:$16 sps:$4 sm:$0xff]   ;;  %v4677_v47 = vld [vmem:[#allocation10 + $0x48] ss:$16 sps:$4 sm:$0xff]  }
  0x48   :  { %350 = vmatprep.subr.bf16.mxu0 %v4016_v17  ;;  %463 = vmatprep.subr.bf16.mxu1 %v4018_v18  ;;  %v4679_v48 = vld [vmem:[#allocation10 + $0x6c] ss:$16 sps:$4 sm:$0xff]   ;;  %v4684_v49 = vld [vmem:[#allocation10 + $0x60] ss:$16 sps:$4 sm:$0xff]   ;;  %v4687_v50 = vld [vmem:[#allocation10 + $0x84] ss:$16 sps:$4 sm:$0xff]  }
  0x49   :  { %v4691_v51 = vld [vmem:[#allocation10 + $0x68] ss:$16 sps:$4 sm:$0xff]   ;;  %v4051_v52 = vld [vmem:[#allocation5 + $0x10] sm:$0xff]   ;;  %v4697_v54 = vld [vmem:[#allocation10 + $0x8c] ss:$16 sps:$4 sm:$0xff]   ;;  %v115_v12 = vshrl.u32 %v114_v11, 7 }
  0x4a   :  { %v4694_v53 = vld [vmem:[#allocation10 + $0x80] ss:$16 sps:$4 sm:$0xff]   ;;  %v4700_v55 = vld [vmem:[#allocation10 + $0xa4] ss:$16 sps:$4 sm:$0xff]   ;;  %v4703_v56 = vld [vmem:[#allocation10 + $0x88] ss:$16 sps:$4 sm:$0xff]  }
  0x4b   :  { %351 = vmatpush1.bf16.msra.mxu0 %v4020_v19  ;;  %464 = vmatpush1.bf16.msra.mxu1 %v4021_v20  ;;  %v4705_v57 = vld [vmem:[#allocation10 + $0xac] ss:$16 sps:$4 sm:$0xff]   ;;  %v4707_v58 = vld [vmem:[#allocation10 + $0xa0] ss:$16 sps:$4 sm:$0xff]   ;;  %v4711_v59 = vld [vmem:[#allocation10 + $0xc4] ss:$16 sps:$4 sm:$0xff]  }
  0x4c   :  { %352 = vmatprep.subr.bf16.mxu0 %v4022_v21  ;;  %465 = vmatprep.subr.bf16.mxu1 %v4024_v22  ;;  %v4713_v60 = vld [vmem:[#allocation10 + $0xa8] ss:$16 sps:$4 sm:$0xff]   ;;  %v4719_v62 = vld [vmem:[#allocation10 + $0xc0] ss:$16 sps:$4 sm:$0xff]   ;;  %v4722_v63 = vld [vmem:[#allocation10 + $0xcc] ss:$16 sps:$4 sm:$0xff]  }
  0x4d   :  { %v4058_v61 = vld [vmem:[#allocation5 + $0x18] sm:$0xff]   ;;  %v4724_v1 = vld [vmem:[#allocation10 + $0xe4] ss:$16 sps:$4 sm:$0xff]   ;;  %v4733_v4 = vld [vmem:[#allocation10 + $0xe0] ss:$16 sps:$4 sm:$0xff]   ;;  %v116_v13 = vsub.s32 0, %v115_v12 }
  0x4e   :  { %v4726_v2 = vld [vmem:[#allocation10 + $0xc8] ss:$16 sps:$4 sm:$0xff]   ;;  %v4729_v3 = vld [vmem:[#allocation10 + $0xec] ss:$16 sps:$4 sm:$0xff]   ;;  %v4065_v6 = vld [vmem:[#allocation5 + $0x20] sm:$0xff]   ;;  %v120_v15 = vsub.s32 1, %v115_v12 }
  0x4f   :  { %353 = vmatpush1.bf16.msra.mxu0 %v4026_v23  ;;  %466 = vmatpush1.bf16.msra.mxu1 %v4027_v24  ;;  %v4737_v5 = vld [vmem:[#allocation10 + $0xe8] ss:$16 sps:$4 sm:$0xff]   ;;  %v4079_v8 = vld [vmem:[#allocation5 + $0x30] sm:$0xff]   ;;  %v112_v14 = vld [vmem:[%s5243_s3] sm:$0xf]  ;;  %v124_v19 = vsub.s32 2, %v115_v12 }
  0x50   :  { %354 = vmatprep.subr.bf16.mxu0 %v4028_v25  ;;  %467 = vmatprep.subr.bf16.mxu1 %v4030_v26  ;;  %v4072_v7 = vld [vmem:[#allocation5 + $0x28] sm:$0xff]   ;;  %v4086_v9 = vld [vmem:[#allocation5 + $0x38] sm:$0xff]   ;;  %v4793_v16 = vrot.slane %v112_v14, %v116_v13  ;;  %v4795_v17 = vrot.slane %v112_v14, %v120_v15  ;;  %s4558_s3 = smov [#allocation12]   ;;  %s4559_s13 = smov [#allocation11]  }
  0x51   :  { %s3467_s8 = sshll.u32 %s4558_s3, 4  ;;  %s3455_s14 = sshll.u32 %s4559_s13, 4  ;;  %s3468_s8 = int_to_ptr.vmem [resolvable:$true] %s3467_s8  ;;  %s5181_s14 = int_to_ptr.vmem [resolvable:$true] %s3455_s14 }
  0x52   :  { %s4560_s15 = smov [#allocation14]   ;;  %s4475_s17 = scalar_lea.vmem %s3468_s8, 256 }
  0x53   :  { %355 = vmatpush1.bf16.msra.mxu0 %v4032_v27  ;;  %468 = vmatpush1.bf16.msra.mxu1 %v4033_v28  ;;  %v128_v28 = vsub.s32 3, %v115_v12  ;;  %s3479_s16 = sshll.u32 %s4560_s15, 4  ;;  %p4476_p10 = scmp.ne.s32.totalorder %s3468_s8, %s4475_s17  ;;  %s5183_s16 = int_to_ptr.vmem [resolvable:$true] %s3479_s16 }
  0x54   :  { %356 = vmatprep.subr.bf16.mxu0 %v4034_v29  ;;  %469 = vmatprep.subr.bf16.mxu1 %v4036_v30  ;;  %p4480_p11 = scmp.lt.s32.totalorder %s3468_s8, %s3468_s8  ;;  %p4481_p12 = scmp.lt.s32.totalorder %s4475_s17, %s4475_s17 }
  0x56   :  { %p4482_p13 = por %p4481_p12, %p4480_p11 }
  0x57   :  { %357 = vmatpush1.bf16.msra.mxu0 %v4038_v31  ;;  %470 = vmatpush1.bf16.msra.mxu1 %v4039_v32  ;;  %v4800_v32 = vrot.slane %v112_v14, %v124_v19 }
  0x58   :  { %848 = vmatprep.subr.bf16.mxu0 %v4642_v33  ;;  %891 = vmatprep.subr.bf16.mxu1 %v4644_v34  ;;  %p4483_p0 = pnand %p4482_p13, %p4476_p10 }
  0x5a   :  { %375 = vmatmul.mubr.bf16.vlgmr.msra.gmra.mrb[0].mxu0 %v4040_v35  ;;  %488 = vmatmul.mubr.bf16.vlgmr.msra.gmra.mrb[0].mxu1 %v4040_v35 }
  0x5b   :  { %849 = vmatpush1.bf16.msra.mxu0 %v4646_v36  ;;  %384 = vmatprep.mubr.bf16.mxu0 %v4556_v0 }
  0x5c   :  { %497 = vmatprep.mubr.bf16.mxu1 %v4556_v0  ;;  %850 = vmatprep.subr.bf16.mxu0 %v4649_v37 }
  0x5d   :  { %892 = vmatpush1.bf16.msra.mxu1 %v4652_v38 }
  0x5e   :  { %893 = vmatprep.subr.bf16.mxu1 %v4654_v39 }
  0x5f   :  { %851 = vmatpush1.bf16.msra.mxu0 %v4658_v40 }
  0x60   :  { %852 = vmatprep.subr.bf16.mxu0 %v4662_v41 }
  0x61   :  { %894 = vmatpush1.bf16.msra.mxu1 %v4665_v42 }
  0x62   :  { %385 = vmatmul.mubr.bf16.gmra.mrb[4].mxu0 %v4044_v43  ;;  %498 = vmatmul.mubr.bf16.gmra.mrb[4].mxu1 %v4044_v43 }
  0x63   :  { %394 = vmatprep.mubr.bf16.mxu0 %v4556_v0  ;;  %507 = vmatprep.mubr.bf16.mxu1 %v4556_v0 }
  0x64   :  { %853 = vmatpush1.bf16.msra.mxu0 %v4669_v44  ;;  %895 = vmatprep.subr.bf16.mxu1 %v4674_v46 }
  0x65   :  { %854 = vmatprep.subr.bf16.mxu0 %v4672_v45  ;;  %896 = vmatpush1.bf16.msra.mxu1 %v4677_v47 }
  0x66   :  { %897 = vmatprep.subr.bf16.mxu1 %v4679_v48 }
  0x68   :  { %855 = vmatpush1.bf16.msra.mxu0 %v4684_v49 }
  0x69   :  { %856 = vmatprep.subr.bf16.mxu0 %v4687_v50  ;;  %898 = vmatpush1.bf16.msra.mxu1 %v4691_v51 }
  0x6a   :  { %395 = vmatmul.mubr.bf16.gmra.mrb[8].mxu0 %v4051_v52  ;;  %508 = vmatmul.mubr.bf16.gmra.mrb[8].mxu1 %v4051_v52 }
  0x6b   :  { %404 = vmatprep.mubr.bf16.mxu0 %v4556_v0  ;;  %517 = vmatprep.mubr.bf16.mxu1 %v4556_v0 }
  0x6c   :  { %857 = vmatpush1.bf16.msra.mxu0 %v4694_v53  ;;  %899 = vmatprep.subr.bf16.mxu1 %v4697_v54 }
  0x6d   :  { %858 = vmatprep.subr.bf16.mxu0 %v4700_v55  ;;  %900 = vmatpush1.bf16.msra.mxu1 %v4703_v56 }
  0x6e   :  { %901 = vmatprep.subr.bf16.mxu1 %v4705_v57 }
  0x70   :  { %859 = vmatpush1.bf16.msra.mxu0 %v4707_v58 }
  0x71   :  { %860 = vmatprep.subr.bf16.mxu0 %v4711_v59  ;;  %902 = vmatpush1.bf16.msra.mxu1 %v4713_v60 }
  0x72   :  { %405 = vmatmul.mubr.bf16.gmra.mrb[12].mxu0 %v4058_v61  ;;  %518 = vmatmul.mubr.bf16.gmra.mrb[12].mxu1 %v4058_v61  ;;  %v4803_v61 = vrot.slane %v112_v14, %v128_v28 }
  0x73   :  { %414 = vmatprep.mubr.bf16.mxu0 %v4556_v0  ;;  %527 = vmatprep.mubr.bf16.mxu1 %v4556_v0 }
  0x74   :  { %861 = vmatpush1.bf16.msra.mxu0 %v4719_v62  ;;  %903 = vmatprep.subr.bf16.mxu1 %v4722_v63 }
  0x75   :  { %862 = vmatprep.subr.bf16.mxu0 %v4724_v1  ;;  %904 = vmatpush1.bf16.msra.mxu1 %v4726_v2 }
  0x76   :  { %905 = vmatprep.subr.bf16.mxu1 %v4729_v3 }
  0x78   :  { %863 = vmatpush1.bf16.msra.mxu0 %v4733_v4 }
  0x79   :  { %906 = vmatpush1.bf16.msra.mxu1 %v4737_v5  ;;  %1196 = vmatprep.subr.bf16.mxu0 %v4642_v33 }
  0x7a   :  { %415 = vmatmul.mubr.bf16.gmra.mrb[16].mxu0 %v4065_v6  ;;  %528 = vmatmul.mubr.bf16.gmra.mrb[16].mxu1 %v4065_v6 }
  0x7b   :  { %424 = vmatprep.mubr.bf16.mxu0 %v4556_v0  ;;  %537 = vmatprep.mubr.bf16.mxu1 %v4556_v0 }
  0x7c   :  { %1239 = vmatprep.subr.bf16.mxu1 %v4644_v34 }
  0x82   :  { %425 = vmatmul.mubr.bf16.gmra.mrb[20].mxu0 %v4072_v7  ;;  %538 = vmatmul.mubr.bf16.gmra.mrb[20].mxu1 %v4072_v7 }
  0x83   :  { %434 = vmatprep.mubr.bf16.mxu0 %v4556_v0  ;;  %547 = vmatprep.mubr.bf16.mxu1 %v4556_v0 }
  0x8a   :  { %435 = vmatmul.mubr.bf16.gmra.mrb[24].mxu0 %v4079_v8  ;;  %548 = vmatmul.mubr.bf16.gmra.mrb[24].mxu1 %v4079_v8 }
  0x8b   :  { %444 = vmatprep.mubr.bf16.mxu0 %v4556_v0  ;;  %557 = vmatprep.mubr.bf16.mxu1 %v4556_v0 }
  0x92   :  { %445 = vmatmul.mubr.bf16.gmra.mrb[28].mxu0 %v4086_v9  ;;  %558 = vmatmul.mubr.bf16.gmra.mrb[28].mxu1 %v4086_v9 }
  0x93   :  { %880 = vmatprep.mubr.bf16.mxu0 %v4556_v0  ;;  %923 = vmatprep.mubr.bf16.mxu1 %v4556_v0 }
  0x9a   :  { %881 = vmatmul.mubr.bf16.vlgmr.msra.gmra.mrb[0].mxu0 %v4557_v10  ;;  %924 = vmatmul.mubr.bf16.vlgmr.msra.gmra.mrb[0].mxu1 %v4557_v10 }
  0x9b   :  { %1197 = vmatpush1.bf16.msra.mxu0 %v4646_v36  ;;  %1240 = vmatpush1.bf16.msra.mxu1 %v4652_v38 }
  0x9c   :  { %1198 = vmatprep.subr.bf16.mxu0 %v4649_v37  ;;  %1241 = vmatprep.subr.bf16.mxu1 %v4654_v39 }
  0x9d   :  { %1228 = vmatprep.mubr.bf16.mxu0 %v4556_v0  ;;  %1271 = vmatprep.mubr.bf16.mxu1 %v4556_v0 }
  0x9f   :  { %1199 = vmatpush1.bf16.msra.mxu0 %v4658_v40  ;;  %1242 = vmatpush1.bf16.msra.mxu1 %v4665_v42 }
  0xa0   :  { %1200 = vmatprep.subr.bf16.mxu0 %v4662_v41  ;;  %1243 = vmatprep.subr.bf16.mxu1 %v4674_v46 }
  0xa3   :  { %1201 = vmatpush1.bf16.msra.mxu0 %v4669_v44  ;;  %1244 = vmatpush1.bf16.msra.mxu1 %v4677_v47 }
  0xa4   :  { %1202 = vmatprep.subr.bf16.mxu0 %v4672_v45  ;;  %1245 = vmatprep.subr.bf16.mxu1 %v4679_v48 }
  0xa7   :  { %1203 = vmatpush1.bf16.msra.mxu0 %v4684_v49  ;;  %1246 = vmatpush1.bf16.msra.mxu1 %v4691_v51 }
  0xa8   :  { %1204 = vmatprep.subr.bf16.mxu0 %v4687_v50  ;;  %1247 = vmatprep.subr.bf16.mxu1 %v4697_v54 }
  0xab   :  { %1205 = vmatpush1.bf16.msra.mxu0 %v4694_v53  ;;  %1248 = vmatpush1.bf16.msra.mxu1 %v4703_v56 }
  0xac   :  { %1206 = vmatprep.subr.bf16.mxu0 %v4700_v55  ;;  %1249 = vmatprep.subr.bf16.mxu1 %v4705_v57 }
  0xaf   :  { %1207 = vmatpush1.bf16.msra.mxu0 %v4707_v58  ;;  %1250 = vmatpush1.bf16.msra.mxu1 %v4713_v60 }
  0xb0   :  { %1208 = vmatprep.subr.bf16.mxu0 %v4711_v59  ;;  %1251 = vmatprep.subr.bf16.mxu1 %v4722_v63 }
  0xb3   :  { %1209 = vmatpush1.bf16.msra.mxu0 %v4719_v62  ;;  %1252 = vmatpush1.bf16.msra.mxu1 %v4726_v2 }
  0xb4   :  { %1210 = vmatprep.subr.bf16.mxu0 %v4724_v1  ;;  %1253 = vmatprep.subr.bf16.mxu1 %v4729_v3 }
  0xb7   :  { %1211 = vmatpush1.bf16.msra.mxu0 %v4733_v4  ;;  %1254 = vmatpush1.bf16.msra.mxu1 %v4737_v5 }
  0xb8   :  { %1545 = vmatprep.subr.bf16.mxu0 %v4642_v33  ;;  %1588 = vmatprep.subr.bf16.mxu1 %v4644_v34 }
 0x16d   :  { %v882_v18 = vpop.f32.mrb[0].mxu0  ;;  %v925_v20 = vpop.f32.mrb[0].mxu1 }
 0x16e   :  { %v3850_v21 = vadd.f32 %v882_v18, %v4793_v16  ;;  %v884_v22 = vpop.f32.mrb[1].mxu0  ;;  %v927_v23 = vpop.f32.mrb[1].mxu1  ;;  %v3882_v6 = vadd.f32 %v925_v20, %v4800_v32 }
 0x16f   :  { %v3851_v24 = vadd.f32 %v884_v22, %v4795_v17  ;;  %v886_v25 = vpop.f32.mrb[2].mxu0  ;;  %v929_v26 = vpop.f32.mrb[2].mxu1  ;;  %v3883_v8 = vadd.f32 %v927_v23, %v4803_v61 }
 0x170   :  { %v3578_v27 = vmul.f32 -1.442695, %v3850_v21  ;;  %v3852_v29 = vadd.f32 %v886_v25, %v4793_v16  ;;  %v888_v30 = vpop.f32.mrb[3].mxu0  ;;  %v931_v31 = vpop.f32.mrb[3].mxu1  ;;  %v3884_v7 = vadd.f32 %v929_v26, %v4800_v32  ;;  %v3580_v9 = vmul.f32 -1.442695, %v3882_v6 }
 0x171   :  { %v3579_v33 = vmul.f32 -1.442695, %v3851_v24  ;;  %v3853_v35 = vadd.f32 %v888_v30, %v4795_v17  ;;  %v3885_v12 = vadd.f32 %v931_v31, %v4803_v61 }
 0x172   :  { %4153 = vpow2.f32 %v3578_v27  ;;  %v3581_v43 = vmul.f32 -1.442695, %v3852_v29  ;;  %v3583_v10 = vmul.f32 -1.442695, %v3884_v7 }
 0x173   :  { %v3582_v52 = vmul.f32 -1.442695, %v3853_v35  ;;  %4155 = vpow2.f32 %v3579_v33 }
 0x174   :  { %4157 = vpow2.f32 %v3581_v43 }
 0x175   :  { %4159 = vpow2.f32 %v3582_v52 }
 0x176   :  { %4161 = vtanh.f32 %v3883_v8 }
 0x177   :  { %4163 = vpow2.f32 %v3580_v9 }
 0x178   :  { %4165 = vpow2.f32 %v3583_v10 }
 0x17c   :  { %v4154_v11 = vpop.eup %4153 }
 0x17d   :  { %v960_v13 = vadd.f32 1.0, %v4154_v11  ;;  %v4156_v15 = vpop.eup %4155 }
 0x17e   :  { %v4158_v14 = vpop.eup %4157  ;;  %v961_v18 = vadd.f32 1.0, %v4156_v15 }
 0x17f   :  { %4167 = vrcp.f32 %v960_v13  ;;  %v963_v19 = vadd.f32 1.0, %v4158_v14  ;;  %v4160_v20 = vpop.eup %4159 }
 0x180   :  { %4169 = vtanh.f32 %v3885_v12  ;;  %v964_v21 = vadd.f32 1.0, %v4160_v20  ;;  %v4162_v22 = vpop.eup %4161 }
 0x181   :  { %4171 = vrcp.f32 %v961_v18  ;;  %v4164_v23 = vpop.eup %4163 }
 0x182   :  { %4173 = vrcp.f32 %v963_v19  ;;  %v4166_v24 = vpop.eup %4165  ;;  %v962_v29 = vadd.f32 1.0, %v4164_v23 }
 0x183   :  { %4175 = vrcp.f32 %v964_v21  ;;  %v965_v52 = vadd.f32 1.0, %v4166_v24 }
 0x184   :  { %4177 = vrcp.f32 %v962_v29 }
 0x189   :  { %v4168_v25 = vpop.eup %4167 }
 0x18a   :  { %v4170_v26 = vpop.eup %4169  ;;  %v982_v27 = vmul.f32 %v4168_v25, %v4162_v22 }
 0x18b   :  { %v4172_v28 = vpop.eup %4171 }
 0x18c   :  { %v4174_v30 = vpop.eup %4173  ;;  %v980_v31 = vmul.f32 0.0, %v4172_v28 }
 0x18d   :  { %v983_v33 = vmul.f32 %v4174_v30, %v4170_v26  ;;  %v4176_v35 = vpop.eup %4175 }
 0x18e   :  { %v4809_v43 = vadd.f32 %v982_v27, %v980_v31  ;;  %v981_v6 = vmul.f32 0.0, %v4176_v35  ;;  %v4178_v8 = vpop.eup %4177 }
 0x190   :  { %4179 = vtanh.f32 %v4809_v43  ;;  %v4812_v7 = vadd.f32 %v983_v33, %v981_v6 }
 0x191   :  { %4181 = vrcp.f32 %v965_v52 }
 0x192   :  { %4183 = vtanh.f32 %v4812_v7 }
 0x19a   :  { %v4180_v9 = vpop.eup %4179 }
 0x19b   :  { %v988_v10 = vmul.f32 %v4180_v9, %v4178_v8  ;;  %v4182_v11 = vpop.eup %4181 }
 0x19c   :  { %v4184_v12 = vpop.eup %4183 }
 0x19d   :  { %990 = vst [vmem:[#allocation11] sm:$0xff] %v988_v10  ;;  %v989_v13 = vmul.f32 %v4184_v12, %v4182_v11 }
 0x19f   :  { %991 = vst [vmem:[#allocation11 + $0x8] sm:$0xff] %v989_v13  ;;  %v1003_v15 = vpack.c.bf16 %v989_v13, %v988_v10 }
 0x1a1   :  { %1229 = vmatmul.mubr.bf16.vlgmr.msra.gmra.mrb[4].mxu0 %v1003_v15  ;;  %1272 = vmatmul.mubr.bf16.vlgmr.msra.gmra.mrb[4].mxu1 %v1003_v15 }
 0x1a2   :  { %1546 = vmatpush1.bf16.msra.mxu0 %v4646_v36  ;;  %1589 = vmatpush1.bf16.msra.mxu1 %v4652_v38 }
 0x1a3   :  { %1547 = vmatprep.subr.bf16.mxu0 %v4649_v37  ;;  %1590 = vmatprep.subr.bf16.mxu1 %v4654_v39 }
 0x1a4   :  { %1577 = vmatprep.mubr.bf16.mxu0 %v4556_v0  ;;  %1620 = vmatprep.mubr.bf16.mxu1 %v4556_v0 }
 0x1a6   :  { %1548 = vmatpush1.bf16.msra.mxu0 %v4658_v40  ;;  %1591 = vmatpush1.bf16.msra.mxu1 %v4665_v42 }
 0x1a7   :  { %1549 = vmatprep.subr.bf16.mxu0 %v4662_v41  ;;  %1592 = vmatprep.subr.bf16.mxu1 %v4674_v46 }
 0x1aa   :  { %1550 = vmatpush1.bf16.msra.mxu0 %v4669_v44  ;;  %1593 = vmatpush1.bf16.msra.mxu1 %v4677_v47 }
 0x1ab   :  { %1551 = vmatprep.subr.bf16.mxu0 %v4672_v45  ;;  %1594 = vmatprep.subr.bf16.mxu1 %v4679_v48 }
 0x1ae   :  { %1552 = vmatpush1.bf16.msra.mxu0 %v4684_v49  ;;  %1595 = vmatpush1.bf16.msra.mxu1 %v4691_v51 }
 0x1af   :  { %1553 = vmatprep.subr.bf16.mxu0 %v4687_v50  ;;  %1596 = vmatprep.subr.bf16.mxu1 %v4697_v54 }
 0x1b2   :  { %1554 = vmatpush1.bf16.msra.mxu0 %v4694_v53  ;;  %1597 = vmatpush1.bf16.msra.mxu1 %v4703_v56 }
 0x1b3   :  { %1555 = vmatprep.subr.bf16.mxu0 %v4700_v55  ;;  %1598 = vmatprep.subr.bf16.mxu1 %v4705_v57 }
 0x1b6   :  { %1556 = vmatpush1.bf16.msra.mxu0 %v4707_v58  ;;  %1599 = vmatpush1.bf16.msra.mxu1 %v4713_v60 }
 0x1b7   :  { %1557 = vmatprep.subr.bf16.mxu0 %v4711_v59  ;;  %1600 = vmatprep.subr.bf16.mxu1 %v4722_v63 }
 0x1ba   :  { %1558 = vmatpush1.bf16.msra.mxu0 %v4719_v62  ;;  %1601 = vmatpush1.bf16.msra.mxu1 %v4726_v2 }
 0x1bb   :  { %1559 = vmatprep.subr.bf16.mxu0 %v4724_v1  ;;  %1602 = vmatprep.subr.bf16.mxu1 %v4729_v3 }
 0x1be   :  { %1560 = vmatpush1.bf16.msra.mxu0 %v4733_v4  ;;  %1603 = vmatpush1.bf16.msra.mxu1 %v4737_v5 }
 0x1bf   :  { %1937 = vmatprep.subr.bf16.mxu1 %v4644_v34 }
 0x274   :  { %v1230_v36 = vpop.f32.mrb[4].mxu0  ;;  %v1273_v37 = vpop.f32.mrb[4].mxu1 }
 0x275   :  { %v3854_v40 = vadd.f32 %v1230_v36, %v4793_v16  ;;  %v1232_v41 = vpop.f32.mrb[5].mxu0  ;;  %v1275_v44 = vpop.f32.mrb[5].mxu1  ;;  %v3886_v27 = vadd.f32 %v1273_v37, %v4800_v32 }
 0x276   :  { %v3855_v14 = vadd.f32 %v1232_v41, %v4795_v17  ;;  %v1234_v18 = vpop.f32.mrb[6].mxu0  ;;  %v1277_v19 = vpop.f32.mrb[6].mxu1  ;;  %v3887_v29 = vadd.f32 %v1275_v44, %v4803_v61 }
 0x277   :  { %v3616_v20 = vmul.f32 -1.442695, %v3854_v40  ;;  %v3856_v21 = vadd.f32 %v1234_v18, %v4793_v16  ;;  %v1236_v22 = vpop.f32.mrb[7].mxu0  ;;  %v1279_v23 = vpop.f32.mrb[7].mxu1  ;;  %v3888_v28 = vadd.f32 %v1277_v19, %v4800_v32  ;;  %v3618_v30 = vmul.f32 -1.442695, %v3886_v27 }
 0x278   :  { %v3617_v24 = vmul.f32 -1.442695, %v3855_v14  ;;  %v3857_v25 = vadd.f32 %v1236_v22, %v4795_v17  ;;  %v3889_v35 = vadd.f32 %v1279_v23, %v4803_v61 }
 0x279   :  { %4185 = vpow2.f32 %v3616_v20  ;;  %v3619_v34 = vmul.f32 -1.442695, %v3856_v21  ;;  %v3621_v31 = vmul.f32 -1.442695, %v3888_v28 }
 0x27a   :  { %v3620_v26 = vmul.f32 -1.442695, %v3857_v25  ;;  %4187 = vpow2.f32 %v3617_v24 }
 0x27b   :  { %4189 = vpow2.f32 %v3619_v34 }
 0x27c   :  { %4191 = vpow2.f32 %v3620_v26 }
 0x27d   :  { %4193 = vtanh.f32 %v3887_v29 }
 0x27e   :  { %4195 = vpow2.f32 %v3618_v30 }
 0x27f   :  { %4197 = vpow2.f32 %v3621_v31 }
 0x283   :  { %v4186_v33 = vpop.eup %4185 }
 0x284   :  { %v1308_v52 = vadd.f32 1.0, %v4186_v33  ;;  %v4188_v6 = vpop.eup %4187 }
 0x285   :  { %v4190_v8 = vpop.eup %4189  ;;  %v1309_v9 = vadd.f32 1.0, %v4188_v6 }
 0x286   :  { %4199 = vrcp.f32 %v1308_v52  ;;  %v1311_v10 = vadd.f32 1.0, %v4190_v8  ;;  %v4192_v11 = vpop.eup %4191 }
 0x287   :  { %4201 = vtanh.f32 %v3889_v35  ;;  %v1312_v12 = vadd.f32 1.0, %v4192_v11  ;;  %v4194_v13 = vpop.eup %4193 }
 0x288   :  { %4203 = vrcp.f32 %v1309_v9  ;;  %v4196_v15 = vpop.eup %4195 }
 0x289   :  { %4205 = vrcp.f32 %v1311_v10  ;;  %v4198_v36 = vpop.eup %4197  ;;  %v1310_v14 = vadd.f32 1.0, %v4196_v15 }
 0x28a   :  { %4207 = vrcp.f32 %v1312_v12  ;;  %v1313_v23 = vadd.f32 1.0, %v4198_v36 }
 0x28b   :  { %4209 = vrcp.f32 %v1310_v14 }
 0x290   :  { %v4200_v37 = vpop.eup %4199 }
 0x291   :  { %v4202_v40 = vpop.eup %4201  ;;  %v1330_v41 = vmul.f32 %v4200_v37, %v4194_v13 }
 0x292   :  { %v4204_v44 = vpop.eup %4203 }
 0x293   :  { %v4206_v18 = vpop.eup %4205  ;;  %v1328_v19 = vmul.f32 %v4204_v44, %v4809_v43 }
 0x294   :  { %v1331_v20 = vmul.f32 %v4206_v18, %v4202_v40  ;;  %v4208_v21 = vpop.eup %4207 }
 0x295   :  { %v4857_v22 = vadd.f32 %v1330_v41, %v1328_v19  ;;  %v1329_v24 = vmul.f32 %v4208_v21, %v4812_v7  ;;  %v4210_v34 = vpop.eup %4209 }
 0x297   :  { %4211 = vtanh.f32 %v4857_v22  ;;  %v4861_v25 = vadd.f32 %v1331_v20, %v1329_v24 }
 0x298   :  { %4213 = vrcp.f32 %v1313_v23 }
 0x299   :  { %4215 = vtanh.f32 %v4861_v25 }
 0x2a1   :  { %v4212_v26 = vpop.eup %4211 }
 0x2a2   :  { %v1336_v27 = vmul.f32 %v4212_v26, %v4210_v34  ;;  %v4214_v28 = vpop.eup %4213 }
 0x2a3   :  { %v4216_v43 = vpop.eup %4215 }
 0x2a4   :  { %1339 = vst [vmem:[#allocation11 + $0x10] sm:$0xff] %v1336_v27  ;;  %v1337_v29 = vmul.f32 %v4216_v43, %v4214_v28 }
 0x2a6   :  { %1340 = vst [vmem:[#allocation11 + $0x18] sm:$0xff] %v1337_v29  ;;  %v1352_v30 = vpack.c.bf16 %v1337_v29, %v1336_v27 }
 0x2a8   :  { %1578 = vmatmul.mubr.bf16.vlgmr.msra.gmra.mrb[8].mxu0 %v1352_v30  ;;  %1621 = vmatmul.mubr.bf16.vlgmr.msra.gmra.mrb[8].mxu1 %v1352_v30 }
 0x2a9   :  { %1938 = vmatpush1.bf16.msra.mxu1 %v4652_v38  ;;  %1926 = vmatprep.mubr.bf16.mxu0 %v4556_v0  ;;  %v4881_v38 = vld [vmem:[#allocation10 + $0x4] ss:$16 sps:$4 sm:$0xff]  }
 0x2aa   :  { %1939 = vmatprep.subr.bf16.mxu1 %v4654_v39  ;;  %1969 = vmatprep.mubr.bf16.mxu1 %v4556_v0  ;;  %v4883_v39 = vld [vmem:[#allocation10] ss:$16 sps:$4 sm:$0xff]  }
 0x2ab   :  { %1894 = vmatprep.subr.bf16.mxu0 %v4881_v38 }
 0x2ac   :  { %1895 = vmatpush1.bf16.msra.mxu0 %v4883_v39 }
 0x2ad   :  { %1940 = vmatpush1.bf16.msra.mxu1 %v4665_v42  ;;  %v4887_v42 = vld [vmem:[#allocation10 + $0x24] ss:$16 sps:$4 sm:$0xff]  }
 0x2ae   :  { %1941 = vmatprep.subr.bf16.mxu1 %v4674_v46  ;;  %v4889_v46 = vld [vmem:[#allocation10 + $0x20] ss:$16 sps:$4 sm:$0xff]   ;;  %1896 = vmatprep.subr.bf16.mxu0 %v4887_v42 }
 0x2b0   :  { %1897 = vmatpush1.bf16.msra.mxu0 %v4889_v46 }
 0x2b1   :  { %1942 = vmatpush1.bf16.msra.mxu1 %v4677_v47  ;;  %v4893_v47 = vld [vmem:[#allocation10 + $0x44] ss:$16 sps:$4 sm:$0xff]  }
 0x2b2   :  { %1943 = vmatprep.subr.bf16.mxu1 %v4679_v48  ;;  %v4895_v48 = vld [vmem:[#allocation10 + $0x40] ss:$16 sps:$4 sm:$0xff]   ;;  %1898 = vmatprep.subr.bf16.mxu0 %v4893_v47 }
 0x2b4   :  { %1899 = vmatpush1.bf16.msra.mxu0 %v4895_v48 }
 0x2b5   :  { %1944 = vmatpush1.bf16.msra.mxu1 %v4691_v51  ;;  %1900 = vmatprep.subr.bf16.mxu0 %v4672_v45 }
 0x2b6   :  { %1945 = vmatprep.subr.bf16.mxu1 %v4697_v54 }
 0x2b8   :  { %1901 = vmatpush1.bf16.msra.mxu0 %v4684_v49 }
 0x2b9   :  { %1946 = vmatpush1.bf16.msra.mxu1 %v4703_v56  ;;  %1902 = vmatprep.subr.bf16.mxu0 %v4687_v50 }
 0x2ba   :  { %1947 = vmatprep.subr.bf16.mxu1 %v4705_v57 }
 0x2bc   :  { %1903 = vmatpush1.bf16.msra.mxu0 %v4694_v53 }
 0x2bd   :  { %1948 = vmatpush1.bf16.msra.mxu1 %v4713_v60  ;;  %1904 = vmatprep.subr.bf16.mxu0 %v4700_v55 }
 0x2be   :  { %1949 = vmatprep.subr.bf16.mxu1 %v4722_v63 }
 0x2c0   :  { %1905 = vmatpush1.bf16.msra.mxu0 %v4707_v58 }
 0x2c1   :  { %1950 = vmatpush1.bf16.msra.mxu1 %v4726_v2  ;;  %1906 = vmatprep.subr.bf16.mxu0 %v4711_v59 }
 0x2c2   :  { %1951 = vmatprep.subr.bf16.mxu1 %v4729_v3 }
 0x2c4   :  { %1907 = vmatpush1.bf16.msra.mxu0 %v4719_v62 }
 0x2c5   :  { %1952 = vmatpush1.bf16.msra.mxu1 %v4737_v5  ;;  %1908 = vmatprep.subr.bf16.mxu0 %v4724_v1 }
 0x2c8   :  { %1909 = vmatpush1.bf16.msra.mxu0 %v4733_v4 }
 0x2c9   :  { %2243 = vmatprep.subr.bf16.mxu0 %v4881_v38 }
 0x37b   :  { %v1579_v45 = vpop.f32.mrb[8].mxu0  ;;  %v1622_v49 = vpop.f32.mrb[8].mxu1 }
 0x37c   :  { %v3858_v50 = vadd.f32 %v1579_v45, %v4793_v16  ;;  %v1581_v51 = vpop.f32.mrb[9].mxu0  ;;  %v1624_v53 = vpop.f32.mrb[9].mxu1  ;;  %v3890_v3 = vadd.f32 %v1622_v49, %v4800_v32  ;;  %v4935_v49 = vld [vmem:[#allocation10 + $0x8] ss:$16 sps:$4 sm:$0xff]  }
 0x37d   :  { %v3859_v54 = vadd.f32 %v1581_v51, %v4795_v17  ;;  %v1583_v55 = vpop.f32.mrb[10].mxu0  ;;  %v1626_v56 = vpop.f32.mrb[10].mxu1  ;;  %v3891_v5 = vadd.f32 %v1624_v53, %v4803_v61  ;;  %v4941_v51 = vld [vmem:[#allocation10 + $0x28] ss:$16 sps:$4 sm:$0xff]   ;;  %v4945_v53 = vld [vmem:[#allocation10 + $0x4c] ss:$16 sps:$4 sm:$0xff]  }
 0x37e   :  { %v3654_v57 = vmul.f32 -1.442695, %v3858_v50  ;;  %v3860_v58 = vadd.f32 %v1583_v55, %v4793_v16  ;;  %v1585_v59 = vpop.f32.mrb[11].mxu0  ;;  %v1628_v60 = vpop.f32.mrb[11].mxu1  ;;  %v3892_v4 = vadd.f32 %v1626_v56, %v4800_v32  ;;  %v3656_v7 = vmul.f32 -1.442695, %v3890_v3 }
 0x37f   :  { %v3655_v62 = vmul.f32 -1.442695, %v3859_v54  ;;  %v3861_v63 = vadd.f32 %v1585_v59, %v4795_v17  ;;  %v3893_v35 = vadd.f32 %v1628_v60, %v4803_v61  ;;  %v4939_v50 = vld [vmem:[#allocation10 + $0x2c] ss:$16 sps:$4 sm:$0xff]   ;;  %v4947_v54 = vld [vmem:[#allocation10 + $0x48] ss:$16 sps:$4 sm:$0xff]  }
 0x380   :  { %4217 = vpow2.f32 %v3654_v57  ;;  %v3657_v1 = vmul.f32 -1.442695, %v3860_v58  ;;  %v3659_v31 = vmul.f32 -1.442695, %v3892_v4  ;;  %v4951_v55 = vld [vmem:[#allocation10 + $0x64] ss:$16 sps:$4 sm:$0xff]  }
 0x381   :  { %v3658_v2 = vmul.f32 -1.442695, %v3861_v63  ;;  %4219 = vpow2.f32 %v3655_v62  ;;  %v4953_v56 = vld [vmem:[#allocation10 + $0x6c] ss:$16 sps:$4 sm:$0xff]   ;;  %v4955_v57 = vld [vmem:[#allocation10 + $0x60] ss:$16 sps:$4 sm:$0xff]  }
 0x382   :  { %4221 = vpow2.f32 %v3657_v1  ;;  %v4957_v58 = vld [vmem:[#allocation10 + $0x68] ss:$16 sps:$4 sm:$0xff]   ;;  %v4963_v59 = vld [vmem:[#allocation10 + $0x80] ss:$16 sps:$4 sm:$0xff]   ;;  %v4965_v60 = vld [vmem:[#allocation10 + $0x84] ss:$16 sps:$4 sm:$0xff]  }
 0x383   :  { %4223 = vpow2.f32 %v3658_v2  ;;  %v4967_v62 = vld [vmem:[#allocation10 + $0x88] ss:$16 sps:$4 sm:$0xff]   ;;  %v4969_v63 = vld [vmem:[#allocation10 + $0x8c] ss:$16 sps:$4 sm:$0xff]   ;;  %v4971_v1 = vld [vmem:[#allocation10 + $0xa4] ss:$16 sps:$4 sm:$0xff]  }
 0x384   :  { %4225 = vtanh.f32 %v3891_v5  ;;  %v4974_v2 = vld [vmem:[#allocation10 + $0xac] ss:$16 sps:$4 sm:$0xff]   ;;  %v4978_v3 = vld [vmem:[#allocation10 + $0xa0] ss:$16 sps:$4 sm:$0xff]   ;;  %v4982_v4 = vld [vmem:[#allocation10 + $0xa8] ss:$16 sps:$4 sm:$0xff]  }
 0x385   :  { %4227 = vpow2.f32 %v3656_v7  ;;  %v4984_v5 = vld [vmem:[#allocation10 + $0xc4] ss:$16 sps:$4 sm:$0xff]   ;;  %v4987_v7 = vld [vmem:[#allocation10 + $0xcc] ss:$16 sps:$4 sm:$0xff]  }
 0x386   :  { %4229 = vpow2.f32 %v3659_v31  ;;  %v4990_v31 = vld [vmem:[#allocation10 + $0xc0] ss:$16 sps:$4 sm:$0xff]  }
 0x38a   :  { %v4218_v33 = vpop.eup %4217 }
 0x38b   :  { %v1657_v52 = vadd.f32 1.0, %v4218_v33  ;;  %v4220_v6 = vpop.eup %4219  ;;  %v4994_v33 = vld [vmem:[#allocation10 + $0xc8] ss:$16 sps:$4 sm:$0xff]  }
 0x38c   :  { %v4222_v8 = vpop.eup %4221  ;;  %v1658_v9 = vadd.f32 1.0, %v4220_v6  ;;  %v5002_v6 = vld [vmem:[#allocation10 + $0xe0] ss:$16 sps:$4 sm:$0xff]  }
 0x38d   :  { %4231 = vrcp.f32 %v1657_v52  ;;  %v1660_v10 = vadd.f32 1.0, %v4222_v8  ;;  %v4224_v11 = vpop.eup %4223  ;;  %v4999_v52 = vld [vmem:[#allocation10 + $0xec] ss:$16 sps:$4 sm:$0xff]   ;;  %v5006_v8 = vld [vmem:[#allocation10 + $0xe8] ss:$16 sps:$4 sm:$0xff]  }
 0x38e   :  { %4233 = vtanh.f32 %v3893_v35  ;;  %v1661_v12 = vadd.f32 1.0, %v4224_v11  ;;  %v4226_v13 = vpop.eup %4225  ;;  %v4996_v35 = vld [vmem:[#allocation10 + $0xe4] ss:$16 sps:$4 sm:$0xff]  }
 0x38f   :  { %4235 = vrcp.f32 %v1658_v9  ;;  %v4228_v15 = vpop.eup %4227 }
 0x390   :  { %4237 = vrcp.f32 %v1660_v10  ;;  %v4230_v36 = vpop.eup %4229  ;;  %v1659_v14 = vadd.f32 1.0, %v4228_v15 }
 0x391   :  { %4239 = vrcp.f32 %v1661_v12  ;;  %v1662_v24 = vadd.f32 1.0, %v4230_v36 }
 0x392   :  { %4241 = vrcp.f32 %v1659_v14 }
 0x397   :  { %v4232_v37 = vpop.eup %4231 }
 0x398   :  { %v4234_v40 = vpop.eup %4233  ;;  %v1679_v41 = vmul.f32 %v4232_v37, %v4226_v13 }
 0x399   :  { %v4236_v44 = vpop.eup %4235 }
 0x39a   :  { %v4238_v18 = vpop.eup %4237  ;;  %v1677_v19 = vmul.f32 %v4236_v44, %v4857_v22 }
 0x39b   :  { %v1680_v20 = vmul.f32 %v4238_v18, %v4234_v40  ;;  %v4240_v21 = vpop.eup %4239 }
 0x39c   :  { %v4919_v23 = vadd.f32 %v1679_v41, %v1677_v19  ;;  %v1678_v34 = vmul.f32 %v4240_v21, %v4861_v25  ;;  %v4242_v27 = vpop.eup %4241  ;;  %v4933_v25 = vld [vmem:[#allocation10 + $0xc] ss:$16 sps:$4 sm:$0xff]  }
 0x39d   :  { %2286 = vmatprep.subr.bf16.mxu1 %v4933_v25 }
 0x39e   :  { %4243 = vtanh.f32 %v4919_v23  ;;  %v4923_v26 = vadd.f32 %v1680_v20, %v1678_v34 }
 0x39f   :  { %4245 = vrcp.f32 %v1662_v24 }
 0x3a0   :  { %4247 = vtanh.f32 %v4923_v26 }
 0x3a8   :  { %v4244_v28 = vpop.eup %4243 }
 0x3a9   :  { %v1685_v43 = vmul.f32 %v4244_v28, %v4242_v27  ;;  %v4246_v29 = vpop.eup %4245 }
 0x3aa   :  { %v4248_v22 = vpop.eup %4247 }
 0x3ab   :  { %1688 = vst [vmem:[#allocation11 + $0x20] sm:$0xff] %v1685_v43  ;;  %v1686_v30 = vmul.f32 %v4248_v22, %v4246_v29 }
 0x3ad   :  { %1689 = vst [vmem:[#allocation11 + $0x28] sm:$0xff] %v1686_v30  ;;  %v1701_v45 = vpack.c.bf16 %v1686_v30, %v1685_v43 }
 0x3af   :  { %1927 = vmatmul.mubr.bf16.vlgmr.msra.gmra.mrb[12].mxu0 %v1701_v45  ;;  %1970 = vmatmul.mubr.bf16.vlgmr.msra.gmra.mrb[12].mxu1 %v1701_v45 }
 0x3b0   :  { %2244 = vmatpush1.bf16.msra.mxu0 %v4883_v39  ;;  %2275 = vmatprep.mubr.bf16.mxu0 %v4556_v0 }
 0x3b1   :  { %2245 = vmatprep.subr.bf16.mxu0 %v4887_v42  ;;  %2318 = vmatprep.mubr.bf16.mxu1 %v4556_v0 }
 0x3b2   :  { %2287 = vmatpush1.bf16.msra.mxu1 %v4935_v49 }
 0x3b3   :  { %2288 = vmatprep.subr.bf16.mxu1 %v4939_v50 }
 0x3b4   :  { %2246 = vmatpush1.bf16.msra.mxu0 %v4889_v46 }
 0x3b5   :  { %2247 = vmatprep.subr.bf16.mxu0 %v4893_v47 }
 0x3b6   :  { %2289 = vmatpush1.bf16.msra.mxu1 %v4941_v51 }
 0x3b7   :  { %2290 = vmatprep.subr.bf16.mxu1 %v4945_v53 }
 0x3b8   :  { %2248 = vmatpush1.bf16.msra.mxu0 %v4895_v48 }
 0x3b9   :  { %2249 = vmatprep.subr.bf16.mxu0 %v4951_v55 }
 0x3ba   :  { %2291 = vmatpush1.bf16.msra.mxu1 %v4947_v54 }
 0x3bb   :  { %2292 = vmatprep.subr.bf16.mxu1 %v4953_v56 }
 0x3bc   :  { %2250 = vmatpush1.bf16.msra.mxu0 %v4955_v57 }
 0x3bd   :  { %2251 = vmatprep.subr.bf16.mxu0 %v4965_v60 }
 0x3be   :  { %2293 = vmatpush1.bf16.msra.mxu1 %v4957_v58 }
 0x3bf   :  { %2294 = vmatprep.subr.bf16.mxu1 %v4969_v63 }
 0x3c0   :  { %2252 = vmatpush1.bf16.msra.mxu0 %v4963_v59 }
 0x3c1   :  { %2253 = vmatprep.subr.bf16.mxu0 %v4971_v1 }
 0x3c2   :  { %2295 = vmatpush1.bf16.msra.mxu1 %v4967_v62 }
 0x3c3   :  { %2296 = vmatprep.subr.bf16.mxu1 %v4974_v2 }
 0x3c4   :  { %2254 = vmatpush1.bf16.msra.mxu0 %v4978_v3 }
 0x3c5   :  { %2255 = vmatprep.subr.bf16.mxu0 %v4984_v5 }
 0x3c6   :  { %2297 = vmatpush1.bf16.msra.mxu1 %v4982_v4 }
 0x3c7   :  { %2298 = vmatprep.subr.bf16.mxu1 %v4987_v7 }
 0x3c8   :  { %2256 = vmatpush1.bf16.msra.mxu0 %v4990_v31 }
 0x3c9   :  { %2257 = vmatprep.subr.bf16.mxu0 %v4996_v35 }
 0x3ca   :  { %2299 = vmatpush1.bf16.msra.mxu1 %v4994_v33 }
 0x3cb   :  { %2300 = vmatprep.subr.bf16.mxu1 %v4999_v52 }
 0x3cc   :  { %2258 = vmatpush1.bf16.msra.mxu0 %v5002_v6 }
 0x3cd   :  { %2592 = vmatprep.subr.bf16.mxu0 %v4881_v38 }
 0x3ce   :  { %2301 = vmatpush1.bf16.msra.mxu1 %v5006_v8 }
 0x3cf   :  { %2635 = vmatprep.subr.bf16.mxu1 %v4933_v25 }
 0x482   :  { %v1928_v9 = vpop.f32.mrb[12].mxu0  ;;  %v1971_v10 = vpop.f32.mrb[12].mxu1 }
 0x483   :  { %v3862_v11 = vadd.f32 %v1928_v9, %v4793_v16  ;;  %v1930_v12 = vpop.f32.mrb[13].mxu0  ;;  %v1973_v13 = vpop.f32.mrb[13].mxu1  ;;  %v3894_v24 = vadd.f32 %v1971_v10, %v4800_v32 }
 0x484   :  { %v3863_v15 = vadd.f32 %v1930_v12, %v4795_v17  ;;  %v1932_v36 = vpop.f32.mrb[14].mxu0  ;;  %v1975_v37 = vpop.f32.mrb[14].mxu1  ;;  %v3895_v27 = vadd.f32 %v1973_v13, %v4803_v61 }
 0x485   :  { %v3692_v40 = vmul.f32 -1.442695, %v3862_v11  ;;  %v3864_v41 = vadd.f32 %v1932_v36, %v4793_v16  ;;  %v1934_v44 = vpop.f32.mrb[15].mxu0  ;;  %v1977_v14 = vpop.f32.mrb[15].mxu1  ;;  %v3896_v34 = vadd.f32 %v1975_v37, %v4800_v32  ;;  %v3694_v28 = vmul.f32 -1.442695, %v3894_v24 }
 0x486   :  { %v3693_v18 = vmul.f32 -1.442695, %v3863_v15  ;;  %v3865_v19 = vadd.f32 %v1934_v44, %v4795_v17  ;;  %v3897_v22 = vadd.f32 %v1977_v14, %v4803_v61 }
 0x487   :  { %4249 = vpow2.f32 %v3692_v40  ;;  %v3695_v20 = vmul.f32 -1.442695, %v3864_v41  ;;  %v3697_v43 = vmul.f32 -1.442695, %v3896_v34 }
 0x488   :  { %v3696_v21 = vmul.f32 -1.442695, %v3865_v19  ;;  %4251 = vpow2.f32 %v3693_v18 }
 0x489   :  { %4253 = vpow2.f32 %v3695_v20 }
 0x48a   :  { %4255 = vpow2.f32 %v3696_v21 }
 0x48b   :  { %4257 = vtanh.f32 %v3895_v27 }
 0x48c   :  { %4259 = vpow2.f32 %v3694_v28 }
 0x48d   :  { %4261 = vpow2.f32 %v3697_v43 }
 0x491   :  { %v4250_v29 = vpop.eup %4249 }
 0x492   :  { %v2006_v30 = vadd.f32 1.0, %v4250_v29  ;;  %v4252_v45 = vpop.eup %4251 }
 0x493   :  { %v4254_v9 = vpop.eup %4253  ;;  %v2007_v11 = vadd.f32 1.0, %v4252_v45 }
 0x494   :  { %4263 = vrcp.f32 %v2006_v30  ;;  %v2009_v10 = vadd.f32 1.0, %v4254_v9  ;;  %v4256_v12 = vpop.eup %4255 }
 0x495   :  { %4265 = vtanh.f32 %v3897_v22  ;;  %v2010_v15 = vadd.f32 1.0, %v4256_v12  ;;  %v4258_v13 = vpop.eup %4257 }
 0x496   :  { %4267 = vrcp.f32 %v2007_v11  ;;  %v4260_v36 = vpop.eup %4259 }
 0x497   :  { %4269 = vrcp.f32 %v2009_v10  ;;  %v4262_v37 = vpop.eup %4261  ;;  %v2008_v18 = vadd.f32 1.0, %v4260_v36 }
 0x498   :  { %4271 = vrcp.f32 %v2010_v15  ;;  %v2011_v27 = vadd.f32 1.0, %v4262_v37 }
 0x499   :  { %4273 = vrcp.f32 %v2008_v18 }
 0x49e   :  { %v4264_v40 = vpop.eup %4263 }
 0x49f   :  { %v4266_v41 = vpop.eup %4265  ;;  %v2028_v44 = vmul.f32 %v4264_v40, %v4258_v13 }
 0x4a0   :  { %v4268_v14 = vpop.eup %4267 }
 0x4a1   :  { %v4270_v19 = vpop.eup %4269  ;;  %v2026_v20 = vmul.f32 %v4268_v14, %v4919_v23 }
 0x4a2   :  { %v2029_v21 = vmul.f32 %v4270_v19, %v4266_v41  ;;  %v4272_v24 = vpop.eup %4271 }
 0x4a3   :  { %v5022_v34 = vadd.f32 %v2028_v44, %v2026_v20  ;;  %v2027_v28 = vmul.f32 %v4272_v24, %v4923_v26  ;;  %v4274_v29 = vpop.eup %4273 }
 0x4a5   :  { %4275 = vtanh.f32 %v5022_v34  ;;  %v5026_v43 = vadd.f32 %v2029_v21, %v2027_v28 }
 0x4a6   :  { %4277 = vrcp.f32 %v2011_v27 }
 0x4a7   :  { %4279 = vtanh.f32 %v5026_v43 }
 0x4af   :  { %v4276_v22 = vpop.eup %4275 }
 0x4b0   :  { %v2034_v30 = vmul.f32 %v4276_v22, %v4274_v29  ;;  %v4278_v45 = vpop.eup %4277 }
 0x4b1   :  { %v4280_v23 = vpop.eup %4279 }
 0x4b2   :  { %2037 = vst [vmem:[#allocation11 + $0x30] sm:$0xff] %v2034_v30  ;;  %v2035_v9 = vmul.f32 %v4280_v23, %v4278_v45 }
 0x4b4   :  { %2038 = vst [vmem:[#allocation11 + $0x38] sm:$0xff] %v2035_v9  ;;  %v2050_v11 = vpack.c.bf16 %v2035_v9, %v2034_v30 }
 0x4b6   :  { %2276 = vmatmul.mubr.bf16.vlgmr.msra.gmra.mrb[16].mxu0 %v2050_v11  ;;  %2319 = vmatmul.mubr.bf16.vlgmr.msra.gmra.mrb[16].mxu1 %v2050_v11 }
 0x4b7   :  { %2593 = vmatpush1.bf16.msra.mxu0 %v4883_v39  ;;  %2636 = vmatpush1.bf16.msra.mxu1 %v4935_v49 }
 0x4b8   :  { %2594 = vmatprep.subr.bf16.mxu0 %v4887_v42  ;;  %2637 = vmatprep.subr.bf16.mxu1 %v4939_v50 }
 0x4b9   :  { %2624 = vmatprep.mubr.bf16.mxu0 %v4556_v0  ;;  %2667 = vmatprep.mubr.bf16.mxu1 %v4556_v0 }
 0x4bb   :  { %2595 = vmatpush1.bf16.msra.mxu0 %v4889_v46  ;;  %2638 = vmatpush1.bf16.msra.mxu1 %v4941_v51 }
 0x4bc   :  { %2596 = vmatprep.subr.bf16.mxu0 %v4893_v47  ;;  %2639 = vmatprep.subr.bf16.mxu1 %v4945_v53 }
 0x4bf   :  { %2597 = vmatpush1.bf16.msra.mxu0 %v4895_v48  ;;  %2640 = vmatpush1.bf16.msra.mxu1 %v4947_v54 }
 0x4c0   :  { %2598 = vmatprep.subr.bf16.mxu0 %v4951_v55  ;;  %2641 = vmatprep.subr.bf16.mxu1 %v4953_v56 }
 0x4c3   :  { %2599 = vmatpush1.bf16.msra.mxu0 %v4955_v57  ;;  %2642 = vmatpush1.bf16.msra.mxu1 %v4957_v58 }
 0x4c4   :  { %2600 = vmatprep.subr.bf16.mxu0 %v4965_v60  ;;  %2643 = vmatprep.subr.bf16.mxu1 %v4969_v63 }
 0x4c7   :  { %2601 = vmatpush1.bf16.msra.mxu0 %v4963_v59  ;;  %2644 = vmatpush1.bf16.msra.mxu1 %v4967_v62 }
 0x4c8   :  { %2602 = vmatprep.subr.bf16.mxu0 %v4971_v1  ;;  %2645 = vmatprep.subr.bf16.mxu1 %v4974_v2 }
 0x4cb   :  { %2603 = vmatpush1.bf16.msra.mxu0 %v4978_v3  ;;  %2646 = vmatpush1.bf16.msra.mxu1 %v4982_v4 }
 0x4cc   :  { %2604 = vmatprep.subr.bf16.mxu0 %v4984_v5  ;;  %2647 = vmatprep.subr.bf16.mxu1 %v4987_v7 }
 0x4cf   :  { %2605 = vmatpush1.bf16.msra.mxu0 %v4990_v31  ;;  %2648 = vmatpush1.bf16.msra.mxu1 %v4994_v33 }
 0x4d0   :  { %2606 = vmatprep.subr.bf16.mxu0 %v4996_v35  ;;  %2649 = vmatprep.subr.bf16.mxu1 %v4999_v52 }
 0x4d3   :  { %2607 = vmatpush1.bf16.msra.mxu0 %v5002_v6  ;;  %2650 = vmatpush1.bf16.msra.mxu1 %v5006_v8 }
 0x4d4   :  { %2941 = vmatprep.subr.bf16.mxu0 %v4881_v38  ;;  %2984 = vmatprep.subr.bf16.mxu1 %v4933_v25 }
 0x589   :  { %v2277_v26 = vpop.f32.mrb[16].mxu0  ;;  %v2320_v10 = vpop.f32.mrb[16].mxu1 }
 0x58a   :  { %v3866_v12 = vadd.f32 %v2277_v26, %v4793_v16  ;;  %v2279_v15 = vpop.f32.mrb[17].mxu0  ;;  %v2322_v13 = vpop.f32.mrb[17].mxu1  ;;  %v3898_v24 = vadd.f32 %v2320_v10, %v4800_v32 }
 0x58b   :  { %v3867_v36 = vadd.f32 %v2279_v15, %v4795_v17  ;;  %v2281_v37 = vpop.f32.mrb[18].mxu0  ;;  %v2324_v40 = vpop.f32.mrb[18].mxu1  ;;  %v3899_v28 = vadd.f32 %v2322_v13, %v4803_v61 }
 0x58c   :  { %v3730_v41 = vmul.f32 -1.442695, %v3866_v12  ;;  %v3868_v44 = vadd.f32 %v2281_v37, %v4793_v16  ;;  %v2283_v14 = vpop.f32.mrb[19].mxu0  ;;  %v2326_v18 = vpop.f32.mrb[19].mxu1  ;;  %v3900_v27 = vadd.f32 %v2324_v40, %v4800_v32  ;;  %v3732_v29 = vmul.f32 -1.442695, %v3898_v24 }
 0x58d   :  { %v3731_v19 = vmul.f32 -1.442695, %v3867_v36  ;;  %v3869_v38 = vadd.f32 %v2283_v14, %v4795_v17  ;;  %v3901_v45 = vadd.f32 %v2326_v18, %v4803_v61 }
 0x58e   :  { %4281 = vpow2.f32 %v3730_v41  ;;  %v3733_v20 = vmul.f32 -1.442695, %v3868_v44  ;;  %v3735_v22 = vmul.f32 -1.442695, %v3900_v27 }
 0x58f   :  { %v3734_v21 = vmul.f32 -1.442695, %v3869_v38  ;;  %4283 = vpow2.f32 %v3731_v19 }
 0x590   :  { %4285 = vpow2.f32 %v3733_v20 }
 0x591   :  { %4287 = vpow2.f32 %v3734_v21 }
 0x592   :  { %4289 = vtanh.f32 %v3899_v28 }
 0x593   :  { %4291 = vpow2.f32 %v3732_v29 }
 0x594   :  { %4293 = vpow2.f32 %v3735_v22 }
 0x598   :  { %v4282_v30 = vpop.eup %4281 }
 0x599   :  { %v2355_v23 = vadd.f32 1.0, %v4282_v30  ;;  %v4284_v9 = vpop.eup %4283 }
 0x59a   :  { %v4286_v11 = vpop.eup %4285  ;;  %v2356_v26 = vadd.f32 1.0, %v4284_v9 }
 0x59b   :  { %4295 = vrcp.f32 %v2355_v23  ;;  %v2358_v10 = vadd.f32 1.0, %v4286_v11  ;;  %v4288_v12 = vpop.eup %4287 }
 0x59c   :  { %4297 = vtanh.f32 %v3901_v45  ;;  %v2359_v15 = vadd.f32 1.0, %v4288_v12  ;;  %v4290_v13 = vpop.eup %4289 }
 0x59d   :  { %4299 = vrcp.f32 %v2356_v26  ;;  %v4292_v36 = vpop.eup %4291 }
 0x59e   :  { %4301 = vrcp.f32 %v2358_v10  ;;  %v4294_v37 = vpop.eup %4293  ;;  %v2357_v18 = vadd.f32 1.0, %v4292_v36 }
 0x59f   :  { %4303 = vrcp.f32 %v2359_v15  ;;  %v2360_v27 = vadd.f32 1.0, %v4294_v37 }
 0x5a0   :  { %4305 = vrcp.f32 %v2357_v18 }
 0x5a5   :  { %v4296_v40 = vpop.eup %4295 }
 0x5a6   :  { %v4298_v41 = vpop.eup %4297  ;;  %v2377_v44 = vmul.f32 %v4296_v40, %v4290_v13 }
 0x5a7   :  { %v4300_v14 = vpop.eup %4299 }
 0x5a8   :  { %v4302_v19 = vpop.eup %4301  ;;  %v2375_v38 = vmul.f32 %v4300_v14, %v5022_v34 }
 0x5a9   :  { %v2378_v20 = vmul.f32 %v4302_v19, %v4298_v41  ;;  %v4304_v21 = vpop.eup %4303 }
 0x5aa   :  { %v5072_v24 = vadd.f32 %v2377_v44, %v2375_v38  ;;  %v2376_v28 = vmul.f32 %v4304_v21, %v5026_v43  ;;  %v4306_v22 = vpop.eup %4305 }
 0x5ac   :  { %4307 = vtanh.f32 %v5072_v24  ;;  %v5076_v29 = vadd.f32 %v2378_v20, %v2376_v28 }
 0x5ad   :  { %4309 = vrcp.f32 %v2360_v27 }
 0x5ae   :  { %4311 = vtanh.f32 %v5076_v29 }
 0x5b6   :  { %v4308_v30 = vpop.eup %4307 }
 0x5b7   :  { %v2383_v45 = vmul.f32 %v4308_v30, %v4306_v22  ;;  %v4310_v23 = vpop.eup %4309 }
 0x5b8   :  { %v4312_v34 = vpop.eup %4311 }
 0x5b9   :  { %2386 = vst [vmem:[#allocation11 + $0x40] sm:$0xff] %v2383_v45  ;;  %v2384_v9 = vmul.f32 %v4312_v34, %v4310_v23 }
 0x5bb   :  { %2387 = vst [vmem:[#allocation11 + $0x48] sm:$0xff] %v2384_v9  ;;  %v2399_v11 = vpack.c.bf16 %v2384_v9, %v2383_v45 }
 0x5bd   :  { %2625 = vmatmul.mubr.bf16.vlgmr.msra.gmra.mrb[20].mxu0 %v2399_v11  ;;  %2668 = vmatmul.mubr.bf16.vlgmr.msra.gmra.mrb[20].mxu1 %v2399_v11 }
 0x5be   :  { %2942 = vmatpush1.bf16.msra.mxu0 %v4883_v39  ;;  %2985 = vmatpush1.bf16.msra.mxu1 %v4935_v49 }
 0x5bf   :  { %2943 = vmatprep.subr.bf16.mxu0 %v4887_v42  ;;  %2986 = vmatprep.subr.bf16.mxu1 %v4939_v50 }
 0x5c0   :  { %2973 = vmatprep.mubr.bf16.mxu0 %v4556_v0  ;;  %3016 = vmatprep.mubr.bf16.mxu1 %v4556_v0 }
 0x5c2   :  { %2944 = vmatpush1.bf16.msra.mxu0 %v4889_v46  ;;  %2987 = vmatpush1.bf16.msra.mxu1 %v4941_v51 }
 0x5c3   :  { %2945 = vmatprep.subr.bf16.mxu0 %v4893_v47  ;;  %2988 = vmatprep.subr.bf16.mxu1 %v4945_v53 }
 0x5c6   :  { %2946 = vmatpush1.bf16.msra.mxu0 %v4895_v48  ;;  %2989 = vmatpush1.bf16.msra.mxu1 %v4947_v54 }
 0x5c7   :  { %2947 = vmatprep.subr.bf16.mxu0 %v4951_v55  ;;  %2990 = vmatprep.subr.bf16.mxu1 %v4953_v56 }
 0x5ca   :  { %2948 = vmatpush1.bf16.msra.mxu0 %v4955_v57  ;;  %2991 = vmatpush1.bf16.msra.mxu1 %v4957_v58 }
 0x5cb   :  { %2949 = vmatprep.subr.bf16.mxu0 %v4965_v60  ;;  %2992 = vmatprep.subr.bf16.mxu1 %v4969_v63 }
 0x5ce   :  { %2950 = vmatpush1.bf16.msra.mxu0 %v4963_v59  ;;  %2993 = vmatpush1.bf16.msra.mxu1 %v4967_v62 }
 0x5cf   :  { %2951 = vmatprep.subr.bf16.mxu0 %v4971_v1  ;;  %2994 = vmatprep.subr.bf16.mxu1 %v4974_v2 }
 0x5d2   :  { %2952 = vmatpush1.bf16.msra.mxu0 %v4978_v3  ;;  %2995 = vmatpush1.bf16.msra.mxu1 %v4982_v4 }
 0x5d3   :  { %2953 = vmatprep.subr.bf16.mxu0 %v4984_v5  ;;  %2996 = vmatprep.subr.bf16.mxu1 %v4987_v7 }
 0x5d6   :  { %2954 = vmatpush1.bf16.msra.mxu0 %v4990_v31  ;;  %2997 = vmatpush1.bf16.msra.mxu1 %v4994_v33 }
 0x5d7   :  { %2955 = vmatprep.subr.bf16.mxu0 %v4996_v35  ;;  %2998 = vmatprep.subr.bf16.mxu1 %v4999_v52 }
 0x5da   :  { %2956 = vmatpush1.bf16.msra.mxu0 %v5002_v6  ;;  %2999 = vmatpush1.bf16.msra.mxu1 %v5006_v8 }
 0x5db   :  { %3333 = vmatprep.subr.bf16.mxu1 %v4933_v25 }
 0x690   :  { %v2626_v39 = vpop.f32.mrb[20].mxu0  ;;  %v2669_v42 = vpop.f32.mrb[20].mxu1 }
 0x691   :  { %v3870_v46 = vadd.f32 %v2626_v39, %v4793_v16  ;;  %v2628_v47 = vpop.f32.mrb[21].mxu0  ;;  %v2671_v48 = vpop.f32.mrb[21].mxu1  ;;  %v3902_v44 = vadd.f32 %v2669_v42, %v4800_v32 }
 0x692   :  { %v3871_v43 = vadd.f32 %v2628_v47, %v4795_v17  ;;  %v2630_v26 = vpop.f32.mrb[22].mxu0  ;;  %v2673_v10 = vpop.f32.mrb[22].mxu1  ;;  %v3903_v18 = vadd.f32 %v2671_v48, %v4803_v61 }
 0x693   :  { %v3768_v12 = vmul.f32 -1.442695, %v3870_v46  ;;  %v3872_v15 = vadd.f32 %v2630_v26, %v4793_v16  ;;  %v2632_v13 = vpop.f32.mrb[23].mxu0  ;;  %v2675_v36 = vpop.f32.mrb[23].mxu1  ;;  %v3904_v14 = vadd.f32 %v2673_v10, %v4800_v32  ;;  %v3770_v19 = vmul.f32 -1.442695, %v3902_v44 }
 0x694   :  { %v3769_v37 = vmul.f32 -1.442695, %v3871_v43  ;;  %v3873_v40 = vadd.f32 %v2632_v13, %v4795_v17  ;;  %v3905_v21 = vadd.f32 %v2675_v36, %v4803_v61 }
 0x695   :  { %4313 = vpow2.f32 %v3768_v12  ;;  %v3771_v25 = vmul.f32 -1.442695, %v3872_v15  ;;  %v3773_v38 = vmul.f32 -1.442695, %v3904_v14 }
 0x696   :  { %v3772_v41 = vmul.f32 -1.442695, %v3873_v40  ;;  %4315 = vpow2.f32 %v3769_v37 }
 0x697   :  { %4317 = vpow2.f32 %v3771_v25 }
 0x698   :  { %4319 = vpow2.f32 %v3772_v41 }
 0x699   :  { %4321 = vtanh.f32 %v3903_v18 }
 0x69a   :  { %4323 = vpow2.f32 %v3770_v19 }
 0x69b   :  { %4325 = vpow2.f32 %v3773_v38 }
 0x69f   :  { %v4314_v20 = vpop.eup %4313 }
 0x6a0   :  { %v2704_v27 = vadd.f32 1.0, %v4314_v20  ;;  %v4316_v28 = vpop.eup %4315 }
 0x6a1   :  { %v4318_v22 = vpop.eup %4317  ;;  %v2705_v30 = vadd.f32 1.0, %v4316_v28 }
 0x6a2   :  { %4327 = vrcp.f32 %v2704_v27  ;;  %v2707_v45 = vadd.f32 1.0, %v4318_v22  ;;  %v4320_v23 = vpop.eup %4319 }
 0x6a3   :  { %4329 = vtanh.f32 %v3905_v21  ;;  %v2708_v34 = vadd.f32 1.0, %v4320_v23  ;;  %v4322_v9 = vpop.eup %4321 }
 0x6a4   :  { %4331 = vrcp.f32 %v2705_v30  ;;  %v4324_v11 = vpop.eup %4323 }
 0x6a5   :  { %4333 = vrcp.f32 %v2707_v45  ;;  %v4326_v39 = vpop.eup %4325  ;;  %v2706_v43 = vadd.f32 1.0, %v4324_v11 }
 0x6a6   :  { %4335 = vrcp.f32 %v2708_v34  ;;  %v2709_v36 = vadd.f32 1.0, %v4326_v39 }
 0x6a7   :  { %4337 = vrcp.f32 %v2706_v43 }
 0x6ac   :  { %v4328_v42 = vpop.eup %4327 }
 0x6ad   :  { %v4330_v46 = vpop.eup %4329  ;;  %v2726_v47 = vmul.f32 %v4328_v42, %v4322_v9 }
 0x6ae   :  { %v4332_v48 = vpop.eup %4331 }
 0x6af   :  { %v4334_v26 = vpop.eup %4333  ;;  %v2724_v10 = vmul.f32 %v4332_v48, %v5072_v24 }
 0x6b0   :  { %v2727_v12 = vmul.f32 %v4334_v26, %v4330_v46  ;;  %v4336_v15 = vpop.eup %4335 }
 0x6b1   :  { %v5121_v13 = vadd.f32 %v2726_v47, %v2724_v10  ;;  %v2725_v37 = vmul.f32 %v4336_v15, %v5076_v29  ;;  %v4338_v25 = vpop.eup %4337 }
 0x6b3   :  { %4339 = vtanh.f32 %v5121_v13  ;;  %v5125_v40 = vadd.f32 %v2727_v12, %v2725_v37 }
 0x6b4   :  { %4341 = vrcp.f32 %v2709_v36 }
 0x6b5   :  { %4343 = vtanh.f32 %v5125_v40 }
 0x6bd   :  { %v4340_v41 = vpop.eup %4339 }
 0x6be   :  { %v2732_v44 = vmul.f32 %v4340_v41, %v4338_v25  ;;  %v4342_v14 = vpop.eup %4341 }
 0x6bf   :  { %v4344_v24 = vpop.eup %4343 }
 0x6c0   :  { %2735 = vst [vmem:[#allocation11 + $0x50] sm:$0xff] %v2732_v44  ;;  %v2733_v18 = vmul.f32 %v4344_v24, %v4342_v14 }
 0x6c2   :  { %2736 = vst [vmem:[#allocation11 + $0x58] sm:$0xff] %v2733_v18  ;;  %v2748_v19 = vpack.c.bf16 %v2733_v18, %v2732_v44 }
 0x6c4   :  { %2974 = vmatmul.mubr.bf16.vlgmr.msra.gmra.mrb[24].mxu0 %v2748_v19  ;;  %3017 = vmatmul.mubr.bf16.vlgmr.msra.gmra.mrb[24].mxu1 %v2748_v19 }
 0x6c5   :  { %3334 = vmatpush1.bf16.msra.mxu1 %v4935_v49  ;;  %3322 = vmatprep.mubr.bf16.mxu0 %v4556_v0  ;;  %v4144_v49 = vld [vmem:[#allocation10] ss:$16 sps:$4 sm:$0xff]  }
 0x6c6   :  { %3335 = vmatprep.subr.bf16.mxu1 %v4939_v50  ;;  %3365 = vmatprep.mubr.bf16.mxu1 %v4556_v0  ;;  %v4146_v0 = vld [vmem:[#allocation10 + $0x4] ss:$16 sps:$4 sm:$0xff]  }
 0x6c7   :  { %3290 = vmatprep.subr.bf16.mxu0 %v4146_v0  ;;  %v4149_v50 = vld [vmem:[#allocation10 + $0x24] ss:$16 sps:$4 sm:$0xff]  }
 0x6c8   :  { %3291 = vmatpush1.bf16.msra.mxu0 %v4144_v49 }
 0x6c9   :  { %3336 = vmatpush1.bf16.msra.mxu1 %v4941_v51  ;;  %v4147_v51 = vld [vmem:[#allocation10 + $0x20] ss:$16 sps:$4 sm:$0xff]   ;;  %3292 = vmatprep.subr.bf16.mxu0 %v4149_v50 }
 0x6ca   :  { %3337 = vmatprep.subr.bf16.mxu1 %v4945_v53  ;;  %v4152_v53 = vld [vmem:[#allocation10 + $0x44] ss:$16 sps:$4 sm:$0xff]  }
 0x6cc   :  { %3293 = vmatpush1.bf16.msra.mxu0 %v4147_v51 }
 0x6cd   :  { %3338 = vmatpush1.bf16.msra.mxu1 %v4947_v54  ;;  %v4150_v54 = vld [vmem:[#allocation10 + $0x40] ss:$16 sps:$4 sm:$0xff]   ;;  %3294 = vmatprep.subr.bf16.mxu0 %v4152_v53 }
 0x6ce   :  { %3339 = vmatprep.subr.bf16.mxu1 %v4953_v56 }
 0x6d0   :  { %3295 = vmatpush1.bf16.msra.mxu0 %v4150_v54 }
 0x6d1   :  { %3340 = vmatpush1.bf16.msra.mxu1 %v4957_v58  ;;  %3296 = vmatprep.subr.bf16.mxu0 %v4951_v55 }
 0x6d2   :  { %3341 = vmatprep.subr.bf16.mxu1 %v4969_v63 }
 0x6d4   :  { %3297 = vmatpush1.bf16.msra.mxu0 %v4955_v57 }
 0x6d5   :  { %3342 = vmatpush1.bf16.msra.mxu1 %v4967_v62  ;;  %3298 = vmatprep.subr.bf16.mxu0 %v4965_v60 }
 0x6d6   :  { %3343 = vmatprep.subr.bf16.mxu1 %v4974_v2 }
 0x6d8   :  { %3299 = vmatpush1.bf16.msra.mxu0 %v4963_v59 }
 0x6d9   :  { %3344 = vmatpush1.bf16.msra.mxu1 %v4982_v4  ;;  %3300 = vmatprep.subr.bf16.mxu0 %v4971_v1 }
 0x6da   :  { %3345 = vmatprep.subr.bf16.mxu1 %v4987_v7 }
 0x6dc   :  { %3301 = vmatpush1.bf16.msra.mxu0 %v4978_v3 }
 0x6dd   :  { %3346 = vmatpush1.bf16.msra.mxu1 %v4994_v33  ;;  %3302 = vmatprep.subr.bf16.mxu0 %v4984_v5 }
 0x6de   :  { %3347 = vmatprep.subr.bf16.mxu1 %v4999_v52 }
 0x6e0   :  { %3303 = vmatpush1.bf16.msra.mxu0 %v4990_v31 }
 0x6e1   :  { %3348 = vmatpush1.bf16.msra.mxu1 %v5006_v8  ;;  %3304 = vmatprep.subr.bf16.mxu0 %v4996_v35 }
 0x6e4   :  { %3305 = vmatpush1.bf16.msra.mxu0 %v5002_v6 }
 0x797   :  { %v2975_v56 = vpop.f32.mrb[24].mxu0  ;;  %v3018_v55 = vpop.f32.mrb[24].mxu1 }
 0x798   :  { %v3874_v57 = vadd.f32 %v2975_v56, %v4793_v16  ;;  %v2977_v58 = vpop.f32.mrb[25].mxu0  ;;  %v3020_v60 = vpop.f32.mrb[25].mxu1  ;;  %v3906_v35 = vadd.f32 %v3018_v55, %v4800_v32 }
 0x799   :  { %v3875_v59 = vadd.f32 %v2977_v58, %v4795_v17  ;;  %v2979_v62 = vpop.f32.mrb[26].mxu0  ;;  %v3022_v63 = vpop.f32.mrb[26].mxu1  ;;  %v3907_v6 = vadd.f32 %v3020_v60, %v4803_v61 }
 0x79a   :  { %v3806_v1 = vmul.f32 -1.442695, %v3874_v57  ;;  %v3876_v2 = vadd.f32 %v2979_v62, %v4793_v16  ;;  %v2981_v3 = vpop.f32.mrb[27].mxu0  ;;  %v3024_v4 = vpop.f32.mrb[27].mxu1  ;;  %v3908_v52 = vadd.f32 %v3022_v63, %v4800_v32  ;;  %v3808_v8 = vmul.f32 -1.442695, %v3906_v35 }
 0x79b   :  { %v3807_v5 = vmul.f32 -1.442695, %v3875_v59  ;;  %v3877_v7 = vadd.f32 %v2981_v3, %v4795_v17  ;;  %v3909_v20 = vadd.f32 %v3024_v4, %v4803_v61 }
 0x79c   :  { %4345 = vpow2.f32 %v3806_v1  ;;  %v3809_v31 = vmul.f32 -1.442695, %v3876_v2  ;;  %v3811_v29 = vmul.f32 -1.442695, %v3908_v52 }
 0x79d   :  { %v3810_v33 = vmul.f32 -1.442695, %v3877_v7  ;;  %4347 = vpow2.f32 %v3807_v5 }
 0x79e   :  { %4349 = vpow2.f32 %v3809_v31 }
 0x79f   :  { %4351 = vpow2.f32 %v3810_v33 }
 0x7a0   :  { %4353 = vtanh.f32 %v3907_v6 }
 0x7a1   :  { %4355 = vpow2.f32 %v3808_v8 }
 0x7a2   :  { %4357 = vpow2.f32 %v3811_v29 }
 0x7a6   :  { %v4346_v38 = vpop.eup %4345 }
 0x7a7   :  { %v3053_v21 = vadd.f32 1.0, %v4346_v38  ;;  %v4348_v27 = vpop.eup %4347 }
 0x7a8   :  { %v4350_v28 = vpop.eup %4349  ;;  %v3054_v22 = vadd.f32 1.0, %v4348_v27 }
 0x7a9   :  { %4359 = vrcp.f32 %v3053_v21  ;;  %v3056_v30 = vadd.f32 1.0, %v4350_v28  ;;  %v4352_v45 = vpop.eup %4351 }
 0x7aa   :  { %4361 = vtanh.f32 %v3909_v20  ;;  %v3057_v23 = vadd.f32 1.0, %v4352_v45  ;;  %v4354_v34 = vpop.eup %4353 }
 0x7ab   :  { %4363 = vrcp.f32 %v3054_v22  ;;  %v4356_v9 = vpop.eup %4355 }
 0x7ac   :  { %4365 = vrcp.f32 %v3056_v30  ;;  %v4358_v11 = vpop.eup %4357  ;;  %v3055_v48 = vadd.f32 1.0, %v4356_v9 }
 0x7ad   :  { %4367 = vrcp.f32 %v3057_v23  ;;  %v3058_v36 = vadd.f32 1.0, %v4358_v11 }
 0x7ae   :  { %4369 = vrcp.f32 %v3055_v48 }
 0x7b3   :  { %v4360_v39 = vpop.eup %4359 }
 0x7b4   :  { %v4362_v42 = vpop.eup %4361  ;;  %v3075_v46 = vmul.f32 %v4360_v39, %v4354_v34 }
 0x7b5   :  { %v4364_v47 = vpop.eup %4363 }
 0x7b6   :  { %v4366_v43 = vpop.eup %4365  ;;  %v3073_v26 = vmul.f32 %v4364_v47, %v5121_v13 }
 0x7b7   :  { %v3076_v10 = vmul.f32 %v4366_v43, %v4362_v42  ;;  %v4368_v12 = vpop.eup %4367 }
 0x7b8   :  { %v5164_v15 = vadd.f32 %v3075_v46, %v3073_v26  ;;  %v3074_v37 = vmul.f32 %v4368_v12, %v5125_v40  ;;  %v4370_v41 = vpop.eup %4369 }
 0x7ba   :  { %4371 = vtanh.f32 %v5164_v15  ;;  %v5168_v25 = vadd.f32 %v3076_v10, %v3074_v37 }
 0x7bb   :  { %4373 = vrcp.f32 %v3058_v36 }
 0x7bc   :  { %4375 = vtanh.f32 %v5168_v25 }
 0x7c4   :  { %v4372_v44 = vpop.eup %4371 }
 0x7c5   :  { %v3081_v14 = vmul.f32 %v4372_v44, %v4370_v41  ;;  %v4374_v24 = vpop.eup %4373 }
 0x7c6   :  { %v4376_v13 = vpop.eup %4375 }
 0x7c7   :  { %3084 = vst [vmem:[#allocation11 + $0x60] sm:$0xff] %v3081_v14  ;;  %v3082_v18 = vmul.f32 %v4376_v13, %v4374_v24 }
 0x7c9   :  { %3085 = vst [vmem:[#allocation11 + $0x68] sm:$0xff] %v3082_v18  ;;  %v3097_v19 = vpack.c.bf16 %v3082_v18, %v3081_v14 }
 0x7cb   :  { %3323 = vmatmul.mubr.bf16.vlgmr.msra.gmra.mrb[28].mxu0 %v3097_v19  ;;  %3366 = vmatmul.mubr.bf16.vlgmr.msra.gmra.mrb[28].mxu1 %v3097_v19 }
 0x89e   :  { %v3324_v0 = vpop.f32.mrb[28].mxu0  ;;  %v3367_v40 = vpop.f32.mrb[28].mxu1 }
 0x89f   :  { %v3878_v49 = vadd.f32 %v3324_v0, %v4793_v16  ;;  %v3326_v50 = vpop.f32.mrb[29].mxu0  ;;  %v3369_v51 = vpop.f32.mrb[29].mxu1  ;;  %v3910_v2 = vadd.f32 %v3367_v40, %v4800_v32 }
 0x8a0   :  { %v3879_v53 = vadd.f32 %v3326_v50, %v4795_v17  ;;  %v3328_v54 = vpop.f32.mrb[30].mxu0  ;;  %v3371_v56 = vpop.f32.mrb[30].mxu1  ;;  %v3911_v4 = vadd.f32 %v3369_v51, %v4803_v61 }
 0x8a1   :  { %v3844_v55 = vmul.f32 -1.442695, %v3878_v49  ;;  %v3880_v57 = vadd.f32 %v3328_v54, %v4793_v16  ;;  %v3330_v58 = vpop.f32.mrb[31].mxu0  ;;  %v3373_v60 = vpop.f32.mrb[31].mxu1  ;;  %v3912_v3 = vadd.f32 %v3371_v56, %v4800_v32  ;;  %v3846_v5 = vmul.f32 -1.442695, %v3910_v2 }
 0x8a2   :  { %v3845_v59 = vmul.f32 -1.442695, %v3879_v53  ;;  %v3881_v62 = vadd.f32 %v3330_v58, %v4795_v17  ;;  %v3913_v31 = vadd.f32 %v3373_v60, %v4803_v61 }
 0x8a3   :  { %4377 = vpow2.f32 %v3844_v55  ;;  %v3847_v63 = vmul.f32 -1.442695, %v3880_v57  ;;  %v3849_v7 = vmul.f32 -1.442695, %v3912_v3 }
 0x8a4   :  { %v3848_v1 = vmul.f32 -1.442695, %v3881_v62  ;;  %4379 = vpow2.f32 %v3845_v59 }
 0x8a5   :  { %4381 = vpow2.f32 %v3847_v63 }
 0x8a6   :  { %4383 = vpow2.f32 %v3848_v1 }
 0x8a7   :  { %4385 = vtanh.f32 %v3911_v4 }
 0x8a8   :  { %4387 = vpow2.f32 %v3846_v5 }
 0x8a9   :  { %4389 = vpow2.f32 %v3849_v7 }
 0x8ad   :  { %v4378_v16 = vpop.eup %4377 }
 0x8ae   :  { %v3402_v33 = vadd.f32 1.0, %v4378_v16  ;;  %v4380_v17 = vpop.eup %4379 }
 0x8af   :  { %v4382_v35 = vpop.eup %4381  ;;  %v3403_v52 = vadd.f32 1.0, %v4380_v17 }
 0x8b0   :  { %4391 = vrcp.f32 %v3402_v33  ;;  %v3405_v6 = vadd.f32 1.0, %v4382_v35  ;;  %v4384_v8 = vpop.eup %4383 }
 0x8b1   :  { %4393 = vtanh.f32 %v3913_v31  ;;  %v3406_v32 = vadd.f32 1.0, %v4384_v8  ;;  %v4386_v29 = vpop.eup %4385 }
 0x8b2   :  { %4395 = vrcp.f32 %v3403_v52  ;;  %v4388_v38 = vpop.eup %4387 }
 0x8b3   :  { %4397 = vrcp.f32 %v3405_v6  ;;  %v4390_v20 = vpop.eup %4389  ;;  %v3404_v22 = vadd.f32 1.0, %v4388_v38 }
 0x8b4   :  { %4399 = vrcp.f32 %v3406_v32  ;;  %v3407_v11 = vadd.f32 1.0, %v4390_v20 }
 0x8b5   :  { %4401 = vrcp.f32 %v3404_v22 }
 0x8ba   :  { %v4392_v21 = vpop.eup %4391 }
 0x8bb   :  { %v4394_v27 = vpop.eup %4393  ;;  %v3424_v61 = vmul.f32 %v4392_v21, %v4386_v29 }
 0x8bc   :  { %v4396_v28 = vpop.eup %4395 }
 0x8bd   :  { %v4398_v30 = vpop.eup %4397  ;;  %v3422_v45 = vmul.f32 %v4396_v28, %v5164_v15 }
 0x8be   :  { %v3425_v23 = vmul.f32 %v4398_v30, %v4394_v27  ;;  %v4400_v34 = vpop.eup %4399 }
 0x8bf   :  { %v3426_v9 = vadd.f32 %v3424_v61, %v3422_v45  ;;  %v3423_v39 = vmul.f32 %v4400_v34, %v5168_v25  ;;  %v4402_v46 = vpop.eup %4401 }
 0x8c1   :  { %4403 = vtanh.f32 %v3426_v9  ;;  %3448 = vst [vmem:[#allocation14] sm:$0xff] %v3426_v9  ;;  %v3427_v42 = vadd.f32 %v3425_v23, %v3423_v39 }
 0x8c2   :  { %4405 = vrcp.f32 %v3407_v11 }
 0x8c3   :  { %4407 = vtanh.f32 %v3427_v42  ;;  %3449 = vst [vmem:[#allocation14 + $0x8] sm:$0xff] %v3427_v42 }
 0x8cb   :  { %v4404_v47 = vpop.eup %4403 }
 0x8cc   :  { %v3430_v48 = vmul.f32 %v4404_v47, %v4402_v46  ;;  %v4406_v43 = vpop.eup %4405 }
 0x8cd   :  { %v4408_v26 = vpop.eup %4407 }
 0x8ce   :  { %3433 = vst [vmem:[#allocation11 + $0x70] sm:$0xff] %v3430_v48  ;;  %3444 = vst [vmem:[#allocation12] sm:$0xff] %v3430_v48  ;;  %v3431_v10 = vmul.f32 %v4408_v26, %v4406_v43 }
 0x8d0   :  { %3434 = vst [vmem:[#allocation11 + $0x78] sm:$0xff] %v3431_v10  ;;  %3445 = vst [vmem:[#allocation12 + $0x8] sm:$0xff] %v3431_v10 }
 0x8d1   :  { %4486 = shalt.err (!%p4483_p0)
}
 0x8d2   :  { %s4487_s20 = scalar_lea.hbm %s5245_s5, 256 }
 0x8d3   :  { %p4488_p1 = scmp.ne.s32.totalorder %s5245_s5, %s4487_s20  ;;  %p4491_p2 = scmp.lt.u32.totalorder %s4487_s20, %s5245_s5 }
 0x8d5   :  { %p4493_p3 = pnand %p4491_p2, %p4488_p1 }
 0x8d7   :  { %4496 = shalt.err (!%p4493_p3)
}
 0x8d8   :  { %s4561_s24 = smov 128   ;;  %s4562_s25 = smov 8  }
 0x8d9   :  { %3473 = dma.vmem_to_hbm [thread:$0]  %s3468_s8, 256, %s5245_s5, [#allocation13], %s4561_s24, %s4561_s24, %s4562_s25  }
 0x8da   :  { %s4497_s28 = scalar_lea.vmem %s5181_s14, 2048  ;;  %p4502_p5 = scmp.lt.s32.totalorder %s5181_s14, %s5181_s14 }
 0x8db   :  { %p4498_p4 = scmp.ne.s32.totalorder %s5181_s14, %s4497_s28  ;;  %p4503_p6 = scmp.lt.s32.totalorder %s4497_s28, %s4497_s28 }
 0x8dd   :  { %p4504_p7 = por %p4503_p6, %p4502_p5 }
 0x8df   :  { %p4505_p8 = pnand %p4504_p7, %p4498_p4 }
 0x8e1   :  { %4508 = shalt.err (!%p4505_p8)
}
 0x8e2   :  { %s4509_s9 = scalar_lea.hbm %s5244_s4, 2048 }
 0x8e3   :  { %p4510_p9 = scmp.ne.s32.totalorder %s5244_s4, %s4509_s9  ;;  %p4513_p10 = scmp.lt.u32.totalorder %s4509_s9, %s5244_s4 }
 0x8e5   :  { %p4515_p11 = pnand %p4513_p10, %p4510_p9 }
 0x8e7   :  { %4518 = shalt.err (!%p4515_p11)
}
 0x8e8   :  { %3461 = dma.vmem_to_hbm [thread:$0]  %s5181_s14, 2048, %s5244_s4, [#allocation7], %s4561_s24, %s4561_s24, %s4562_s25  }
 0x8e9   :  { %s4519_s7 = scalar_lea.vmem %s5183_s16, 256  ;;  %p4524_p13 = scmp.lt.s32.totalorder %s5183_s16, %s5183_s16 }
 0x8ea   :  { %p4520_p12 = scmp.ne.s32.totalorder %s5183_s16, %s4519_s7  ;;  %p4525_p0 = scmp.lt.s32.totalorder %s4519_s7, %s4519_s7 }
 0x8ec   :  { %p4526_p1 = por %p4525_p0, %p4524_p13 }
 0x8ee   :  { %p4527_p2 = pnand %p4526_p1, %p4520_p12 }
 0x8f0   :  { %4530 = shalt.err (!%p4527_p2)
}
 0x8f1   :  { %s4531_s13 = scalar_lea.hbm %s5246_s6, 256 }
 0x8f2   :  { %p4532_p3 = scmp.ne.s32.totalorder %s5246_s6, %s4531_s13  ;;  %p4535_p4 = scmp.lt.u32.totalorder %s4531_s13, %s5246_s6 }
 0x8f4   :  { %p4537_p5 = pnand %p4535_p4, %p4532_p3 }
 0x8f6   :  { %4540 = shalt.err (!%p4537_p5)
}
 0x8f7   :  { %3485 = dma.vmem_to_hbm [thread:$0]  %s5183_s16, 256, %s5246_s6, [#allocation13], %s4561_s24, %s4561_s24, %s4562_s25  }
 0x8f8   :  { %4545 = dma.done.wait [#allocation7], 2048  }
 0x8f9   :  { %4546 = vsyncadd [#allocation7], 4294965248 }
 0x8fa   :  { %4547 = dma.done.wait [#allocation13], 512  }
 0x8fb   :  { %4548 = vsyncadd [#allocation13], 4294966784 }
 0x8fc   :  { %3495 = vsyncpa [#allocation6], 1 }
 0x8fd   :  { %3496 = vsyncpa [#allocation9], 1 }
 0x8fe   :  { %3497 = vsyncpa [#allocation7], 1 }
 0x8ff   :  { %3498 = vsyncpa [#allocation13], 1 }

</bundles_post_ra>
